<compile_context>
chip_gen: v7x
topology: tpu7x:2x2x1
jax: 0.10.0
libtpu: 0.0.40
codegen_flags: <defaults>
</compile_context>

<pallas_src>
import functools

import jax
import jax.numpy as jnp
from jax.experimental import pallas as pl
from jax.experimental.pallas import tpu as pltpu

NEG_SLOPE = 0.25             # LeakyReLU(0.25)
COMPUTE_DTYPE = jnp.bfloat16
VMEM_BUDGET = 48 << 20       # per-step working-set target (fits v7x 64 MiB VMEM)


def _leaky(x):
    # exact for 0 < slope < 1
    return jnp.maximum(x, NEG_SLOPE * x)


def _halo(W):
    # halo >= W+1 lanes, rounded up to 128 so the scratch-center stores stay
    # lane-aligned (the shifted window *loads* may be unaligned; that's fine).
    return ((W + 1 + 127) // 128) * 128


def _pick_num_blocks(n_imgs, lanes_per_img, bytes_per_lane, budget=VMEM_BUDGET):
    """Split whole images into lane blocks: smallest block count >=2 whose
    working set fits the VMEM budget; otherwise the most blocks available."""
    feasible = []
    for nb in range(1, n_imgs + 1):
        if n_imgs % nb:
            continue
        lb = (n_imgs // nb) * lanes_per_img
        if nb != 1 and lb % 128:
            continue
        feasible.append(nb)
    for nb in feasible:
        lb = (n_imgs // nb) * lanes_per_img
        if nb >= 2 and lb * bytes_per_lane <= budget:
            return nb
    return feasible[-1] if feasible else 1
    # TODO(synk): for very large single images, tile inside an image and DMA
    # real neighbour rows into the halo instead of relying on whole-image blocks.


def _vmem_limit(est_bytes):
    # explicit scoped-VMEM limit sized to the working set (defaults are 16/32 MiB)
    return int(min(96 << 20, max(32 << 20, int(1.25 * est_bytes))))


def _stacked_weight(w, dtype):
    # HWIO (3,3,Cin,Cout) -> (Cout, 9*Cin), tap-major: column t*Cin + ci with
    # t = kh*3 + kw.  Must match the im2col slab layout inside the kernels.
    kh, kw, ci, co = w.shape
    return jnp.transpose(w, (3, 0, 1, 2)).reshape(co, kh * kw * ci).astype(dtype)


def _tap_masks_stride1(imgs_per_block, H, W, dtype):
    # per-tap validity of the shifted read, per pixel of one lane block
    row = jnp.arange(H, dtype=jnp.int32)[:, None]
    col = jnp.arange(W, dtype=jnp.int32)[None, :]
    taps = []
    for kh in range(3):
        for kw in range(3):
            oy, ox = kh - 1, kw - 1
            m = ((row + oy >= 0) & (row + oy < H) &
                 (col + ox >= 0) & (col + ox < W))
            taps.append(m.reshape(1, H * W))
    m = jnp.concatenate(taps, axis=0).astype(dtype)            # (9, H*W)
    return jnp.tile(m, (1, imgs_per_block))                    # (9, Lb)


def _tap_masks_stride2(imgs_per_block, H2, W2, dtype):
    # stride-2 conv reads its phase planes with shifts in {0, -1} only
    row = jnp.arange(H2, dtype=jnp.int32)[:, None]
    col = jnp.arange(W2, dtype=jnp.int32)[None, :]
    taps = []
    for kh in range(3):
        for kw in range(3):
            sy = -1 if kh == 0 else 0
            sx = -1 if kw == 0 else 0
            m = (row + sy >= 0) & (col + sx >= 0)
            taps.append(m.reshape(1, H2 * W2))
    m = jnp.concatenate(taps, axis=0).astype(dtype)
    return jnp.tile(m, (1, imgs_per_block))


def _space_to_depth(x_cf, n_imgs, H, W):
    # (C, N*H*W) -> (4, C, N*(H//2)*(W//2)); phase p = py*2+px holds
    # x[..., 2r+py, 2c+px].  Pure layout glue (no data expansion).
    C = x_cf.shape[0]
    H2, W2 = H // 2, W // 2
    v = x_cf.reshape(C, n_imgs, H2, 2, W2, 2)
    v = jnp.transpose(v, (3, 5, 0, 1, 2, 4))
    return v.reshape(4, C, n_imgs * H2 * W2)


# ---------------------------------------------------------------------------
# Kernel 1: fused ResBlock (conv_in, cb0, cb1, cb2 + residual), stride 1.
#   x_ref            : (Cin, Lb)        bf16 lane-dense input block (whole images)
#   m_ref            : (9, Lb)          bf16 per-tap border masks (resident)
#   w*_ref           : (Cout, 9*Cin)    bf16 stacked weights;  b*_ref: (Cout,1) f32
#   o_ref            : (base, Lb)       f32 preconv output block
#   scr_ref          : (Cmax, Lb+2*halo) bf16 halo staging buffer
#   slab_ref         : (9*Cmax, Lb)     bf16 im2col slab
# ---------------------------------------------------------------------------
def _preblock_kernel(x_ref, m_ref,
                     wi_ref, bi_ref, w0_ref, b0_ref,
                     w1_ref, b1_ref, w2_ref, b2_ref,
                     o_ref, scr_ref, slab_ref, *, W, halo):
    Lb = x_ref.shape[-1]
    cmax = scr_ref.shape[0]
    cdt = scr_ref.dtype

    # zero ONLY the halo columns (tiny); done every step because scratch is
    # per-core under megacore "parallel" sharding.
    scr_ref[:, pl.ds(0, halo)] = jnp.zeros((cmax, halo), cdt)
    scr_ref[:, pl.ds(halo + Lb, halo)] = jnp.zeros((cmax, halo), cdt)

    offs = tuple((kh - 1) * W + (kw - 1) for kh in range(3) for kw in range(3))

    def build_slab(val):
        # stage `val` behind the zero halo, then write the 9 shifted+masked
        # views as the (9*cin, Lb) im2col slab
        cin = val.shape[0]
        scr_ref[pl.ds(0, cin), pl.ds(halo, Lb)] = val
        for t, off in enumerate(offs):
            xs = scr_ref[pl.ds(0, cin), pl.ds(halo + off, Lb)]
            if t != 4:                                   # centre tap needs no mask
                xs = xs * m_ref[pl.ds(t, 1), :]
            slab_ref[pl.ds(t * cin, cin), :] = xs

    def conv(w_ref, b_ref, cin, leaky):
        acc = jnp.dot(w_ref[...], slab_ref[pl.ds(0, 9 * cin), :],
                      preferred_element_type=jnp.float32)
        acc = acc + b_ref[...]
        return _leaky(acc) if leaky else acc

    cin0 = x_ref.shape[0]
    base = o_ref.shape[0]

    build_slab(x_ref[...])                       # one slab serves conv_in AND cb0
    x_in = conv(wi_ref, bi_ref, cin0, True)      # conv_in + LeakyReLU   (f32)
    t = conv(w0_ref, b0_ref, cin0, True)         # conv_block[0] + LeakyReLU

    build_slab(t.astype(cdt))
    t = conv(w1_ref, b1_ref, base, True)         # conv_block[2] + LeakyReLU

    build_slab(t.astype(cdt))
    t = conv(w2_ref, b2_ref, base, False)        # conv_block[4]

    o_ref[...] = (t + x_in).astype(o_ref.dtype)


# ---------------------------------------------------------------------------
# Kernel 2: 3x3 stride-2 pad-1 conv on space-to-depth phase planes.
#   xp_ref : (4, Cin, Lb) bf16 phase planes (output positions only)
#   m_ref  : (9, Lb) bf16 per-tap masks;  w_ref: (Cout, 9*Cin);  b_ref: (Cout,1)
#   o_ref  : (Cout, Lb) f32
#   scr_ref: (3, Cin, halo+Lb) bf16 (only the planes ever read shifted, left halo)
#   slab_ref: (9*Cin, Lb) bf16
# ---------------------------------------------------------------------------
def _down_kernel(xp_ref, m_ref, w_ref, b_ref, o_ref, scr_ref, slab_ref,
                 *, W2, halo):
    Lb = o_ref.shape[-1]
    cin = xp_ref.shape[1]
    cdt = scr_ref.dtype

    # LEFT halo only (all shifts are {0,-1}); zeroed every step (see note above)
    scr_ref[:, :, pl.ds(0, halo)] = jnp.zeros((scr_ref.shape[0], cin, halo), cdt)

    # only phase planes 1, 2, 3 are ever read shifted -> stage just those
    for slot, p in enumerate((1, 2, 3)):
        scr_ref[slot, :, pl.ds(halo, Lb)] = xp_ref[p]

    for kh in range(3):
        for kw in range(3):
            t = kh * 3 + kw
            oy, ox = kh - 1, kw - 1
            p = (oy % 2) * 2 + (ox % 2)               # phase plane for this tap
            sy = -1 if oy < 0 else 0                  # shift inside the phase grid
            sx = -1 if ox < 0 else 0
            if sy == 0 and sx == 0:
                xs = xp_ref[p]                        # unshifted: read directly
            else:
                xs = scr_ref[p - 1, :, pl.ds(halo + sy * W2 + sx, Lb)]
                xs = xs * m_ref[pl.ds(t, 1), :]
            slab_ref[pl.ds(t * cin, cin), :] = xs

    acc = jnp.dot(w_ref[...], slab_ref[...], preferred_element_type=jnp.float32)
    o_ref[...] = (acc + b_ref[...]).astype(o_ref.dtype)


# ---------------------------------------------------------------------------
# Wrappers
# ---------------------------------------------------------------------------
def preblock_pallas(x_cf, params, n_imgs, H, W, compute_dtype=COMPUTE_DTYPE):
    """Fused ResBlock.  x_cf: (img_ch, n_imgs*H*W) bf16 -> (base, n_imgs*H*W) f32."""
    cin, L = x_cf.shape
    base = params["conv_in"][0].shape[-1]
    cmax = max(cin, base)
    lanes_per_img = H * W

    # rough per-lane VMEM working set: scratch + slab + dbuf in/out + f32 temps
    bpl = 2 * cmax + 18 * cmax + 4 * cin + 8 * base + 18 + 12 * base
    nb = _pick_num_blocks(n_imgs, lanes_per_img, bpl)
    Lb = L // nb
    halo = _halo(W)
    masks = _tap_masks_stride1(n_imgs // nb, H, W, compute_dtype)

    conv_args, conv_specs = [], []
    for name in ("conv_in", "cb0", "cb1", "cb2"):
        w, b = params[name]
        co, ci = w.shape[3], w.shape[2]
        conv_args += [_stacked_weight(w, compute_dtype),
                      b.reshape(co, 1).astype(jnp.float32)]
        conv_specs += [pl.BlockSpec((co, 9 * ci), lambda i: (0, 0)),
                       pl.BlockSpec((co, 1), lambda i: (0, 0))]

    est_vmem = Lb * bpl + 4 * cmax * halo
    flops = 2 * 9 * L * (2 * cin * base + 2 * base * base)
    bytes_acc = 2 * cin * L + 4 * base * L + 18 * Lb + sum(
        2 * int(a.size) for a in conv_args)

    kernel = functools.partial(_preblock_kernel, W=W, halo=halo)
    return pl.pallas_call(
        kernel,
        out_shape=jax.ShapeDtypeStruct((base, L), jnp.float32),
        grid=(nb,),
        in_specs=[pl.BlockSpec((cin, Lb), lambda i: (0, i)),
                  pl.BlockSpec((9, Lb), lambda i: (0, 0))] + conv_specs,
        out_specs=pl.BlockSpec((base, Lb), lambda i: (0, i)),
        scratch_shapes=[pltpu.VMEM((cmax, Lb + 2 * halo), compute_dtype),
                        pltpu.VMEM((9 * cmax, Lb), compute_dtype)],
        compiler_params=pltpu.CompilerParams(
            dimension_semantics=("parallel",),
            vmem_limit_bytes=_vmem_limit(est_vmem)),
        cost_estimate=pl.CostEstimate(flops=int(flops), transcendentals=0,
                                      bytes_accessed=int(bytes_acc)),
    )(x_cf, masks, *conv_args)


def conv_down_pallas(x_cf, w, b, n_imgs, H, W, compute_dtype=COMPUTE_DTYPE):
    """3x3 stride-2 pad-1 conv.  (Cin, n*H*W) f32 -> (Cout, n*(H//2)*(W//2)) f32."""
    assert H % 2 == 0 and W % 2 == 0
    cin, L = x_cf.shape
    cout = w.shape[-1]
    H2, W2 = H // 2, W // 2
    L2 = n_imgs * H2 * W2

    # space-to-depth phase split + bf16 cast happen in XLA (fuses with the
    # producing transpose).
    # TODO(synk): fuse down0 into the preblock epilogue (emit the phase layout
    # straight from VMEM) to remove this remaining HBM round trip.
    xp = _space_to_depth(x_cf, n_imgs, H, W).astype(compute_dtype)   # (4,cin,L2)

    bpl = 16 * cin + 6 * cin + 18 * cin + 8 * cout + 18 + 4 * cout
    nb = _pick_num_blocks(n_imgs, H2 * W2, bpl)
    Lb = L2 // nb
    halo = _halo(W2)
    masks = _tap_masks_stride2(n_imgs // nb, H2, W2, compute_dtype)
    w2d = _stacked_weight(w, compute_dtype)
    b2 = b.reshape(cout, 1).astype(jnp.float32)

    est_vmem = Lb * bpl + 6 * cin * halo
    kernel = functools.partial(_down_kernel, W2=W2, halo=halo)
    return pl.pallas_call(
        kernel,
        out_shape=jax.ShapeDtypeStruct((cout, L2), jnp.float32),
        grid=(nb,),
        in_specs=[pl.BlockSpec((4, cin, Lb), lambda i: (0, 0, i)),
                  pl.BlockSpec((9, Lb), lambda i: (0, 0)),
                  pl.BlockSpec((cout, 9 * cin), lambda i: (0, 0)),
                  pl.BlockSpec((cout, 1), lambda i: (0, 0))],
        out_specs=pl.BlockSpec((cout, Lb), lambda i: (0, i)),
        scratch_shapes=[pltpu.VMEM((3, cin, halo + Lb), compute_dtype),
                        pltpu.VMEM((9 * cin, Lb), compute_dtype)],
        compiler_params=pltpu.CompilerParams(
            dimension_semantics=("parallel",),
            vmem_limit_bytes=_vmem_limit(est_vmem)),
        cost_estimate=pl.CostEstimate(
            flops=int(2 * 9 * cin * cout * L2), transcendentals=0,
            bytes_accessed=int(2 * 4 * cin * L2 + 4 * cout * L2 + 2 * w2d.size)),
    )(xp, masks, w2d, b2)


# ---------------------------------------------------------------------------
# ImageEncoder forward (matches the PyTorch module semantics)
# ---------------------------------------------------------------------------
def image_encoder(img_nchw, params, img_ch, compute_dtype=COMPUTE_DTYPE):
    n, C, h, w = img_nchw.shape
    groups = C // img_ch
    # torch.cat(img.split(img_ch, 1), 0)
    x = jnp.concatenate(jnp.split(img_nchw, groups, axis=1), axis=0)  # (n*g, img_ch, h, w)
    N = n * groups
    # channels-on-sublanes / flat-spatial-on-lanes, cast once to compute dtype
    x_cf = jnp.transpose(x, (1, 0, 2, 3)).reshape(img_ch, N * h * w).astype(compute_dtype)

    base = params["conv_in"][0].shape[-1]
    preconv = preblock_pallas(x_cf, params, N, h, w, compute_dtype)          # (base, N*h*w) f32
    im_half = conv_down_pallas(preconv, *params["down0"], N, h, w, compute_dtype)
    im_q = conv_down_pallas(im_half, *params["down1"], N, h // 2, w // 2, compute_dtype)

    pre = jnp.transpose(preconv.reshape(base, N, h, w), (1, 0, 2, 3))
    q = jnp.transpose(im_q.reshape(4 * base, N, h // 4, w // 4), (1, 0, 2, 3))
    # PyTorch returns exactly [:n] / [n:] (assumes the channel split gives 2 groups)
    return q[:n], q[n:], pre[:n], pre[n:]


# ---------------------------------------------------------------------------
# Pure-JAX reference.  dtype=bfloat16 reproduces the kernel's staging
# precision exactly (bf16 operands, f32 accumulation); dtype=float32 gives the
# original full-precision module semantics.
# ---------------------------------------------------------------------------
def _ref_conv(x, w, b, stride=1, leaky=False, dtype=jnp.float32):
    y = jax.lax.conv_general_dilated(
        x.astype(dtype), w.astype(dtype), (stride, stride), [(1, 1), (1, 1)],
        dimension_numbers=("NHWC", "HWIO", "NHWC"),
        preferred_element_type=jnp.float32)
    y = y + b
    if leaky:
        y = jnp.where(y >= 0, y, NEG_SLOPE * y)
    return y


def ref_encoder(img_nchw, params, img_ch, dtype=jnp.float32):
    n, C, h, w = img_nchw.shape
    groups = jnp.split(img_nchw, C // img_ch, axis=1)
    x = jnp.transpose(jnp.concatenate(groups, axis=0), (0, 2, 3, 1))
    x_in = _ref_conv(x, *params["conv_in"], leaky=True, dtype=dtype)
    t = _ref_conv(x, *params["cb0"], leaky=True, dtype=dtype)
    t = _ref_conv(t, *params["cb1"], leaky=True, dtype=dtype)
    preconv = _ref_conv(t, *params["cb2"], leaky=False, dtype=dtype) + x_in
    im_half = _ref_conv(preconv, *params["down0"], stride=2, dtype=dtype)
    im_quater = _ref_conv(im_half, *params["down1"], stride=2, dtype=dtype)
    pre = jnp.transpose(preconv, (0, 3, 1, 2))
    q = jnp.transpose(im_quater, (0, 3, 1, 2))
    return q[:n], q[n:], pre[:n], pre[n:]


# ---------------------------------------------------------------------------
# Deterministic parameter init (shapes follow the PyTorch __init__)
# ---------------------------------------------------------------------------
def init_params(key, img_ch, base):
    def conv_init(k, cin, cout):
        kw, kb = jax.random.split(k)
        w = jax.random.normal(kw, (3, 3, cin, cout), jnp.float32) / jnp.sqrt(9.0 * cin)
        b = 0.1 * jax.random.normal(kb, (cout,), jnp.float32)
        return w, b

    keys = jax.random.split(key, 6)
    return {
        "conv_in": conv_init(keys[0], img_ch, base),      # preblock.conv_in
        "cb0":     conv_init(keys[1], img_ch, base),      # preblock.conv_block[0]
        "cb1":     conv_init(keys[2], base, base),        # preblock.conv_block[2]
        "cb2":     conv_init(keys[3], base, base),        # preblock.conv_block[4]
        "down0":   conv_init(keys[4], base, 2 * base),
        "down1":   conv_init(keys[5], 2 * base, 4 * base),
    }


if __name__ == "__main__":
    key = jax.random.PRNGKey(0)
    k_img, k_par = jax.random.split(key)

    n, img_ch, base = 2, 2, 8
    h = w = 16
    in_ch = 2 * img_ch            # channel split yields 2 groups (as in the module)

    img = jax.random.normal(k_img, (n, in_ch, h, w), jnp.float32)
    params = init_params(k_par, img_ch, base)

    enc = jax.jit(functools.partial(image_encoder, img_ch=img_ch))
    outs = jax.block_until_ready(enc(img, params))

    # matched-precision reference (bf16 operands, f32 accumulation): tight check
    refs_bf16 = jax.block_until_ready(ref_encoder(img, params, img_ch, jnp.bfloat16))
    # full-f32 reference: bf16 staging drift is informational only
    refs_f32 = jax.block_until_ready(ref_encoder(img, params, img_ch, jnp.float32))

    for o, rb, rf in zip(outs, refs_bf16, refs_f32):
        assert o.shape == rb.shape, (o.shape, rb.shape)
        err = float(jnp.max(jnp.abs(o - rb)))
        assert jnp.allclose(o, rb, rtol=2e-3, atol=2e-3), err
        _drift = float(jnp.max(jnp.abs(o - rf)))   # bf16-vs-f32 drift (not asserted)

    print("KERNEL_OK")
</pallas_src>

<mosaic_0001>
module attributes {stable_mosaic.version = 11 : i64} {
  func.func @_preblock_kernel(%arg0: i32, %arg1: memref<2x512xbf16, #tpu.memory_space<vmem>>, %arg2: memref<9x512xbf16, #tpu.memory_space<vmem>>, %arg3: memref<8x18xbf16, #tpu.memory_space<vmem>>, %arg4: memref<8x1xf32, #tpu.memory_space<vmem>>, %arg5: memref<8x18xbf16, #tpu.memory_space<vmem>>, %arg6: memref<8x1xf32, #tpu.memory_space<vmem>>, %arg7: memref<8x72xbf16, #tpu.memory_space<vmem>>, %arg8: memref<8x1xf32, #tpu.memory_space<vmem>>, %arg9: memref<8x72xbf16, #tpu.memory_space<vmem>>, %arg10: memref<8x1xf32, #tpu.memory_space<vmem>>, %arg11: memref<8x512xf32, #tpu.memory_space<vmem>>, %arg12: memref<8x768xbf16, #tpu.memory_space<vmem>>, %arg13: memref<72x512xbf16, #tpu.memory_space<vmem>>) attributes {dimension_semantics = [#tpu.dimension_semantics<parallel>], iteration_bounds = array<i64: 2>, scalar_prefetch = 0 : i64, scratch_operands = 2 : i64, tpu.core_type = #tpu.core_type<tc>, window_params = [{transform_indices = @transform_0, window_bounds = array<i64: 2, 512>}, {pipeline_mode = #tpu.pipeline_mode<synchronous>, transform_indices = @transform_1, window_bounds = array<i64: 9, 512>}, {pipeline_mode = #tpu.pipeline_mode<synchronous>, transform_indices = @transform_2, window_bounds = array<i64: 8, 18>}, {pipeline_mode = #tpu.pipeline_mode<synchronous>, transform_indices = @transform_3, window_bounds = array<i64: 8, 1>}, {pipeline_mode = #tpu.pipeline_mode<synchronous>, transform_indices = @transform_4, window_bounds = array<i64: 8, 18>}, {pipeline_mode = #tpu.pipeline_mode<synchronous>, transform_indices = @transform_5, window_bounds = array<i64: 8, 1>}, {pipeline_mode = #tpu.pipeline_mode<synchronous>, transform_indices = @transform_6, window_bounds = array<i64: 8, 72>}, {pipeline_mode = #tpu.pipeline_mode<synchronous>, transform_indices = @transform_7, window_bounds = array<i64: 8, 1>}, {pipeline_mode = #tpu.pipeline_mode<synchronous>, transform_indices = @transform_8, window_bounds = array<i64: 8, 72>}, {pipeline_mode = #tpu.pipeline_mode<synchronous>, transform_indices = @transform_9, window_bounds = array<i64: 8, 1>}, {transform_indices = @transform_10, window_bounds = array<i64: 8, 512>}]} {
    %cst = arith.constant 0.000000e+00 : bf16
    %0 = vector.broadcast %cst : bf16 to vector<8x128xbf16>
    %c0 = arith.constant 0 : index
    %c0_0 = arith.constant 0 : index
    %1 = vector.load %arg12[%c0, %c0_0] : memref<8x768xbf16, #tpu.memory_space<vmem>>, vector<8x128xbf16>
    tpu.vector_store %arg12[%c0, %c0_0], %0 {strides = array<i32>} : memref<8x768xbf16, #tpu.memory_space<vmem>>, vector<8x128xbf16>,
    %cst_1 = arith.constant 0.000000e+00 : bf16
    %2 = vector.broadcast %cst_1 : bf16 to vector<8x128xbf16>
    %c0_2 = arith.constant 0 : index
    %c640 = arith.constant 640 : index
    %3 = vector.load %arg12[%c0_2, %c640] : memref<8x768xbf16, #tpu.memory_space<vmem>>, vector<8x128xbf16>
    tpu.vector_store %arg12[%c0_2, %c640], %2 {strides = array<i32>} : memref<8x768xbf16, #tpu.memory_space<vmem>>, vector<8x128xbf16>,
    %c0_3 = arith.constant 0 : index
    %c0_4 = arith.constant 0 : index
    %4 = vector.load %arg1[%c0_3, %c0_4] : memref<2x512xbf16, #tpu.memory_space<vmem>>, vector<2x512xbf16>
    %c0_5 = arith.constant 0 : index
    %c128 = arith.constant 128 : index
    %5 = vector.load %arg12[%c0_5, %c128] : memref<8x768xbf16, #tpu.memory_space<vmem>>, vector<2x512xbf16>
    tpu.vector_store %arg12[%c0_5, %c128], %4 {strides = array<i32>} : memref<8x768xbf16, #tpu.memory_space<vmem>>, vector<2x512xbf16>,
    %c0_6 = arith.constant 0 : index
    %c111 = arith.constant 111 : index
    %6 = vector.load %arg12[%c0_6, %c111] : memref<8x768xbf16, #tpu.memory_space<vmem>>, vector<2x512xbf16>
    %c0_7 = arith.constant 0 : index
    %c0_8 = arith.constant 0 : index
    %7 = vector.load %arg2[%c0_7, %c0_8] : memref<9x512xbf16, #tpu.memory_space<vmem>>, vector<1x512xbf16>
    %8 = vector.broadcast %7 : vector<1x512xbf16> to vector<2x512xbf16>
    %9 = arith.mulf %6, %8 : vector<2x512xbf16>
    %c0_9 = arith.constant 0 : index
    %c0_10 = arith.constant 0 : index
    %10 = vector.load %arg13[%c0_9, %c0_10] : memref<72x512xbf16, #tpu.memory_space<vmem>>, vector<2x512xbf16>
    tpu.vector_store %arg13[%c0_9, %c0_10], %9 {strides = array<i32>} : memref<72x512xbf16, #tpu.memory_space<vmem>>, vector<2x512xbf16>,
    %c0_11 = arith.constant 0 : index
    %c112 = arith.constant 112 : index
    %11 = vector.load %arg12[%c0_11, %c112] : memref<8x768xbf16, #tpu.memory_space<vmem>>, vector<2x512xbf16>
    %c1 = arith.constant 1 : index
    %c0_12 = arith.constant 0 : index
    %12 = vector.load %arg2[%c1, %c0_12] : memref<9x512xbf16, #tpu.memory_space<vmem>>, vector<1x512xbf16>
    %13 = vector.broadcast %12 : vector<1x512xbf16> to vector<2x512xbf16>
    %14 = arith.mulf %11, %13 : vector<2x512xbf16>
    %c2 = arith.constant 2 : index
    %c0_13 = arith.constant 0 : index
    %15 = vector.load %arg13[%c2, %c0_13] : memref<72x512xbf16, #tpu.memory_space<vmem>>, vector<2x512xbf16>
    tpu.vector_store %arg13[%c2, %c0_13], %14 {strides = array<i32>} : memref<72x512xbf16, #tpu.memory_space<vmem>>, vector<2x512xbf16>,
    %c0_14 = arith.constant 0 : index
    %c113 = arith.constant 113 : index
    %16 = vector.load %arg12[%c0_14, %c113] : memref<8x768xbf16, #tpu.memory_space<vmem>>, vector<2x512xbf16>
    %c2_15 = arith.constant 2 : index
    %c0_16 = arith.constant 0 : index
    %17 = vector.load %arg2[%c2_15, %c0_16] : memref<9x512xbf16, #tpu.memory_space<vmem>>, vector<1x512xbf16>
    %18 = vector.broadcast %17 : vector<1x512xbf16> to vector<2x512xbf16>
    %19 = arith.mulf %16, %18 : vector<2x512xbf16>
    %c4 = arith.constant 4 : index
    %c0_17 = arith.constant 0 : index
    %20 = vector.load %arg13[%c4, %c0_17] : memref<72x512xbf16, #tpu.memory_space<vmem>>, vector<2x512xbf16>
    tpu.vector_store %arg13[%c4, %c0_17], %19 {strides = array<i32>} : memref<72x512xbf16, #tpu.memory_space<vmem>>, vector<2x512xbf16>,
    %c0_18 = arith.constant 0 : index
    %c127 = arith.constant 127 : index
    %21 = vector.load %arg12[%c0_18, %c127] : memref<8x768xbf16, #tpu.memory_space<vmem>>, vector<2x512xbf16>
    %c3 = arith.constant 3 : index
    %c0_19 = arith.constant 0 : index
    %22 = vector.load %arg2[%c3, %c0_19] : memref<9x512xbf16, #tpu.memory_space<vmem>>, vector<1x512xbf16>
    %23 = vector.broadcast %22 : vector<1x512xbf16> to vector<2x512xbf16>
    %24 = arith.mulf %21, %23 : vector<2x512xbf16>
    %c6 = arith.constant 6 : index
    %c0_20 = arith.constant 0 : index
    %25 = vector.load %arg13[%c6, %c0_20] : memref<72x512xbf16, #tpu.memory_space<vmem>>, vector<2x512xbf16>
    tpu.vector_store %arg13[%c6, %c0_20], %24 {strides = array<i32>} : memref<72x512xbf16, #tpu.memory_space<vmem>>, vector<2x512xbf16>,
    %c0_21 = arith.constant 0 : index
    %c128_22 = arith.constant 128 : index
    %26 = vector.load %arg12[%c0_21, %c128_22] : memref<8x768xbf16, #tpu.memory_space<vmem>>, vector<2x512xbf16>
    %c8 = arith.constant 8 : index
    %c0_23 = arith.constant 0 : index
    %27 = vector.load %arg13[%c8, %c0_23] : memref<72x512xbf16, #tpu.memory_space<vmem>>, vector<2x512xbf16>
    tpu.vector_store %arg13[%c8, %c0_23], %26 {strides = array<i32>} : memref<72x512xbf16, #tpu.memory_space<vmem>>, vector<2x512xbf16>,
    %c0_24 = arith.constant 0 : index
    %c129 = arith.constant 129 : index
    %28 = vector.load %arg12[%c0_24, %c129] : memref<8x768xbf16, #tpu.memory_space<vmem>>, vector<2x512xbf16>
    %c5 = arith.constant 5 : index
    %c0_25 = arith.constant 0 : index
    %29 = vector.load %arg2[%c5, %c0_25] : memref<9x512xbf16, #tpu.memory_space<vmem>>, vector<1x512xbf16>
    %30 = vector.broadcast %29 : vector<1x512xbf16> to vector<2x512xbf16>
    %31 = arith.mulf %28, %30 : vector<2x512xbf16>
    %c10 = arith.constant 10 : index
    %c0_26 = arith.constant 0 : index
    %32 = vector.load %arg13[%c10, %c0_26] : memref<72x512xbf16, #tpu.memory_space<vmem>>, vector<2x512xbf16>
    tpu.vector_store %arg13[%c10, %c0_26], %31 {strides = array<i32>} : memref<72x512xbf16, #tpu.memory_space<vmem>>, vector<2x512xbf16>,
    %c0_27 = arith.constant 0 : index
    %c143 = arith.constant 143 : index
    %33 = vector.load %arg12[%c0_27, %c143] : memref<8x768xbf16, #tpu.memory_space<vmem>>, vector<2x512xbf16>
    %c6_28 = arith.constant 6 : index
    %c0_29 = arith.constant 0 : index
    %34 = vector.load %arg2[%c6_28, %c0_29] : memref<9x512xbf16, #tpu.memory_space<vmem>>, vector<1x512xbf16>
    %35 = vector.broadcast %34 : vector<1x512xbf16> to vector<2x512xbf16>
    %36 = arith.mulf %33, %35 : vector<2x512xbf16>
    %c12 = arith.constant 12 : index
    %c0_30 = arith.constant 0 : index
    %37 = vector.load %arg13[%c12, %c0_30] : memref<72x512xbf16, #tpu.memory_space<vmem>>, vector<2x512xbf16>
    tpu.vector_store %arg13[%c12, %c0_30], %36 {strides = array<i32>} : memref<72x512xbf16, #tpu.memory_space<vmem>>, vector<2x512xbf16>,
    %c0_31 = arith.constant 0 : index
    %c144 = arith.constant 144 : index
    %38 = vector.load %arg12[%c0_31, %c144] : memref<8x768xbf16, #tpu.memory_space<vmem>>, vector<2x512xbf16>
    %c7 = arith.constant 7 : index
    %c0_32 = arith.constant 0 : index
    %39 = vector.load %arg2[%c7, %c0_32] : memref<9x512xbf16, #tpu.memory_space<vmem>>, vector<1x512xbf16>
    %40 = vector.broadcast %39 : vector<1x512xbf16> to vector<2x512xbf16>
    %41 = arith.mulf %38, %40 : vector<2x512xbf16>
    %c14 = arith.constant 14 : index
    %c0_33 = arith.constant 0 : index
    %42 = vector.load %arg13[%c14, %c0_33] : memref<72x512xbf16, #tpu.memory_space<vmem>>, vector<2x512xbf16>
    tpu.vector_store %arg13[%c14, %c0_33], %41 {strides = array<i32>} : memref<72x512xbf16, #tpu.memory_space<vmem>>, vector<2x512xbf16>,
    %c0_34 = arith.constant 0 : index
    %c145 = arith.constant 145 : index
    %43 = vector.load %arg12[%c0_34, %c145] : memref<8x768xbf16, #tpu.memory_space<vmem>>, vector<2x512xbf16>
    %c8_35 = arith.constant 8 : index
    %c0_36 = arith.constant 0 : index
    %44 = vector.load %arg2[%c8_35, %c0_36] : memref<9x512xbf16, #tpu.memory_space<vmem>>, vector<1x512xbf16>
    %45 = vector.broadcast %44 : vector<1x512xbf16> to vector<2x512xbf16>
    %46 = arith.mulf %43, %45 : vector<2x512xbf16>
    %c16 = arith.constant 16 : index
    %c0_37 = arith.constant 0 : index
    %47 = vector.load %arg13[%c16, %c0_37] : memref<72x512xbf16, #tpu.memory_space<vmem>>, vector<2x512xbf16>
    tpu.vector_store %arg13[%c16, %c0_37], %46 {strides = array<i32>} : memref<72x512xbf16, #tpu.memory_space<vmem>>, vector<2x512xbf16>,
    %c0_38 = arith.constant 0 : index
    %c0_39 = arith.constant 0 : index
    %48 = vector.load %arg3[%c0_38, %c0_39] : memref<8x18xbf16, #tpu.memory_space<vmem>>, vector<8x18xbf16>
    %c0_40 = arith.constant 0 : index
    %c0_41 = arith.constant 0 : index
    %49 = vector.load %arg13[%c0_40, %c0_41] : memref<72x512xbf16, #tpu.memory_space<vmem>>, vector<18x512xbf16>
    %cst_42 = arith.constant dense<0.000000e+00> : vector<8x512xf32>
    %50 = tpu.matmul %48, %49, %cst_42 {dimension_numbers = #tpu.dot_dimension_numbers<[1], [0], [0], [1], [0, 0, 1, 1], [], []>} : vector<8x18xbf16>, vector<18x512xbf16>, vector<8x512xf32> -> vector<8x512xf32>
    %c0_43 = arith.constant 0 : index
    %c0_44 = arith.constant 0 : index
    %51 = vector.load %arg4[%c0_43, %c0_44] : memref<8x1xf32, #tpu.memory_space<vmem>>, vector<8x1xf32>
    %52 = vector.broadcast %51 : vector<8x1xf32> to vector<8x512xf32>
    %53 = arith.addf %50, %52 : vector<8x512xf32>
    %cst_45 = arith.constant 2.500000e-01 : f32
    %54 = vector.broadcast %cst_45 : f32 to vector<8x512xf32>
    %55 = arith.mulf %54, %53 : vector<8x512xf32>
    %56 = arith.maximumf %53, %55 : vector<8x512xf32>
    %c0_46 = arith.constant 0 : index
    %c0_47 = arith.constant 0 : index
    %57 = vector.load %arg5[%c0_46, %c0_47] : memref<8x18xbf16, #tpu.memory_space<vmem>>, vector<8x18xbf16>
    %c0_48 = arith.constant 0 : index
    %c0_49 = arith.constant 0 : index
    %58 = vector.load %arg13[%c0_48, %c0_49] : memref<72x512xbf16, #tpu.memory_space<vmem>>, vector<18x512xbf16>
    %cst_50 = arith.constant dense<0.000000e+00> : vector<8x512xf32>
    %59 = tpu.matmul %57, %58, %cst_50 {dimension_numbers = #tpu.dot_dimension_numbers<[1], [0], [0], [1], [0, 0, 1, 1], [], []>} : vector<8x18xbf16>, vector<18x512xbf16>, vector<8x512xf32> -> vector<8x512xf32>
    %c0_51 = arith.constant 0 : index
    %c0_52 = arith.constant 0 : index
    %60 = vector.load %arg6[%c0_51, %c0_52] : memref<8x1xf32, #tpu.memory_space<vmem>>, vector<8x1xf32>
    %61 = vector.broadcast %60 : vector<8x1xf32> to vector<8x512xf32>
    %62 = arith.addf %59, %61 : vector<8x512xf32>
    %cst_53 = arith.constant 2.500000e-01 : f32
    %63 = vector.broadcast %cst_53 : f32 to vector<8x512xf32>
    %64 = arith.mulf %63, %62 : vector<8x512xf32>
    %65 = arith.maximumf %62, %64 : vector<8x512xf32>
    %66 = arith.truncf %65 : vector<8x512xf32> to vector<8x512xbf16>
    %c0_54 = arith.constant 0 : index
    %c128_55 = arith.constant 128 : index
    %67 = vector.load %arg12[%c0_54, %c128_55] : memref<8x768xbf16, #tpu.memory_space<vmem>>, vector<8x512xbf16>
    tpu.vector_store %arg12[%c0_54, %c128_55], %66 {strides = array<i32>} : memref<8x768xbf16, #tpu.memory_space<vmem>>, vector<8x512xbf16>,
    %c0_56 = arith.constant 0 : index
    %c111_57 = arith.constant 111 : index
    %68 = vector.load %arg12[%c0_56, %c111_57] : memref<8x768xbf16, #tpu.memory_space<vmem>>, vector<8x512xbf16>
    %c0_58 = arith.constant 0 : index
    %c0_59 = arith.constant 0 : index
    %69 = vector.load %arg2[%c0_58, %c0_59] : memref<9x512xbf16, #tpu.memory_space<vmem>>, vector<1x512xbf16>
    %70 = vector.broadcast %69 : vector<1x512xbf16> to vector<8x512xbf16>
    %71 = arith.mulf %68, %70 : vector<8x512xbf16>
    %c0_60 = arith.constant 0 : index
    %c0_61 = arith.constant 0 : index
    %72 = vector.load %arg13[%c0_60, %c0_61] : memref<72x512xbf16, #tpu.memory_space<vmem>>, vector<8x512xbf16>
    tpu.vector_store %arg13[%c0_60, %c0_61], %71 {strides = array<i32>} : memref<72x512xbf16, #tpu.memory_space<vmem>>, vector<8x512xbf16>,
    %c0_62 = arith.constant 0 : index
    %c112_63 = arith.constant 112 : index
    %73 = vector.load %arg12[%c0_62, %c112_63] : memref<8x768xbf16, #tpu.memory_space<vmem>>, vector<8x512xbf16>
    %c1_64 = arith.constant 1 : index
    %c0_65 = arith.constant 0 : index
    %74 = vector.load %arg2[%c1_64, %c0_65] : memref<9x512xbf16, #tpu.memory_space<vmem>>, vector<1x512xbf16>
    %75 = vector.broadcast %74 : vector<1x512xbf16> to vector<8x512xbf16>
    %76 = arith.mulf %73, %75 : vector<8x512xbf16>
    %c8_66 = arith.constant 8 : index
    %c0_67 = arith.constant 0 : index
    %77 = vector.load %arg13[%c8_66, %c0_67] : memref<72x512xbf16, #tpu.memory_space<vmem>>, vector<8x512xbf16>
    tpu.vector_store %arg13[%c8_66, %c0_67], %76 {strides = array<i32>} : memref<72x512xbf16, #tpu.memory_space<vmem>>, vector<8x512xbf16>,
    %c0_68 = arith.constant 0 : index
    %c113_69 = arith.constant 113 : index
    %78 = vector.load %arg12[%c0_68, %c113_69] : memref<8x768xbf16, #tpu.memory_space<vmem>>, vector<8x512xbf16>
    %c2_70 = arith.constant 2 : index
    %c0_71 = arith.constant 0 : index
    %79 = vector.load %arg2[%c2_70, %c0_71] : memref<9x512xbf16, #tpu.memory_space<vmem>>, vector<1x512xbf16>
    %80 = vector.broadcast %79 : vector<1x512xbf16> to vector<8x512xbf16>
    %81 = arith.mulf %78, %80 : vector<8x512xbf16>
    %c16_72 = arith.constant 16 : index
    %c0_73 = arith.constant 0 : index
    %82 = vector.load %arg13[%c16_72, %c0_73] : memref<72x512xbf16, #tpu.memory_space<vmem>>, vector<8x512xbf16>
    tpu.vector_store %arg13[%c16_72, %c0_73], %81 {strides = array<i32>} : memref<72x512xbf16, #tpu.memory_space<vmem>>, vector<8x512xbf16>,
    %c0_74 = arith.constant 0 : index
    %c127_75 = arith.constant 127 : index
    %83 = vector.load %arg12[%c0_74, %c127_75] : memref<8x768xbf16, #tpu.memory_space<vmem>>, vector<8x512xbf16>
    %c3_76 = arith.constant 3 : index
    %c0_77 = arith.constant 0 : index
    %84 = vector.load %arg2[%c3_76, %c0_77] : memref<9x512xbf16, #tpu.memory_space<vmem>>, vector<1x512xbf16>
    %85 = vector.broadcast %84 : vector<1x512xbf16> to vector<8x512xbf16>
    %86 = arith.mulf %83, %85 : vector<8x512xbf16>
    %c24 = arith.constant 24 : index
    %c0_78 = arith.constant 0 : index
    %87 = vector.load %arg13[%c24, %c0_78] : memref<72x512xbf16, #tpu.memory_space<vmem>>, vector<8x512xbf16>
    tpu.vector_store %arg13[%c24, %c0_78], %86 {strides = array<i32>} : memref<72x512xbf16, #tpu.memory_space<vmem>>, vector<8x512xbf16>,
    %c0_79 = arith.constant 0 : index
    %c128_80 = arith.constant 128 : index
    %88 = vector.load %arg12[%c0_79, %c128_80] : memref<8x768xbf16, #tpu.memory_space<vmem>>, vector<8x512xbf16>
    %c32 = arith.constant 32 : index
    %c0_81 = arith.constant 0 : index
    %89 = vector.load %arg13[%c32, %c0_81] : memref<72x512xbf16, #tpu.memory_space<vmem>>, vector<8x512xbf16>
    tpu.vector_store %arg13[%c32, %c0_81], %88 {strides = array<i32>} : memref<72x512xbf16, #tpu.memory_space<vmem>>, vector<8x512xbf16>,
    %c0_82 = arith.constant 0 : index
    %c129_83 = arith.constant 129 : index
    %90 = vector.load %arg12[%c0_82, %c129_83] : memref<8x768xbf16, #tpu.memory_space<vmem>>, vector<8x512xbf16>
    %c5_84 = arith.constant 5 : index
    %c0_85 = arith.constant 0 : index
    %91 = vector.load %arg2[%c5_84, %c0_85] : memref<9x512xbf16, #tpu.memory_space<vmem>>, vector<1x512xbf16>
    %92 = vector.broadcast %91 : vector<1x512xbf16> to vector<8x512xbf16>
    %93 = arith.mulf %90, %92 : vector<8x512xbf16>
    %c40 = arith.constant 40 : index
    %c0_86 = arith.constant 0 : index
    %94 = vector.load %arg13[%c40, %c0_86] : memref<72x512xbf16, #tpu.memory_space<vmem>>, vector<8x512xbf16>
    tpu.vector_store %arg13[%c40, %c0_86], %93 {strides = array<i32>} : memref<72x512xbf16, #tpu.memory_space<vmem>>, vector<8x512xbf16>,
    %c0_87 = arith.constant 0 : index
    %c143_88 = arith.constant 143 : index
    %95 = vector.load %arg12[%c0_87, %c143_88] : memref<8x768xbf16, #tpu.memory_space<vmem>>, vector<8x512xbf16>
    %c6_89 = arith.constant 6 : index
    %c0_90 = arith.constant 0 : index
    %96 = vector.load %arg2[%c6_89, %c0_90] : memref<9x512xbf16, #tpu.memory_space<vmem>>, vector<1x512xbf16>
    %97 = vector.broadcast %96 : vector<1x512xbf16> to vector<8x512xbf16>
    %98 = arith.mulf %95, %97 : vector<8x512xbf16>
    %c48 = arith.constant 48 : index
    %c0_91 = arith.constant 0 : index
    %99 = vector.load %arg13[%c48, %c0_91] : memref<72x512xbf16, #tpu.memory_space<vmem>>, vector<8x512xbf16>
    tpu.vector_store %arg13[%c48, %c0_91], %98 {strides = array<i32>} : memref<72x512xbf16, #tpu.memory_space<vmem>>, vector<8x512xbf16>,
    %c0_92 = arith.constant 0 : index
    %c144_93 = arith.constant 144 : index
    %100 = vector.load %arg12[%c0_92, %c144_93] : memref<8x768xbf16, #tpu.memory_space<vmem>>, vector<8x512xbf16>
    %c7_94 = arith.constant 7 : index
    %c0_95 = arith.constant 0 : index
    %101 = vector.load %arg2[%c7_94, %c0_95] : memref<9x512xbf16, #tpu.memory_space<vmem>>, vector<1x512xbf16>
    %102 = vector.broadcast %101 : vector<1x512xbf16> to vector<8x512xbf16>
    %103 = arith.mulf %100, %102 : vector<8x512xbf16>
    %c56 = arith.constant 56 : index
    %c0_96 = arith.constant 0 : index
    %104 = vector.load %arg13[%c56, %c0_96] : memref<72x512xbf16, #tpu.memory_space<vmem>>, vector<8x512xbf16>
    tpu.vector_store %arg13[%c56, %c0_96], %103 {strides = array<i32>} : memref<72x512xbf16, #tpu.memory_space<vmem>>, vector<8x512xbf16>,
    %c0_97 = arith.constant 0 : index
    %c145_98 = arith.constant 145 : index
    %105 = vector.load %arg12[%c0_97, %c145_98] : memref<8x768xbf16, #tpu.memory_space<vmem>>, vector<8x512xbf16>
    %c8_99 = arith.constant 8 : index
    %c0_100 = arith.constant 0 : index
    %106 = vector.load %arg2[%c8_99, %c0_100] : memref<9x512xbf16, #tpu.memory_space<vmem>>, vector<1x512xbf16>
    %107 = vector.broadcast %106 : vector<1x512xbf16> to vector<8x512xbf16>
    %108 = arith.mulf %105, %107 : vector<8x512xbf16>
    %c64 = arith.constant 64 : index
    %c0_101 = arith.constant 0 : index
    %109 = vector.load %arg13[%c64, %c0_101] : memref<72x512xbf16, #tpu.memory_space<vmem>>, vector<8x512xbf16>
    tpu.vector_store %arg13[%c64, %c0_101], %108 {strides = array<i32>} : memref<72x512xbf16, #tpu.memory_space<vmem>>, vector<8x512xbf16>,
    %c0_102 = arith.constant 0 : index
    %c0_103 = arith.constant 0 : index
    %110 = vector.load %arg7[%c0_102, %c0_103] : memref<8x72xbf16, #tpu.memory_space<vmem>>, vector<8x72xbf16>
    %c0_104 = arith.constant 0 : index
    %c0_105 = arith.constant 0 : index
    %111 = vector.load %arg13[%c0_104, %c0_105] : memref<72x512xbf16, #tpu.memory_space<vmem>>, vector<72x512xbf16>
    %cst_106 = arith.constant dense<0.000000e+00> : vector<8x512xf32>
    %112 = tpu.matmul %110, %111, %cst_106 {dimension_numbers = #tpu.dot_dimension_numbers<[1], [0], [0], [1], [0, 0, 1, 1], [], []>} : vector<8x72xbf16>, vector<72x512xbf16>, vector<8x512xf32> -> vector<8x512xf32>
    %c0_107 = arith.constant 0 : index
    %c0_108 = arith.constant 0 : index
    %113 = vector.load %arg8[%c0_107, %c0_108] : memref<8x1xf32, #tpu.memory_space<vmem>>, vector<8x1xf32>
    %114 = vector.broadcast %113 : vector<8x1xf32> to vector<8x512xf32>
    %115 = arith.addf %112, %114 : vector<8x512xf32>
    %cst_109 = arith.constant 2.500000e-01 : f32
    %116 = vector.broadcast %cst_109 : f32 to vector<8x512xf32>
    %117 = arith.mulf %116, %115 : vector<8x512xf32>
    %118 = arith.maximumf %115, %117 : vector<8x512xf32>
    %119 = arith.truncf %118 : vector<8x512xf32> to vector<8x512xbf16>
    %c0_110 = arith.constant 0 : index
    %c128_111 = arith.constant 128 : index
    %120 = vector.load %arg12[%c0_110, %c128_111] : memref<8x768xbf16, #tpu.memory_space<vmem>>, vector<8x512xbf16>
    tpu.vector_store %arg12[%c0_110, %c128_111], %119 {strides = array<i32>} : memref<8x768xbf16, #tpu.memory_space<vmem>>, vector<8x512xbf16>,
    %c0_112 = arith.constant 0 : index
    %c111_113 = arith.constant 111 : index
    %121 = vector.load %arg12[%c0_112, %c111_113] : memref<8x768xbf16, #tpu.memory_space<vmem>>, vector<8x512xbf16>
    %c0_114 = arith.constant 0 : index
    %c0_115 = arith.constant 0 : index
    %122 = vector.load %arg2[%c0_114, %c0_115] : memref<9x512xbf16, #tpu.memory_space<vmem>>, vector<1x512xbf16>
    %123 = vector.broadcast %122 : vector<1x512xbf16> to vector<8x512xbf16>
    %124 = arith.mulf %121, %123 : vector<8x512xbf16>
    %c0_116 = arith.constant 0 : index
    %c0_117 = arith.constant 0 : index
    %125 = vector.load %arg13[%c0_116, %c0_117] : memref<72x512xbf16, #tpu.memory_space<vmem>>, vector<8x512xbf16>
    tpu.vector_store %arg13[%c0_116, %c0_117], %124 {strides = array<i32>} : memref<72x512xbf16, #tpu.memory_space<vmem>>, vector<8x512xbf16>,
    %c0_118 = arith.constant 0 : index
    %c112_119 = arith.constant 112 : index
    %126 = vector.load %arg12[%c0_118, %c112_119] : memref<8x768xbf16, #tpu.memory_space<vmem>>, vector<8x512xbf16>
    %c1_120 = arith.constant 1 : index
    %c0_121 = arith.constant 0 : index
    %127 = vector.load %arg2[%c1_120, %c0_121] : memref<9x512xbf16, #tpu.memory_space<vmem>>, vector<1x512xbf16>
    %128 = vector.broadcast %127 : vector<1x512xbf16> to vector<8x512xbf16>
    %129 = arith.mulf %126, %128 : vector<8x512xbf16>
    %c8_122 = arith.constant 8 : index
    %c0_123 = arith.constant 0 : index
    %130 = vector.load %arg13[%c8_122, %c0_123] : memref<72x512xbf16, #tpu.memory_space<vmem>>, vector<8x512xbf16>
    tpu.vector_store %arg13[%c8_122, %c0_123], %129 {strides = array<i32>} : memref<72x512xbf16, #tpu.memory_space<vmem>>, vector<8x512xbf16>,
    %c0_124 = arith.constant 0 : index
    %c113_125 = arith.constant 113 : index
    %131 = vector.load %arg12[%c0_124, %c113_125] : memref<8x768xbf16, #tpu.memory_space<vmem>>, vector<8x512xbf16>
    %c2_126 = arith.constant 2 : index
    %c0_127 = arith.constant 0 : index
    %132 = vector.load %arg2[%c2_126, %c0_127] : memref<9x512xbf16, #tpu.memory_space<vmem>>, vector<1x512xbf16>
    %133 = vector.broadcast %132 : vector<1x512xbf16> to vector<8x512xbf16>
    %134 = arith.mulf %131, %133 : vector<8x512xbf16>
    %c16_128 = arith.constant 16 : index
    %c0_129 = arith.constant 0 : index
    %135 = vector.load %arg13[%c16_128, %c0_129] : memref<72x512xbf16, #tpu.memory_space<vmem>>, vector<8x512xbf16>
    tpu.vector_store %arg13[%c16_128, %c0_129], %134 {strides = array<i32>} : memref<72x512xbf16, #tpu.memory_space<vmem>>, vector<8x512xbf16>,
    %c0_130 = arith.constant 0 : index
    %c127_131 = arith.constant 127 : index
    %136 = vector.load %arg12[%c0_130, %c127_131] : memref<8x768xbf16, #tpu.memory_space<vmem>>, vector<8x512xbf16>
    %c3_132 = arith.constant 3 : index
    %c0_133 = arith.constant 0 : index
    %137 = vector.load %arg2[%c3_132, %c0_133] : memref<9x512xbf16, #tpu.memory_space<vmem>>, vector<1x512xbf16>
    %138 = vector.broadcast %137 : vector<1x512xbf16> to vector<8x512xbf16>
    %139 = arith.mulf %136, %138 : vector<8x512xbf16>
    %c24_134 = arith.constant 24 : index
    %c0_135 = arith.constant 0 : index
    %140 = vector.load %arg13[%c24_134, %c0_135] : memref<72x512xbf16, #tpu.memory_space<vmem>>, vector<8x512xbf16>
    tpu.vector_store %arg13[%c24_134, %c0_135], %139 {strides = array<i32>} : memref<72x512xbf16, #tpu.memory_space<vmem>>, vector<8x512xbf16>,
    %c0_136 = arith.constant 0 : index
    %c128_137 = arith.constant 128 : index
    %141 = vector.load %arg12[%c0_136, %c128_137] : memref<8x768xbf16, #tpu.memory_space<vmem>>, vector<8x512xbf16>
    %c32_138 = arith.constant 32 : index
    %c0_139 = arith.constant 0 : index
    %142 = vector.load %arg13[%c32_138, %c0_139] : memref<72x512xbf16, #tpu.memory_space<vmem>>, vector<8x512xbf16>
    tpu.vector_store %arg13[%c32_138, %c0_139], %141 {strides = array<i32>} : memref<72x512xbf16, #tpu.memory_space<vmem>>, vector<8x512xbf16>,
    %c0_140 = arith.constant 0 : index
    %c129_141 = arith.constant 129 : index
    %143 = vector.load %arg12[%c0_140, %c129_141] : memref<8x768xbf16, #tpu.memory_space<vmem>>, vector<8x512xbf16>
    %c5_142 = arith.constant 5 : index
    %c0_143 = arith.constant 0 : index
    %144 = vector.load %arg2[%c5_142, %c0_143] : memref<9x512xbf16, #tpu.memory_space<vmem>>, vector<1x512xbf16>
    %145 = vector.broadcast %144 : vector<1x512xbf16> to vector<8x512xbf16>
    %146 = arith.mulf %143, %145 : vector<8x512xbf16>
    %c40_144 = arith.constant 40 : index
    %c0_145 = arith.constant 0 : index
    %147 = vector.load %arg13[%c40_144, %c0_145] : memref<72x512xbf16, #tpu.memory_space<vmem>>, vector<8x512xbf16>
    tpu.vector_store %arg13[%c40_144, %c0_145], %146 {strides = array<i32>} : memref<72x512xbf16, #tpu.memory_space<vmem>>, vector<8x512xbf16>,
    %c0_146 = arith.constant 0 : index
    %c143_147 = arith.constant 143 : index
    %148 = vector.load %arg12[%c0_146, %c143_147] : memref<8x768xbf16, #tpu.memory_space<vmem>>, vector<8x512xbf16>
    %c6_148 = arith.constant 6 : index
    %c0_149 = arith.constant 0 : index
    %149 = vector.load %arg2[%c6_148, %c0_149] : memref<9x512xbf16, #tpu.memory_space<vmem>>, vector<1x512xbf16>
    %150 = vector.broadcast %149 : vector<1x512xbf16> to vector<8x512xbf16>
    %151 = arith.mulf %148, %150 : vector<8x512xbf16>
    %c48_150 = arith.constant 48 : index
    %c0_151 = arith.constant 0 : index
    %152 = vector.load %arg13[%c48_150, %c0_151] : memref<72x512xbf16, #tpu.memory_space<vmem>>, vector<8x512xbf16>
    tpu.vector_store %arg13[%c48_150, %c0_151], %151 {strides = array<i32>} : memref<72x512xbf16, #tpu.memory_space<vmem>>, vector<8x512xbf16>,
    %c0_152 = arith.constant 0 : index
    %c144_153 = arith.constant 144 : index
    %153 = vector.load %arg12[%c0_152, %c144_153] : memref<8x768xbf16, #tpu.memory_space<vmem>>, vector<8x512xbf16>
    %c7_154 = arith.constant 7 : index
    %c0_155 = arith.constant 0 : index
    %154 = vector.load %arg2[%c7_154, %c0_155] : memref<9x512xbf16, #tpu.memory_space<vmem>>, vector<1x512xbf16>
    %155 = vector.broadcast %154 : vector<1x512xbf16> to vector<8x512xbf16>
    %156 = arith.mulf %153, %155 : vector<8x512xbf16>
    %c56_156 = arith.constant 56 : index
    %c0_157 = arith.constant 0 : index
    %157 = vector.load %arg13[%c56_156, %c0_157] : memref<72x512xbf16, #tpu.memory_space<vmem>>, vector<8x512xbf16>
    tpu.vector_store %arg13[%c56_156, %c0_157], %156 {strides = array<i32>} : memref<72x512xbf16, #tpu.memory_space<vmem>>, vector<8x512xbf16>,
    %c0_158 = arith.constant 0 : index
    %c145_159 = arith.constant 145 : index
    %158 = vector.load %arg12[%c0_158, %c145_159] : memref<8x768xbf16, #tpu.memory_space<vmem>>, vector<8x512xbf16>
    %c8_160 = arith.constant 8 : index
    %c0_161 = arith.constant 0 : index
    %159 = vector.load %arg2[%c8_160, %c0_161] : memref<9x512xbf16, #tpu.memory_space<vmem>>, vector<1x512xbf16>
    %160 = vector.broadcast %159 : vector<1x512xbf16> to vector<8x512xbf16>
    %161 = arith.mulf %158, %160 : vector<8x512xbf16>
    %c64_162 = arith.constant 64 : index
    %c0_163 = arith.constant 0 : index
    %162 = vector.load %arg13[%c64_162, %c0_163] : memref<72x512xbf16, #tpu.memory_space<vmem>>, vector<8x512xbf16>
    tpu.vector_store %arg13[%c64_162, %c0_163], %161 {strides = array<i32>} : memref<72x512xbf16, #tpu.memory_space<vmem>>, vector<8x512xbf16>,
    %c0_164 = arith.constant 0 : index
    %c0_165 = arith.constant 0 : index
    %163 = vector.load %arg9[%c0_164, %c0_165] : memref<8x72xbf16, #tpu.memory_space<vmem>>, vector<8x72xbf16>
    %c0_166 = arith.constant 0 : index
    %c0_167 = arith.constant 0 : index
    %164 = vector.load %arg13[%c0_166, %c0_167] : memref<72x512xbf16, #tpu.memory_space<vmem>>, vector<72x512xbf16>
    %cst_168 = arith.constant dense<0.000000e+00> : vector<8x512xf32>
    %165 = tpu.matmul %163, %164, %cst_168 {dimension_numbers = #tpu.dot_dimension_numbers<[1], [0], [0], [1], [0, 0, 1, 1], [], []>} : vector<8x72xbf16>, vector<72x512xbf16>, vector<8x512xf32> -> vector<8x512xf32>
    %c0_169 = arith.constant 0 : index
    %c0_170 = arith.constant 0 : index
    %166 = vector.load %arg10[%c0_169, %c0_170] : memref<8x1xf32, #tpu.memory_space<vmem>>, vector<8x1xf32>
    %167 = vector.broadcast %166 : vector<8x1xf32> to vector<8x512xf32>
    %168 = arith.addf %165, %167 : vector<8x512xf32>
    %169 = arith.addf %168, %56 : vector<8x512xf32>
    %c0_171 = arith.constant 0 : index
    %c0_172 = arith.constant 0 : index
    %170 = vector.load %arg11[%c0_171, %c0_172] : memref<8x512xf32, #tpu.memory_space<vmem>>, vector<8x512xf32>
    tpu.vector_store %arg11[%c0_171, %c0_172], %169 {strides = array<i32>} : memref<8x512xf32, #tpu.memory_space<vmem>>, vector<8x512xf32>,
    return
  }
  func.func @transform_0(%arg0: i32) -> (i32, i32) {
    %c0_i32 = arith.constant 0 : i32
    %c0_i32_0 = arith.constant 0 : i32
    return %c0_i32, %arg0 : i32, i32
  }
  func.func @transform_1(%arg0: i32) -> (i32, i32) {
    %c0_i32 = arith.constant 0 : i32
    %c0_i32_0 = arith.constant 0 : i32
    %c0_i32_1 = arith.constant 0 : i32
    return %c0_i32, %c0_i32_0 : i32, i32
  }
  func.func @transform_2(%arg0: i32) -> (i32, i32) {
    %c0_i32 = arith.constant 0 : i32
    %c0_i32_0 = arith.constant 0 : i32
    %c0_i32_1 = arith.constant 0 : i32
    return %c0_i32, %c0_i32_0 : i32, i32
  }
  func.func @transform_3(%arg0: i32) -> (i32, i32) {
    %c0_i32 = arith.constant 0 : i32
    %c0_i32_0 = arith.constant 0 : i32
    %c0_i32_1 = arith.constant 0 : i32
    return %c0_i32, %c0_i32_0 : i32, i32
  }
  func.func @transform_4(%arg0: i32) -> (i32, i32) {
    %c0_i32 = arith.constant 0 : i32
    %c0_i32_0 = arith.constant 0 : i32
    %c0_i32_1 = arith.constant 0 : i32
    return %c0_i32, %c0_i32_0 : i32, i32
  }
  func.func @transform_5(%arg0: i32) -> (i32, i32) {
    %c0_i32 = arith.constant 0 : i32
    %c0_i32_0 = arith.constant 0 : i32
    %c0_i32_1 = arith.constant 0 : i32
    return %c0_i32, %c0_i32_0 : i32, i32
  }
  func.func @transform_6(%arg0: i32) -> (i32, i32) {
    %c0_i32 = arith.constant 0 : i32
    %c0_i32_0 = arith.constant 0 : i32
    %c0_i32_1 = arith.constant 0 : i32
    return %c0_i32, %c0_i32_0 : i32, i32
  }
  func.func @transform_7(%arg0: i32) -> (i32, i32) {
    %c0_i32 = arith.constant 0 : i32
    %c0_i32_0 = arith.constant 0 : i32
    %c0_i32_1 = arith.constant 0 : i32
    return %c0_i32, %c0_i32_0 : i32, i32
  }
  func.func @transform_8(%arg0: i32) -> (i32, i32) {
    %c0_i32 = arith.constant 0 : i32
    %c0_i32_0 = arith.constant 0 : i32
    %c0_i32_1 = arith.constant 0 : i32
    return %c0_i32, %c0_i32_0 : i32, i32
  }
  func.func @transform_9(%arg0: i32) -> (i32, i32) {
    %c0_i32 = arith.constant 0 : i32
    %c0_i32_0 = arith.constant 0 : i32
    %c0_i32_1 = arith.constant 0 : i32
    return %c0_i32, %c0_i32_0 : i32, i32
  }
  func.func @transform_10(%arg0: i32) -> (i32, i32) {
    %c0_i32 = arith.constant 0 : i32
    %c0_i32_0 = arith.constant 0 : i32
    return %c0_i32, %arg0 : i32, i32
  }
}

module attributes {stable_mosaic.version = 11 : i64} {
  func.func @_down_kernel(%arg0: i32, %arg1: memref<4x8x128xbf16, #tpu.memory_space<vmem>>, %arg2: memref<9x128xbf16, #tpu.memory_space<vmem>>, %arg3: memref<16x72xbf16, #tpu.memory_space<vmem>>, %arg4: memref<16x1xf32, #tpu.memory_space<vmem>>, %arg5: memref<16x128xf32, #tpu.memory_space<vmem>>, %arg6: memref<3x8x256xbf16, #tpu.memory_space<vmem>>, %arg7: memref<72x128xbf16, #tpu.memory_space<vmem>>) attributes {dimension_semantics = [#tpu.dimension_semantics<parallel>], iteration_bounds = array<i64: 2>, scalar_prefetch = 0 : i64, scratch_operands = 2 : i64, tpu.core_type = #tpu.core_type<tc>, window_params = [{transform_indices = @transform_0, window_bounds = array<i64: 4, 8, 128>}, {pipeline_mode = #tpu.pipeline_mode<synchronous>, transform_indices = @transform_1, window_bounds = array<i64: 9, 128>}, {pipeline_mode = #tpu.pipeline_mode<synchronous>, transform_indices = @transform_2, window_bounds = array<i64: 16, 72>}, {pipeline_mode = #tpu.pipeline_mode<synchronous>, transform_indices = @transform_3, window_bounds = array<i64: 16, 1>}, {transform_indices = @transform_4, window_bounds = array<i64: 16, 128>}]} {
    %cst = arith.constant 0.000000e+00 : bf16
    %0 = vector.broadcast %cst : bf16 to vector<3x8x128xbf16>
    %c0 = arith.constant 0 : index
    %c0_0 = arith.constant 0 : index
    %c0_1 = arith.constant 0 : index
    %1 = vector.load %arg6[%c0, %c0_0, %c0_1] : memref<3x8x256xbf16, #tpu.memory_space<vmem>>, vector<3x8x128xbf16>
    tpu.vector_store %arg6[%c0, %c0_0, %c0_1], %0 {strides = array<i32>} : memref<3x8x256xbf16, #tpu.memory_space<vmem>>, vector<3x8x128xbf16>,
    %c1 = arith.constant 1 : index
    %c0_2 = arith.constant 0 : index
    %c0_3 = arith.constant 0 : index
    %2 = vector.load %arg1[%c1, %c0_2, %c0_3] : memref<4x8x128xbf16, #tpu.memory_space<vmem>>, vector<1x8x128xbf16>
    %3 = vector.shape_cast %2 : vector<1x8x128xbf16> to vector<8x128xbf16>
    %c0_4 = arith.constant 0 : index
    %c0_5 = arith.constant 0 : index
    %c128 = arith.constant 128 : index
    %4 = vector.load %arg6[%c0_4, %c0_5, %c128] : memref<3x8x256xbf16, #tpu.memory_space<vmem>>, vector<1x8x128xbf16>
    %5 = vector.shape_cast %4 : vector<1x8x128xbf16> to vector<8x128xbf16>
    %6 = vector.shape_cast %3 : vector<8x128xbf16> to vector<1x8x128xbf16>
    tpu.vector_store %arg6[%c0_4, %c0_5, %c128], %6 {strides = array<i32>} : memref<3x8x256xbf16, #tpu.memory_space<vmem>>, vector<1x8x128xbf16>,
    %c2 = arith.constant 2 : index
    %c0_6 = arith.constant 0 : index
    %c0_7 = arith.constant 0 : index
    %7 = vector.load %arg1[%c2, %c0_6, %c0_7] : memref<4x8x128xbf16, #tpu.memory_space<vmem>>, vector<1x8x128xbf16>
    %8 = vector.shape_cast %7 : vector<1x8x128xbf16> to vector<8x128xbf16>
    %c1_8 = arith.constant 1 : index
    %c0_9 = arith.constant 0 : index
    %c128_10 = arith.constant 128 : index
    %9 = vector.load %arg6[%c1_8, %c0_9, %c128_10] : memref<3x8x256xbf16, #tpu.memory_space<vmem>>, vector<1x8x128xbf16>
    %10 = vector.shape_cast %9 : vector<1x8x128xbf16> to vector<8x128xbf16>
    %11 = vector.shape_cast %8 : vector<8x128xbf16> to vector<1x8x128xbf16>
    tpu.vector_store %arg6[%c1_8, %c0_9, %c128_10], %11 {strides = array<i32>} : memref<3x8x256xbf16, #tpu.memory_space<vmem>>, vector<1x8x128xbf16>,
    %c3 = arith.constant 3 : index
    %c0_11 = arith.constant 0 : index
    %c0_12 = arith.constant 0 : index
    %12 = vector.load %arg1[%c3, %c0_11, %c0_12] : memref<4x8x128xbf16, #tpu.memory_space<vmem>>, vector<1x8x128xbf16>
    %13 = vector.shape_cast %12 : vector<1x8x128xbf16> to vector<8x128xbf16>
    %c2_13 = arith.constant 2 : index
    %c0_14 = arith.constant 0 : index
    %c128_15 = arith.constant 128 : index
    %14 = vector.load %arg6[%c2_13, %c0_14, %c128_15] : memref<3x8x256xbf16, #tpu.memory_space<vmem>>, vector<1x8x128xbf16>
    %15 = vector.shape_cast %14 : vector<1x8x128xbf16> to vector<8x128xbf16>
    %16 = vector.shape_cast %13 : vector<8x128xbf16> to vector<1x8x128xbf16>
    tpu.vector_store %arg6[%c2_13, %c0_14, %c128_15], %16 {strides = array<i32>} : memref<3x8x256xbf16, #tpu.memory_space<vmem>>, vector<1x8x128xbf16>,
    %c2_16 = arith.constant 2 : index
    %c0_17 = arith.constant 0 : index
    %c119 = arith.constant 119 : index
    %17 = vector.load %arg6[%c2_16, %c0_17, %c119] : memref<3x8x256xbf16, #tpu.memory_space<vmem>>, vector<1x8x128xbf16>
    %18 = vector.shape_cast %17 : vector<1x8x128xbf16> to vector<8x128xbf16>
    %c0_18 = arith.constant 0 : index
    %c0_19 = arith.constant 0 : index
    %19 = vector.load %arg2[%c0_18, %c0_19] : memref<9x128xbf16, #tpu.memory_space<vmem>>, vector<1x128xbf16>
    %20 = vector.broadcast %19 : vector<1x128xbf16> to vector<8x128xbf16>
    %21 = arith.mulf %18, %20 : vector<8x128xbf16>
    %c0_20 = arith.constant 0 : index
    %c0_21 = arith.constant 0 : index
    %22 = vector.load %arg7[%c0_20, %c0_21] : memref<72x128xbf16, #tpu.memory_space<vmem>>, vector<8x128xbf16>
    tpu.vector_store %arg7[%c0_20, %c0_21], %21 {strides = array<i32>} : memref<72x128xbf16, #tpu.memory_space<vmem>>, vector<8x128xbf16>,
    %c1_22 = arith.constant 1 : index
    %c0_23 = arith.constant 0 : index
    %c120 = arith.constant 120 : index
    %23 = vector.load %arg6[%c1_22, %c0_23, %c120] : memref<3x8x256xbf16, #tpu.memory_space<vmem>>, vector<1x8x128xbf16>
    %24 = vector.shape_cast %23 : vector<1x8x128xbf16> to vector<8x128xbf16>
    %c1_24 = arith.constant 1 : index
    %c0_25 = arith.constant 0 : index
    %25 = vector.load %arg2[%c1_24, %c0_25] : memref<9x128xbf16, #tpu.memory_space<vmem>>, vector<1x128xbf16>
    %26 = vector.broadcast %25 : vector<1x128xbf16> to vector<8x128xbf16>
    %27 = arith.mulf %24, %26 : vector<8x128xbf16>
    %c8 = arith.constant 8 : index
    %c0_26 = arith.constant 0 : index
    %28 = vector.load %arg7[%c8, %c0_26] : memref<72x128xbf16, #tpu.memory_space<vmem>>, vector<8x128xbf16>
    tpu.vector_store %arg7[%c8, %c0_26], %27 {strides = array<i32>} : memref<72x128xbf16, #tpu.memory_space<vmem>>, vector<8x128xbf16>,
    %c2_27 = arith.constant 2 : index
    %c0_28 = arith.constant 0 : index
    %c120_29 = arith.constant 120 : index
    %29 = vector.load %arg6[%c2_27, %c0_28, %c120_29] : memref<3x8x256xbf16, #tpu.memory_space<vmem>>, vector<1x8x128xbf16>
    %30 = vector.shape_cast %29 : vector<1x8x128xbf16> to vector<8x128xbf16>
    %c2_30 = arith.constant 2 : index
    %c0_31 = arith.constant 0 : index
    %31 = vector.load %arg2[%c2_30, %c0_31] : memref<9x128xbf16, #tpu.memory_space<vmem>>, vector<1x128xbf16>
    %32 = vector.broadcast %31 : vector<1x128xbf16> to vector<8x128xbf16>
    %33 = arith.mulf %30, %32 : vector<8x128xbf16>
    %c16 = arith.constant 16 : index
    %c0_32 = arith.constant 0 : index
    %34 = vector.load %arg7[%c16, %c0_32] : memref<72x128xbf16, #tpu.memory_space<vmem>>, vector<8x128xbf16>
    tpu.vector_store %arg7[%c16, %c0_32], %33 {strides = array<i32>} : memref<72x128xbf16, #tpu.memory_space<vmem>>, vector<8x128xbf16>,
    %c0_33 = arith.constant 0 : index
    %c0_34 = arith.constant 0 : index
    %c127 = arith.constant 127 : index
    %35 = vector.load %arg6[%c0_33, %c0_34, %c127] : memref<3x8x256xbf16, #tpu.memory_space<vmem>>, vector<1x8x128xbf16>
    %36 = vector.shape_cast %35 : vector<1x8x128xbf16> to vector<8x128xbf16>
    %c3_35 = arith.constant 3 : index
    %c0_36 = arith.constant 0 : index
    %37 = vector.load %arg2[%c3_35, %c0_36] : memref<9x128xbf16, #tpu.memory_space<vmem>>, vector<1x128xbf16>
    %38 = vector.broadcast %37 : vector<1x128xbf16> to vector<8x128xbf16>
    %39 = arith.mulf %36, %38 : vector<8x128xbf16>
    %c24 = arith.constant 24 : index
    %c0_37 = arith.constant 0 : index
    %40 = vector.load %arg7[%c24, %c0_37] : memref<72x128xbf16, #tpu.memory_space<vmem>>, vector<8x128xbf16>
    tpu.vector_store %arg7[%c24, %c0_37], %39 {strides = array<i32>} : memref<72x128xbf16, #tpu.memory_space<vmem>>, vector<8x128xbf16>,
    %c0_38 = arith.constant 0 : index
    %c0_39 = arith.constant 0 : index
    %c0_40 = arith.constant 0 : index
    %41 = vector.load %arg1[%c0_38, %c0_39, %c0_40] : memref<4x8x128xbf16, #tpu.memory_space<vmem>>, vector<1x8x128xbf16>
    %42 = vector.shape_cast %41 : vector<1x8x128xbf16> to vector<8x128xbf16>
    %c32 = arith.constant 32 : index
    %c0_41 = arith.constant 0 : index
    %43 = vector.load %arg7[%c32, %c0_41] : memref<72x128xbf16, #tpu.memory_space<vmem>>, vector<8x128xbf16>
    tpu.vector_store %arg7[%c32, %c0_41], %42 {strides = array<i32>} : memref<72x128xbf16, #tpu.memory_space<vmem>>, vector<8x128xbf16>,
    %c1_42 = arith.constant 1 : index
    %c0_43 = arith.constant 0 : index
    %c0_44 = arith.constant 0 : index
    %44 = vector.load %arg1[%c1_42, %c0_43, %c0_44] : memref<4x8x128xbf16, #tpu.memory_space<vmem>>, vector<1x8x128xbf16>
    %45 = vector.shape_cast %44 : vector<1x8x128xbf16> to vector<8x128xbf16>
    %c40 = arith.constant 40 : index
    %c0_45 = arith.constant 0 : index
    %46 = vector.load %arg7[%c40, %c0_45] : memref<72x128xbf16, #tpu.memory_space<vmem>>, vector<8x128xbf16>
    tpu.vector_store %arg7[%c40, %c0_45], %45 {strides = array<i32>} : memref<72x128xbf16, #tpu.memory_space<vmem>>, vector<8x128xbf16>,
    %c2_46 = arith.constant 2 : index
    %c0_47 = arith.constant 0 : index
    %c127_48 = arith.constant 127 : index
    %47 = vector.load %arg6[%c2_46, %c0_47, %c127_48] : memref<3x8x256xbf16, #tpu.memory_space<vmem>>, vector<1x8x128xbf16>
    %48 = vector.shape_cast %47 : vector<1x8x128xbf16> to vector<8x128xbf16>
    %c6 = arith.constant 6 : index
    %c0_49 = arith.constant 0 : index
    %49 = vector.load %arg2[%c6, %c0_49] : memref<9x128xbf16, #tpu.memory_space<vmem>>, vector<1x128xbf16>
    %50 = vector.broadcast %49 : vector<1x128xbf16> to vector<8x128xbf16>
    %51 = arith.mulf %48, %50 : vector<8x128xbf16>
    %c48 = arith.constant 48 : index
    %c0_50 = arith.constant 0 : index
    %52 = vector.load %arg7[%c48, %c0_50] : memref<72x128xbf16, #tpu.memory_space<vmem>>, vector<8x128xbf16>
    tpu.vector_store %arg7[%c48, %c0_50], %51 {strides = array<i32>} : memref<72x128xbf16, #tpu.memory_space<vmem>>, vector<8x128xbf16>,
    %c2_51 = arith.constant 2 : index
    %c0_52 = arith.constant 0 : index
    %c0_53 = arith.constant 0 : index
    %53 = vector.load %arg1[%c2_51, %c0_52, %c0_53] : memref<4x8x128xbf16, #tpu.memory_space<vmem>>, vector<1x8x128xbf16>
    %54 = vector.shape_cast %53 : vector<1x8x128xbf16> to vector<8x128xbf16>
    %c56 = arith.constant 56 : index
    %c0_54 = arith.constant 0 : index
    %55 = vector.load %arg7[%c56, %c0_54] : memref<72x128xbf16, #tpu.memory_space<vmem>>, vector<8x128xbf16>
    tpu.vector_store %arg7[%c56, %c0_54], %54 {strides = array<i32>} : memref<72x128xbf16, #tpu.memory_space<vmem>>, vector<8x128xbf16>,
    %c3_55 = arith.constant 3 : index
    %c0_56 = arith.constant 0 : index
    %c0_57 = arith.constant 0 : index
    %56 = vector.load %arg1[%c3_55, %c0_56, %c0_57] : memref<4x8x128xbf16, #tpu.memory_space<vmem>>, vector<1x8x128xbf16>
    %57 = vector.shape_cast %56 : vector<1x8x128xbf16> to vector<8x128xbf16>
    %c64 = arith.constant 64 : index
    %c0_58 = arith.constant 0 : index
    %58 = vector.load %arg7[%c64, %c0_58] : memref<72x128xbf16, #tpu.memory_space<vmem>>, vector<8x128xbf16>
    tpu.vector_store %arg7[%c64, %c0_58], %57 {strides = array<i32>} : memref<72x128xbf16, #tpu.memory_space<vmem>>, vector<8x128xbf16>,
    %c0_59 = arith.constant 0 : index
    %c0_60 = arith.constant 0 : index
    %59 = vector.load %arg3[%c0_59, %c0_60] : memref<16x72xbf16, #tpu.memory_space<vmem>>, vector<16x72xbf16>
    %c0_61 = arith.constant 0 : index
    %c0_62 = arith.constant 0 : index
    %60 = vector.load %arg7[%c0_61, %c0_62] : memref<72x128xbf16, #tpu.memory_space<vmem>>, vector<72x128xbf16>
    %cst_63 = arith.constant dense<0.000000e+00> : vector<16x128xf32>
    %61 = tpu.matmul %59, %60, %cst_63 {dimension_numbers = #tpu.dot_dimension_numbers<[1], [0], [0], [1], [0, 0, 1, 1], [], []>} : vector<16x72xbf16>, vector<72x128xbf16>, vector<16x128xf32> -> vector<16x128xf32>
    %c0_64 = arith.constant 0 : index
    %c0_65 = arith.constant 0 : index
    %62 = vector.load %arg4[%c0_64, %c0_65] : memref<16x1xf32, #tpu.memory_space<vmem>>, vector<16x1xf32>
    %63 = vector.broadcast %62 : vector<16x1xf32> to vector<16x128xf32>
    %64 = arith.addf %61, %63 : vector<16x128xf32>
    %c0_66 = arith.constant 0 : index
    %c0_67 = arith.constant 0 : index
    %65 = vector.load %arg5[%c0_66, %c0_67] : memref<16x128xf32, #tpu.memory_space<vmem>>, vector<16x128xf32>
    tpu.vector_store %arg5[%c0_66, %c0_67], %64 {strides = array<i32>} : memref<16x128xf32, #tpu.memory_space<vmem>>, vector<16x128xf32>,
    return
  }
  func.func @transform_0(%arg0: i32) -> (i32, i32, i32) {
    %c0_i32 = arith.constant 0 : i32
    %c0_i32_0 = arith.constant 0 : i32
    %c0_i32_1 = arith.constant 0 : i32
    return %c0_i32, %c0_i32_0, %arg0 : i32, i32, i32
  }
  func.func @transform_1(%arg0: i32) -> (i32, i32) {
    %c0_i32 = arith.constant 0 : i32
    %c0_i32_0 = arith.constant 0 : i32
    %c0_i32_1 = arith.constant 0 : i32
    return %c0_i32, %c0_i32_0 : i32, i32
  }
  func.func @transform_2(%arg0: i32) -> (i32, i32) {
    %c0_i32 = arith.constant 0 : i32
    %c0_i32_0 = arith.constant 0 : i32
    %c0_i32_1 = arith.constant 0 : i32
    return %c0_i32, %c0_i32_0 : i32, i32
  }
  func.func @transform_3(%arg0: i32) -> (i32, i32) {
    %c0_i32 = arith.constant 0 : i32
    %c0_i32_0 = arith.constant 0 : i32
    %c0_i32_1 = arith.constant 0 : i32
    return %c0_i32, %c0_i32_0 : i32, i32
  }
  func.func @transform_4(%arg0: i32) -> (i32, i32) {
    %c0_i32 = arith.constant 0 : i32
    %c0_i32_0 = arith.constant 0 : i32
    return %c0_i32, %arg0 : i32, i32
  }
}

module attributes {stable_mosaic.version = 11 : i64} {
  func.func @_down_kernel(%arg0: i32, %arg1: memref<4x16x64xbf16, #tpu.memory_space<vmem>>, %arg2: memref<9x64xbf16, #tpu.memory_space<vmem>>, %arg3: memref<32x144xbf16, #tpu.memory_space<vmem>>, %arg4: memref<32x1xf32, #tpu.memory_space<vmem>>, %arg5: memref<32x64xf32, #tpu.memory_space<vmem>>, %arg6: memref<3x16x192xbf16, #tpu.memory_space<vmem>>, %arg7: memref<144x64xbf16, #tpu.memory_space<vmem>>) attributes {dimension_semantics = [#tpu.dimension_semantics<parallel>], iteration_bounds = array<i64: 1>, scalar_prefetch = 0 : i64, scratch_operands = 2 : i64, tpu.core_type = #tpu.core_type<tc>, window_params = [{transform_indices = @transform_0, window_bounds = array<i64: 4, 16, 64>}, {pipeline_mode = #tpu.pipeline_mode<synchronous>, transform_indices = @transform_1, window_bounds = array<i64: 9, 64>}, {pipeline_mode = #tpu.pipeline_mode<synchronous>, transform_indices = @transform_2, window_bounds = array<i64: 32, 144>}, {pipeline_mode = #tpu.pipeline_mode<synchronous>, transform_indices = @transform_3, window_bounds = array<i64: 32, 1>}, {transform_indices = @transform_4, window_bounds = array<i64: 32, 64>}]} {
    %cst = arith.constant 0.000000e+00 : bf16
    %0 = vector.broadcast %cst : bf16 to vector<3x16x128xbf16>
    %c0 = arith.constant 0 : index
    %c0_0 = arith.constant 0 : index
    %c0_1 = arith.constant 0 : index
    %1 = vector.load %arg6[%c0, %c0_0, %c0_1] : memref<3x16x192xbf16, #tpu.memory_space<vmem>>, vector<3x16x128xbf16>
    tpu.vector_store %arg6[%c0, %c0_0, %c0_1], %0 {strides = array<i32>} : memref<3x16x192xbf16, #tpu.memory_space<vmem>>, vector<3x16x128xbf16>,
    %c1 = arith.constant 1 : index
    %c0_2 = arith.constant 0 : index
    %c0_3 = arith.constant 0 : index
    %2 = vector.load %arg1[%c1, %c0_2, %c0_3] : memref<4x16x64xbf16, #tpu.memory_space<vmem>>, vector<1x16x64xbf16>
    %3 = vector.shape_cast %2 : vector<1x16x64xbf16> to vector<16x64xbf16>
    %c0_4 = arith.constant 0 : index
    %c0_5 = arith.constant 0 : index
    %c128 = arith.constant 128 : index
    %4 = vector.load %arg6[%c0_4, %c0_5, %c128] : memref<3x16x192xbf16, #tpu.memory_space<vmem>>, vector<1x16x64xbf16>
    %5 = vector.shape_cast %4 : vector<1x16x64xbf16> to vector<16x64xbf16>
    %6 = vector.shape_cast %3 : vector<16x64xbf16> to vector<1x16x64xbf16>
    tpu.vector_store %arg6[%c0_4, %c0_5, %c128], %6 {strides = array<i32>} : memref<3x16x192xbf16, #tpu.memory_space<vmem>>, vector<1x16x64xbf16>,
    %c2 = arith.constant 2 : index
    %c0_6 = arith.constant 0 : index
    %c0_7 = arith.constant 0 : index
    %7 = vector.load %arg1[%c2, %c0_6, %c0_7] : memref<4x16x64xbf16, #tpu.memory_space<vmem>>, vector<1x16x64xbf16>
    %8 = vector.shape_cast %7 : vector<1x16x64xbf16> to vector<16x64xbf16>
    %c1_8 = arith.constant 1 : index
    %c0_9 = arith.constant 0 : index
    %c128_10 = arith.constant 128 : index
    %9 = vector.load %arg6[%c1_8, %c0_9, %c128_10] : memref<3x16x192xbf16, #tpu.memory_space<vmem>>, vector<1x16x64xbf16>
    %10 = vector.shape_cast %9 : vector<1x16x64xbf16> to vector<16x64xbf16>
    %11 = vector.shape_cast %8 : vector<16x64xbf16> to vector<1x16x64xbf16>
    tpu.vector_store %arg6[%c1_8, %c0_9, %c128_10], %11 {strides = array<i32>} : memref<3x16x192xbf16, #tpu.memory_space<vmem>>, vector<1x16x64xbf16>,
    %c3 = arith.constant 3 : index
    %c0_11 = arith.constant 0 : index
    %c0_12 = arith.constant 0 : index
    %12 = vector.load %arg1[%c3, %c0_11, %c0_12] : memref<4x16x64xbf16, #tpu.memory_space<vmem>>, vector<1x16x64xbf16>
    %13 = vector.shape_cast %12 : vector<1x16x64xbf16> to vector<16x64xbf16>
    %c2_13 = arith.constant 2 : index
    %c0_14 = arith.constant 0 : index
    %c128_15 = arith.constant 128 : index
    %14 = vector.load %arg6[%c2_13, %c0_14, %c128_15] : memref<3x16x192xbf16, #tpu.memory_space<vmem>>, vector<1x16x64xbf16>
    %15 = vector.shape_cast %14 : vector<1x16x64xbf16> to vector<16x64xbf16>
    %16 = vector.shape_cast %13 : vector<16x64xbf16> to vector<1x16x64xbf16>
    tpu.vector_store %arg6[%c2_13, %c0_14, %c128_15], %16 {strides = array<i32>} : memref<3x16x192xbf16, #tpu.memory_space<vmem>>, vector<1x16x64xbf16>,
    %c2_16 = arith.constant 2 : index
    %c0_17 = arith.constant 0 : index
    %c123 = arith.constant 123 : index
    %17 = vector.load %arg6[%c2_16, %c0_17, %c123] : memref<3x16x192xbf16, #tpu.memory_space<vmem>>, vector<1x16x64xbf16>
    %18 = vector.shape_cast %17 : vector<1x16x64xbf16> to vector<16x64xbf16>
    %c0_18 = arith.constant 0 : index
    %c0_19 = arith.constant 0 : index
    %19 = vector.load %arg2[%c0_18, %c0_19] : memref<9x64xbf16, #tpu.memory_space<vmem>>, vector<1x64xbf16>
    %20 = vector.broadcast %19 : vector<1x64xbf16> to vector<16x64xbf16>
    %21 = arith.mulf %18, %20 : vector<16x64xbf16>
    %c0_20 = arith.constant 0 : index
    %c0_21 = arith.constant 0 : index
    %22 = vector.load %arg7[%c0_20, %c0_21] : memref<144x64xbf16, #tpu.memory_space<vmem>>, vector<16x64xbf16>
    tpu.vector_store %arg7[%c0_20, %c0_21], %21 {strides = array<i32>} : memref<144x64xbf16, #tpu.memory_space<vmem>>, vector<16x64xbf16>,
    %c1_22 = arith.constant 1 : index
    %c0_23 = arith.constant 0 : index
    %c124 = arith.constant 124 : index
    %23 = vector.load %arg6[%c1_22, %c0_23, %c124] : memref<3x16x192xbf16, #tpu.memory_space<vmem>>, vector<1x16x64xbf16>
    %24 = vector.shape_cast %23 : vector<1x16x64xbf16> to vector<16x64xbf16>
    %c1_24 = arith.constant 1 : index
    %c0_25 = arith.constant 0 : index
    %25 = vector.load %arg2[%c1_24, %c0_25] : memref<9x64xbf16, #tpu.memory_space<vmem>>, vector<1x64xbf16>
    %26 = vector.broadcast %25 : vector<1x64xbf16> to vector<16x64xbf16>
    %27 = arith.mulf %24, %26 : vector<16x64xbf16>
    %c16 = arith.constant 16 : index
    %c0_26 = arith.constant 0 : index
    %28 = vector.load %arg7[%c16, %c0_26] : memref<144x64xbf16, #tpu.memory_space<vmem>>, vector<16x64xbf16>
    tpu.vector_store %arg7[%c16, %c0_26], %27 {strides = array<i32>} : memref<144x64xbf16, #tpu.memory_space<vmem>>, vector<16x64xbf16>,
    %c2_27 = arith.constant 2 : index
    %c0_28 = arith.constant 0 : index
    %c124_29 = arith.constant 124 : index
    %29 = vector.load %arg6[%c2_27, %c0_28, %c124_29] : memref<3x16x192xbf16, #tpu.memory_space<vmem>>, vector<1x16x64xbf16>
    %30 = vector.shape_cast %29 : vector<1x16x64xbf16> to vector<16x64xbf16>
    %c2_30 = arith.constant 2 : index
    %c0_31 = arith.constant 0 : index
    %31 = vector.load %arg2[%c2_30, %c0_31] : memref<9x64xbf16, #tpu.memory_space<vmem>>, vector<1x64xbf16>
    %32 = vector.broadcast %31 : vector<1x64xbf16> to vector<16x64xbf16>
    %33 = arith.mulf %30, %32 : vector<16x64xbf16>
    %c32 = arith.constant 32 : index
    %c0_32 = arith.constant 0 : index
    %34 = vector.load %arg7[%c32, %c0_32] : memref<144x64xbf16, #tpu.memory_space<vmem>>, vector<16x64xbf16>
    tpu.vector_store %arg7[%c32, %c0_32], %33 {strides = array<i32>} : memref<144x64xbf16, #tpu.memory_space<vmem>>, vector<16x64xbf16>,
    %c0_33 = arith.constant 0 : index
    %c0_34 = arith.constant 0 : index
    %c127 = arith.constant 127 : index
    %35 = vector.load %arg6[%c0_33, %c0_34, %c127] : memref<3x16x192xbf16, #tpu.memory_space<vmem>>, vector<1x16x64xbf16>
    %36 = vector.shape_cast %35 : vector<1x16x64xbf16> to vector<16x64xbf16>
    %c3_35 = arith.constant 3 : index
    %c0_36 = arith.constant 0 : index
    %37 = vector.load %arg2[%c3_35, %c0_36] : memref<9x64xbf16, #tpu.memory_space<vmem>>, vector<1x64xbf16>
    %38 = vector.broadcast %37 : vector<1x64xbf16> to vector<16x64xbf16>
    %39 = arith.mulf %36, %38 : vector<16x64xbf16>
    %c48 = arith.constant 48 : index
    %c0_37 = arith.constant 0 : index
    %40 = vector.load %arg7[%c48, %c0_37] : memref<144x64xbf16, #tpu.memory_space<vmem>>, vector<16x64xbf16>
    tpu.vector_store %arg7[%c48, %c0_37], %39 {strides = array<i32>} : memref<144x64xbf16, #tpu.memory_space<vmem>>, vector<16x64xbf16>,
    %c0_38 = arith.constant 0 : index
    %c0_39 = arith.constant 0 : index
    %c0_40 = arith.constant 0 : index
    %41 = vector.load %arg1[%c0_38, %c0_39, %c0_40] : memref<4x16x64xbf16, #tpu.memory_space<vmem>>, vector<1x16x64xbf16>
    %42 = vector.shape_cast %41 : vector<1x16x64xbf16> to vector<16x64xbf16>
    %c64 = arith.constant 64 : index
    %c0_41 = arith.constant 0 : index
    %43 = vector.load %arg7[%c64, %c0_41] : memref<144x64xbf16, #tpu.memory_space<vmem>>, vector<16x64xbf16>
    tpu.vector_store %arg7[%c64, %c0_41], %42 {strides = array<i32>} : memref<144x64xbf16, #tpu.memory_space<vmem>>, vector<16x64xbf16>,
    %c1_42 = arith.constant 1 : index
    %c0_43 = arith.constant 0 : index
    %c0_44 = arith.constant 0 : index
    %44 = vector.load %arg1[%c1_42, %c0_43, %c0_44] : memref<4x16x64xbf16, #tpu.memory_space<vmem>>, vector<1x16x64xbf16>
    %45 = vector.shape_cast %44 : vector<1x16x64xbf16> to vector<16x64xbf16>
    %c80 = arith.constant 80 : index
    %c0_45 = arith.constant 0 : index
    %46 = vector.load %arg7[%c80, %c0_45] : memref<144x64xbf16, #tpu.memory_space<vmem>>, vector<16x64xbf16>
    tpu.vector_store %arg7[%c80, %c0_45], %45 {strides = array<i32>} : memref<144x64xbf16, #tpu.memory_space<vmem>>, vector<16x64xbf16>,
    %c2_46 = arith.constant 2 : index
    %c0_47 = arith.constant 0 : index
    %c127_48 = arith.constant 127 : index
    %47 = vector.load %arg6[%c2_46, %c0_47, %c127_48] : memref<3x16x192xbf16, #tpu.memory_space<vmem>>, vector<1x16x64xbf16>
    %48 = vector.shape_cast %47 : vector<1x16x64xbf16> to vector<16x64xbf16>
    %c6 = arith.constant 6 : index
    %c0_49 = arith.constant 0 : index
    %49 = vector.load %arg2[%c6, %c0_49] : memref<9x64xbf16, #tpu.memory_space<vmem>>, vector<1x64xbf16>
    %50 = vector.broadcast %49 : vector<1x64xbf16> to vector<16x64xbf16>
    %51 = arith.mulf %48, %50 : vector<16x64xbf16>
    %c96 = arith.constant 96 : index
    %c0_50 = arith.constant 0 : index
    %52 = vector.load %arg7[%c96, %c0_50] : memref<144x64xbf16, #tpu.memory_space<vmem>>, vector<16x64xbf16>
    tpu.vector_store %arg7[%c96, %c0_50], %51 {strides = array<i32>} : memref<144x64xbf16, #tpu.memory_space<vmem>>, vector<16x64xbf16>,
    %c2_51 = arith.constant 2 : index
    %c0_52 = arith.constant 0 : index
    %c0_53 = arith.constant 0 : index
    %53 = vector.load %arg1[%c2_51, %c0_52, %c0_53] : memref<4x16x64xbf16, #tpu.memory_space<vmem>>, vector<1x16x64xbf16>
    %54 = vector.shape_cast %53 : vector<1x16x64xbf16> to vector<16x64xbf16>
    %c112 = arith.constant 112 : index
    %c0_54 = arith.constant 0 : index
    %55 = vector.load %arg7[%c112, %c0_54] : memref<144x64xbf16, #tpu.memory_space<vmem>>, vector<16x64xbf16>
    tpu.vector_store %arg7[%c112, %c0_54], %54 {strides = array<i32>} : memref<144x64xbf16, #tpu.memory_space<vmem>>, vector<16x64xbf16>,
    %c3_55 = arith.constant 3 : index
    %c0_56 = arith.constant 0 : index
    %c0_57 = arith.constant 0 : index
    %56 = vector.load %arg1[%c3_55, %c0_56, %c0_57] : memref<4x16x64xbf16, #tpu.memory_space<vmem>>, vector<1x16x64xbf16>
    %57 = vector.shape_cast %56 : vector<1x16x64xbf16> to vector<16x64xbf16>
    %c128_58 = arith.constant 128 : index
    %c0_59 = arith.constant 0 : index
    %58 = vector.load %arg7[%c128_58, %c0_59] : memref<144x64xbf16, #tpu.memory_space<vmem>>, vector<16x64xbf16>
    tpu.vector_store %arg7[%c128_58, %c0_59], %57 {strides = array<i32>} : memref<144x64xbf16, #tpu.memory_space<vmem>>, vector<16x64xbf16>,
    %c0_60 = arith.constant 0 : index
    %c0_61 = arith.constant 0 : index
    %59 = vector.load %arg3[%c0_60, %c0_61] : memref<32x144xbf16, #tpu.memory_space<vmem>>, vector<32x144xbf16>
    %c0_62 = arith.constant 0 : index
    %c0_63 = arith.constant 0 : index
    %60 = vector.load %arg7[%c0_62, %c0_63] : memref<144x64xbf16, #tpu.memory_space<vmem>>, vector<144x64xbf16>
    %cst_64 = arith.constant dense<0.000000e+00> : vector<32x64xf32>
    %61 = tpu.matmul %59, %60, %cst_64 {dimension_numbers = #tpu.dot_dimension_numbers<[1], [0], [0], [1], [0, 0, 1, 1], [], []>} : vector<32x144xbf16>, vector<144x64xbf16>, vector<32x64xf32> -> vector<32x64xf32>
    %c0_65 = arith.constant 0 : index
    %c0_66 = arith.constant 0 : index
    %62 = vector.load %arg4[%c0_65, %c0_66] : memref<32x1xf32, #tpu.memory_space<vmem>>, vector<32x1xf32>
    %63 = vector.broadcast %62 : vector<32x1xf32> to vector<32x64xf32>
    %64 = arith.addf %61, %63 : vector<32x64xf32>
    %c0_67 = arith.constant 0 : index
    %c0_68 = arith.constant 0 : index
    %65 = vector.load %arg5[%c0_67, %c0_68] : memref<32x64xf32, #tpu.memory_space<vmem>>, vector<32x64xf32>
    tpu.vector_store %arg5[%c0_67, %c0_68], %64 {strides = array<i32>} : memref<32x64xf32, #tpu.memory_space<vmem>>, vector<32x64xf32>,
    return
  }
  func.func @transform_0(%arg0: i32) -> (i32, i32, i32) {
    %c0_i32 = arith.constant 0 : i32
    %c0_i32_0 = arith.constant 0 : i32
    %c0_i32_1 = arith.constant 0 : i32
    return %c0_i32, %c0_i32_0, %arg0 : i32, i32, i32
  }
  func.func @transform_1(%arg0: i32) -> (i32, i32) {
    %c0_i32 = arith.constant 0 : i32
    %c0_i32_0 = arith.constant 0 : i32
    %c0_i32_1 = arith.constant 0 : i32
    return %c0_i32, %c0_i32_0 : i32, i32
  }
  func.func @transform_2(%arg0: i32) -> (i32, i32) {
    %c0_i32 = arith.constant 0 : i32
    %c0_i32_0 = arith.constant 0 : i32
    %c0_i32_1 = arith.constant 0 : i32
    return %c0_i32, %c0_i32_0 : i32, i32
  }
  func.func @transform_3(%arg0: i32) -> (i32, i32) {
    %c0_i32 = arith.constant 0 : i32
    %c0_i32_0 = arith.constant 0 : i32
    %c0_i32_1 = arith.constant 0 : i32
    return %c0_i32, %c0_i32_0 : i32, i32
  }
  func.func @transform_4(%arg0: i32) -> (i32, i32) {
    %c0_i32 = arith.constant 0 : i32
    %c0_i32_0 = arith.constant 0 : i32
    return %c0_i32, %arg0 : i32, i32
  }
}

</mosaic_0001>

<bundles_post_ra>
// kernel: tile.24
= control target key start
LH: loop header
LB: loop body
LE: loop exit
PB: predicated region body
PF: predicated region fallthrough
CT: control target
= control target key end

     0   :  { %vm149_vm0 = vcmask 523264   ;;  %vm147_vm1 = vcmask 1047556   ;;  %vm164_vm2 = vcmask 1048064   ;;  %s255_s0 = inlined_call_operand.vmem [shape: bf16[9,2,64], index: 0, kind: input, shape index: {}]   ;;  %s256_s1 = inlined_call_operand.vmem [shape: bf16[9,128], index: 1, kind: output, shape index: {}]  }
   0x1   :  { %v194_v0 = vld [vmem:[%s255_s0 + $0x8] sm:$0x1]  ;;  %v195_v1 = vld [vmem:[%s255_s0 + $0x7] sm:$0x1]  ;;  %v196_v2 = vld [vmem:[%s255_s0 + $0x6] sm:$0x1] }
   0x2   :  { %v17_v3 = vunpack.c.l.bf16 %v194_v0  ;;  %v33_v4 = vunpack.c.l.bf16 %v195_v1  ;;  %v49_v5 = vunpack.c.l.bf16 %v196_v2  ;;  %v197_v6 = vld [vmem:[%s255_s0 + $0x5] sm:$0x1]  ;;  %v198_v7 = vld [vmem:[%s255_s0 + $0x4] sm:$0x1]  ;;  %v199_v8 = vld [vmem:[%s255_s0 + $0x3] sm:$0x1] }
   0x3   :  { %v65_v9 = vunpack.c.l.bf16 %v197_v6  ;;  %v81_v10 = vunpack.c.l.bf16 %v198_v7  ;;  %v97_v11 = vunpack.c.l.bf16 %v199_v8  ;;  %v200_v12 = vld [vmem:[%s255_s0 + $0x2] sm:$0x1]  ;;  %v201_v13 = vld [vmem:[%s255_s0 + $0x1] sm:$0x1]  ;;  %v141_v14 = vld [vmem:[%s255_s0] sm:$0x1] }
   0x4   :  { %20 = vst [vmem:[#allocation1 + $0x40] sm:$0x3] %v17_v3  ;;  %36 = vst [vmem:[#allocation1 + $0x38] sm:$0x3] %v33_v4  ;;  %v113_v15 = vunpack.c.l.bf16 %v200_v12  ;;  %v128_v16 = vunpack.c.l.bf16 %v201_v13  ;;  %v142_v17 = vunpack.c.l.bf16 %v141_v14  ;;  %s214_s0 = smov 64  }
   0x5   :  { %52 = vst [vmem:[#allocation1 + $0x30] sm:$0x3] %v49_v5  ;;  %68 = vst [vmem:[#allocation1 + $0x28] sm:$0x3] %v65_v9 }
   0x6   :  { %84 = vst [vmem:[#allocation1 + $0x20] sm:$0x3] %v81_v10  ;;  %100 = vst [vmem:[#allocation1 + $0x18] sm:$0x3] %v97_v11 }
   0x7   :  { %116 = vst [vmem:[#allocation1 + $0x10] sm:$0x3] %v113_v15  ;;  %131 = vst [vmem:[#allocation1 + $0x8] sm:$0x3] %v128_v16 }
   0x8   :  { %144 = vst [vmem:[#allocation1] sm:$0x3] %v142_v17 }
   0xb   :  { %v167_v18 = vld [vmem:[#allocation1 + $0x41] sm:$0x1]   ;;  %v152_v19 = vld [vmem:[#allocation1 + $0x40] sm:$0x1]  }
   0xc   :  { %155 = vst.msk [vmem:[#allocation0 + $0x8] sm:$0x1] %vm149_vm0, %v152_v19  }
   0xd   :  { %v146_v20 = vld [vmem:[#allocation1] ss:$8 sm:$0xf0]   ;;  %v159_v21 = vld [vmem:[#allocation1 + $0x1] ss:$8 sm:$0xf0]  }
   0xf   :  { %v145_v22 = vld [vmem:[#allocation1] ss:$8 sm:$0xf]   ;;  %v157_v23 = vld [vmem:[#allocation1 + $0x1] ss:$8 sm:$0xf]  }
  0x10   :  { %v148_v24 = vsel %vm147_vm1, %v146_v20, %v145_v22  ;;  %v161_v25 = vsel %vm147_vm1, %v159_v21, %v157_v23 }
  0x11   :  { %v209_v26 = vpack.i.bf16 %v167_v18, %v161_v25  ;;  %150 = vst.msk [vmem:[#allocation0] sm:$0xff] %vm149_vm0, %v148_v24  }
  0x13   :  { %210 = vrot.lane.b32.xlu0 %v209_v26, %s214_s0 }
  0x85   :  { %v211_v27 = vpop.permute.xlu0 %210 }
  0x86   :  { %v213_v28 = vunpack.i.h.bf16 %v211_v27  ;;  %v212_v29 = vunpack.i.l.bf16 %v211_v27 }
  0x88   :  { %165 = vst.msk [vmem:[#allocation0] sm:$0xff] %vm164_vm2, %v212_v29   ;;  %172 = vst.msk [vmem:[#allocation0 + $0x8] sm:$0x1] %vm164_vm2, %v213_v28  }
  0x8f   :  { %v177_v30 = vld [vmem:[#allocation0] sm:$0xff]  ;;  %v182_v31 = vld [vmem:[#allocation0 + $0x8] sm:$0xff] }
  0x90   :  { %v206_v32 = vpack.c.bf16 %v182_v31, %v177_v30 }
  0x92   :  { %207 = vst [vmem:[%s256_s1] sm:$0xff] %v206_v32  }

// kernel: image_encoder.4
= control target key start
LH: loop header
LB: loop body
LE: loop exit
PB: predicated region body
PF: predicated region fallthrough
CT: control target
= control target key end

     0   :  { %s758_s15 = smov 0   ;;  %s760_s16 = smov 0   ;;  %s861_s0 = inlined_call_operand.vmem [shape: bf16[4,8,256], index: 0, kind: input, shape index: {}]   ;;  %s862_s1 = inlined_call_operand.vmem [shape: bf16[9,128], index: 1, kind: input, shape index: {}]   ;;  %s863_s2 = inlined_call_operand.vmem [shape: bf16[16,72], index: 2, kind: input, shape index: {}]   ;;  %s864_s3 = inlined_call_operand.vmem [shape: f32[16,1], index: 3, kind: input, shape index: {}]   ;;  %s865_s4 = inlined_call_operand.vmem [shape: f32[16,256], index: 4, kind: output, shape index: {}]  }
   0x1   :  { %s762_s17 = smov 0  }
   0x2 LB: > { %s608_s18 = sadd.s32 4294967295, %s722_s17   ;;  %s775_s19 = sadd.s32 1, %s722_s17   ;;  %s722_s17 = sphi %s762_s17, %s869_s17   ;;  %s718_s16 = sphi %s760_s16, %s868_s16   ;;  %s714_s15 = sphi %s758_s15, %s867_s15  }
   0x3   : > { %s18_s20 = ssub.s32 %s722_s17, %s775_s19  ;;  %s21_s21 = sadd.s32 1, %s718_s16 }
   0x4   : > { %p19_p0 = scmp.eq.s32.totalorder %s18_s20, 0  ;;  %p28_p1 = scmp.ne.s32.totalorder %s718_s16, %s714_s15 }
   0x5   : > { %p29_p2 = scmp.eq.s32.totalorder %s722_s17, 0  ;;  %p121_p3 = scmp.eq.s32.totalorder %s608_s18, 1 }
   0x6   : > { %s786_s22 = scalar_select %p19_p0, %s718_s16, %s21_s21  }
   0x7   : > { %p30_p4 = por %p29_p2, %p28_p1  ;;  %p788_p5 = por %p121_p3, %p28_p1 }
   0x8   : > { %p611_p6 = scmp.ge.s32.totalorder %s722_s17, 2 }
   0xa   : > { %152 = sbr.rel (%p611_p6) target bundleno = 24 (0x18), region = 28 }
  0x11   : > { %155 = sbr.rel (!%p30_p4) target bundleno = 24 (0x18), region = 32  ;;  %s157_s24 = sand.u32 (%p30_p4), 1, %s718_s16  }
  0x12   : > { %s613_s25 = sshll.u32 (%p30_p4), %s722_s17, 2  ;;  %s612_s26 = sshll.u32 (%p30_p4), %s157_s24, 4 }
  0x13   : > { %s161_s29 = scalar_lea.vmem (%p30_p4), %s861_s0, %s613_s25  ;;  %s159_s30 = scalar_lea.vmem (%p30_p4), [#allocation4], %s612_s26 }
  0x14   : > { %v177_v0 = vld [vmem:[%s161_s29] sm:$0xf] (%p30_p4)  ;;  %v179_v1 = vld [vmem:[%s161_s29 + $0x8] sm:$0xf] (%p30_p4)  ;;  %v181_v2 = vld [vmem:[%s161_s29 + $0x10] sm:$0xf] (%p30_p4) }
  0x15   : > { %178 = vst [vmem:[%s159_s30] sm:$0xf] (%p30_p4), %v177_v0  ;;  %180 = vst [vmem:[%s159_s30 + $0x4] sm:$0xf] (%p30_p4), %v179_v1  ;;  %v183_v3 = vld [vmem:[%s161_s29 + $0x18] sm:$0xf] (%p30_p4) }
  0x16   : > { %182 = vst [vmem:[%s159_s30 + $0x8] sm:$0xf] (%p30_p4), %v181_v2  ;;  %184 = vst [vmem:[%s159_s30 + $0xc] sm:$0xf] (%p30_p4), %v183_v3 }
  0x18 PF: > { %p614_p7 = scmp.ge.s32.totalorder %s722_s17, 1  ;;  %p214_p8 = scmp.lt.s32.totalorder %s722_s17, 3 }
  0x1a   : > { %p215_p9 = pnand %p614_p7, %p214_p8 }
  0x1b   : > { %v261_v4 = vld [vmem:[%s862_s1] sm:$0x1] (!%p215_p9)  ;;  %v265_v5 = vlaneseq (!%p215_p9)  ;;  %v316_v6 = vld [vmem:[%s862_s1] sm:$0x2] (!%p215_p9)  ;;  %v373_v14 = vld [vmem:[%s862_s1] sm:$0x8] (!%p215_p9) }
  0x1c   : > { %218 = sbr.rel (%p215_p9) target bundleno = 531 (0x213), region = 73  ;;  %v263_v7 = vpack.i.b16 (!%p215_p9), %v261_v4, %v261_v4  ;;  %v288_v8 = vld [vmem:[%s862_s1] sm:$0x1] (!%p215_p9)  ;;  %v341_v9 = vld [vmem:[%s862_s1] sm:$0x2] (!%p215_p9)  ;;  %v318_v11 = vpack.i.b16 (!%p215_p9), %v316_v6, %v316_v6  ;;  %s221_s20 = sand.u32 (!%p215_p9), 1, %s714_s15   ;;  %v375_v20 = vpack.i.b16 (!%p215_p9), %v373_v14, %v373_v14 }
  0x1d   : > { %v266_v10 = vshrl.u32 (!%p215_p9), %v265_v5, 7  ;;  %v290_v12 = vshrl.u32 (!%p215_p9), %v288_v8, 16  ;;  %v343_v13 = vshrl.u32 (!%p215_p9), %v341_v9, 16  ;;  %s816_s21 = sshll.u32 (!%p215_p9), %s221_s20, 4  ;;  %v724_v19 = vmov (!%p215_p9), 0   ;;  %s725_s15 = smov (!%p215_p9), 119  }
  0x1e   : > { %248 = vst [vmem:[#allocation2 + $0x10] sm:$0xf] (!%p215_p9), %v724_v19  ;;  %246 = vst [vmem:[#allocation2] sm:$0xf] (!%p215_p9), %v724_v19  ;;  %692 = vset.pattern.permute.xlu0 (!%p215_p9), %v724_v19  ;;  %693 = vset.pattern.permute.xlu1 (!%p215_p9), %v724_v19  ;;  %s819_s24 = scalar_lea.vmem (!%p215_p9), [#allocation4], %s816_s21  ;;  %s726_s25 = smov (!%p215_p9), 120  }
  0x1f   : > { %v267_v15 = vsub.s32 (!%p215_p9), 0, %v266_v10  ;;  %v322_v16 = vsub.s32 (!%p215_p9), 1, %v266_v10  ;;  %v291_v17 = vpack.i.b16 (!%p215_p9), %v290_v12, %v290_v12  ;;  %v344_v18 = vpack.i.b16 (!%p215_p9), %v343_v13, %v343_v13  ;;  %247 = vst [vmem:[#allocation2 + $0x8] sm:$0xf] (!%p215_p9), %v724_v19  ;;  %v619_v22 = vld [vmem:[%s819_s24 + $0xc] sm:$0xf] (!%p215_p9) }
  0x20   : > { %v379_v21 = vsub.s32 (!%p215_p9), 3, %v266_v10  ;;  %v618_v23 = vld [vmem:[%s819_s24 + $0x8] sm:$0xf] (!%p215_p9)  ;;  %259 = vst [vmem:[#allocation2 + $0x14] sm:$0xf] (!%p215_p9), %v619_v22  ;;  %s727_s26 = smov (!%p215_p9), 127  }
  0x21   : > { %v268_v24 = vrot.slane (!%p215_p9), %v263_v7, %v267_v15  ;;  %v323_v25 = vrot.slane (!%p215_p9), %v318_v11, %v322_v16  ;;  %v296_v26 = vrot.slane (!%p215_p9), %v291_v17, %v267_v15  ;;  %v349_v27 = vrot.slane (!%p215_p9), %v344_v18, %v322_v16  ;;  %255 = vst [vmem:[#allocation2 + $0xc] sm:$0xf] (!%p215_p9), %v618_v23  ;;  %v617_v28 = vld [vmem:[%s819_s24 + $0x4] sm:$0xf] (!%p215_p9)  ;;  %s729_s27 = smov (!%p215_p9), 9   ;;  %v626_v51 = vld [vmem:[%s819_s24 + $0x8] sm:$0xff] (!%p215_p9)  }
  0x22   : > { %251 = vst [vmem:[#allocation2 + $0x4] sm:$0xf] (!%p215_p9), %v617_v28  ;;  %v380_v33 = vrot.slane (!%p215_p9), %v375_v20, %v379_v21  ;;  %vm275_vm0 = vcmask (!%p215_p9), 973824   ;;  %vm303_vm1 = vcmask (!%p215_p9), 982016   ;;  %v728_v48 = vmov (!%p215_p9), 0.0   ;;  %v368_v50 = vld [vmem:[%s819_s24] sm:$0xff] (!%p215_p9)  }
  0x23   : > { %v620_v29 = vcombine.low %v268_v24, %v268_v24  ;;  %v622_v30 = vcombine.low %v323_v25, %v323_v25  ;;  %v621_v31 = vcombine.low %v296_v26, %v296_v26  ;;  %v623_v32 = vcombine.low %v349_v27, %v349_v27  ;;  %645 = vmatprep.subr.bf16.mxu0 %v728_v48  ;;  %s730_s28 = smov 8   ;;  %s731_s29 = smov 1   ;;  %v412_v61 = vld [vmem:[%s864_s3] sm:$0xff]  ;;  %v413_v62 = vld [vmem:[%s864_s3 + $0x8] sm:$0xff] }
  0x24   : > { %v625_v34 = vcombine.low %v380_v33, %v380_v33  ;;  %vm356_vm2 = vcmask 1039360   ;;  %369 = vst [vmem:[#allocation3 + $0x10] sm:$0xff] %v368_v50   ;;  %398 = vst [vmem:[#allocation3 + $0x1c] sm:$0xff] %v626_v51   ;;  %vm732_vm3 = vmmov 0   ;;  %vm283_vm4 = vcmask 72704   ;;  %v699_v20 = vld [vmem:[%s863_s2] sm:$0xff]  }
  0x25   : > { %272 = vrot.lane.b32.xlu0 %v620_v29, %s725_s15  ;;  %327 = vrot.lane.b32.xlu1 %v622_v30, %s726_s25  ;;  %vm311_vm5 = vcmask 64512   ;;  %vm364_vm6 = vcmask 7168   ;;  %vm460_vm7 = vcmask 1043456   ;;  %vm456_vm8 = vcmask 588800   ;;  %s244_s10 = scalar_lea.vmem [#allocation5], %s816_s21  ;;  %s636_s11 = sshll.u32 (%p788_p5), %s608_s18, 3 }
  0x26   : > { %655 = vmatprep.mubr.msk.bf16.mxu0 %vm732_vm3, %v728_v48  ;;  %s515_s14 = scalar_lea.vmem (%p788_p5), %s865_s4, %s636_s11 }
  0x27   : > { %v260_v37 = vld [vmem:[#allocation2 + $0x10] sm:$0xff] }
  0x28   : > { %v287_v45 = vld [vmem:[#allocation2 + $0x8] sm:$0xff] }
  0x29   : > { %300 = vrot.lane.b32.xlu0 %v621_v31, %s726_s25  ;;  %353 = vrot.lane.b32.xlu1 %v623_v32, %s727_s26  ;;  %v340_v55 = vld [vmem:[#allocation2] sm:$0xff] }
  0x2b   : > { %v696_v16 = vld [vmem:[#allocation3 + $0x10] sm:$0xff]   ;;  %v698_v17 = vld [vmem:[#allocation3 + $0x20] ss:$0 sps:$4 sm:$0xff]  }
  0x2c   : > { %v462_v19 = vsel %vm460_vm7, %v698_v17, 0 }
  0x2d   : > { %384 = vrot.lane.b32.xlu0 %v625_v34, %s727_s26 }
  0x97   : > { %v273_v35 = vpop.permute.xlu0 %272  ;;  %v328_v36 = vpop.permute.xlu1 %327 }
  0x98   : > { %v274_v38 = vrot.slane %v273_v35, 4  ;;  %v329_v39 = vrot.slane %v328_v36, 4 }
  0x9a   : > { %v276_v40 = vsel %vm275_vm0, %v274_v38, %v273_v35  ;;  %v330_v44 = vsel %vm303_vm1, %v329_v39, %v328_v36 }
  0x9b   : > { %v278_v41 = vmul.bf16 %v276_v40, %v260_v37  ;;  %v301_v42 = vpop.permute.xlu0 %300  ;;  %v354_v43 = vpop.permute.xlu1 %353  ;;  %v332_v52 = vmul.bf16 %v330_v44, %v260_v37 }
  0x9c   : > { %v302_v46 = vrot.slane %v301_v42, 4  ;;  %v355_v47 = vrot.slane %v354_v43, 4 }
  0x9d   : > { %280 = vrot.lane.b32.xlu1 %v278_v41, %s729_s27 }
  0x9e   : > { %v304_v49 = vsel %vm303_vm1, %v302_v46, %v301_v42  ;;  %v357_v56 = vsel %vm356_vm2, %v355_v47, %v354_v43 }
  0x9f   : > { %v306_v53 = vmul.bf16 %v304_v49, %v287_v45  ;;  %v385_v54 = vpop.permute.xlu0 %384  ;;  %v359_v59 = vmul.bf16 %v357_v56, %v340_v55 }
  0xa0   : > { %v386_v57 = vrot.slane %v385_v54, 4 }
  0xa1   : > { %334 = vrot.lane.b32.xlu1 %v332_v52, %s730_s28  ;;  %308 = vrot.lane.b32.xlu0 %v306_v53, %s730_s28 }
  0xa2   : > { %v387_v58 = vsel %vm356_vm2, %v386_v57, %v385_v54 }
  0xa3   : > { %v389_v60 = vmul.bf16 %v387_v58, %v260_v37 }
  0xa5   : > { %361 = vrot.lane.b32.xlu0 %v359_v59, %s731_s29  ;;  %391 = vrot.lane.b32.xlu1 %v389_v60, %s731_s29 }
  0xa9   : > { %416 = vperm.xlu0 %692, %v412_v61   ;;  %421 = vperm.xlu1 %693, %v413_v62  }
 0x10f   : > { %v281_v63 = vpop.permute.xlu1 %280 }
 0x110   : > { %v282_v0 = vrot.slane %v281_v63, 4 }
 0x112   : > { %v284_v1 = vsel %vm283_vm4, %v281_v63, %v282_v0 }
 0x113   : > { %286 = vst [vmem:[#allocation3] sm:$0xf] %v284_v1  ;;  %v335_v2 = vpop.permute.xlu1 %334  ;;  %v309_v3 = vpop.permute.xlu0 %308 }
 0x114   : > { %v336_v4 = vrot.slane %v335_v2, 4  ;;  %v310_v5 = vrot.slane %v309_v3, 4 }
 0x116   : > { %v337_v6 = vsel %vm311_vm5, %v335_v2, %v336_v4  ;;  %v312_v7 = vsel %vm311_vm5, %v309_v3, %v310_v5 }
 0x117   : > { %339 = vst [vmem:[#allocation3 + $0x8] sm:$0xf] %v337_v6  ;;  %314 = vst [vmem:[#allocation3 + $0x4] sm:$0xf] %v312_v7  ;;  %v362_v8 = vpop.permute.xlu0 %361  ;;  %v392_v9 = vpop.permute.xlu1 %391 }
 0x118   : > { %v363_v10 = vrot.slane %v362_v8, 4  ;;  %v393_v11 = vrot.slane %v392_v9, 4 }
 0x11a   : > { %v365_v12 = vsel %vm364_vm6, %v362_v8, %v363_v10  ;;  %v394_v13 = vsel %vm364_vm6, %v392_v9, %v393_v11 }
 0x11b   : > { %367 = vst [vmem:[#allocation3 + $0xc] sm:$0xf] %v365_v12  ;;  %396 = vst [vmem:[#allocation3 + $0x18] sm:$0xf] %v394_v13 }
 0x11e   : > { %v694_v14 = vld [vmem:[#allocation3] sm:$0xff]  }
 0x11f   : > { %646 = vmatpush3.bf16.msra.mxu0 %v694_v14 }
 0x120   : > { %647 = vmatprep.subr.bf16.mxu0 %v728_v48 }
 0x122   : > { %v695_v15 = vld [vmem:[#allocation3 + $0x8] sm:$0xff]   ;;  %v697_v18 = vld [vmem:[#allocation3 + $0x18] sm:$0xff]  }
 0x123   : > { %648 = vmatpush3.bf16.msra.mxu0 %v695_v15 }
 0x124   : > { %649 = vmatprep.subr.bf16.mxu0 %v728_v48 }
 0x127   : > { %650 = vmatpush3.bf16.msra.mxu0 %v696_v16 }
 0x128   : > { %651 = vmatprep.subr.bf16.mxu0 %v728_v48  ;;  %v417_v21 = vpop.permute.xlu0 %416  ;;  %v422_v23 = vpop.permute.xlu1 %421 }
 0x12b   : > { %652 = vmatpush3.bf16.msra.mxu0 %v697_v18 }
 0x12c   : > { %653 = vmatprep.subr.bf16.mxu0 %v728_v48 }
 0x12f   : > { %654 = vmatpush3.bf16.msra.mxu0 %v462_v19 }
 0x132   : > { %656 = vmatmul.mubr.msk.bf16.vlgmr.msra.gmra.mrb[0].mxu0 %vm456_vm8, %v699_v20 }
 0x204   : > { %513 = sbr.rel (!%p788_p5) target bundleno = 531 (0x213), region = 81 }
 0x205   : > { %v498_v22 = vpop.f32.mrb[0].mxu0 }
 0x206   : > { %v499_v24 = vadd.f32 %v498_v22, %v417_v21  ;;  %v657_v25 = vpop.f32.mrb[1].mxu0 }
 0x207   : > { %v501_v26 = vpop.f32.mrb[2].mxu0 }
 0x208   : > { %505 = vst [vmem:[%s244_s10] sm:$0xff] %v499_v24  ;;  %v502_v27 = vadd.f32 %v501_v26, %v422_v23  ;;  %v658_v28 = vpop.f32.mrb[3].mxu0 }
 0x20a   : > { %506 = vst [vmem:[%s244_s10 + $0x8] sm:$0xff] %v502_v27 }
 0x20f   : > { %v545_v29 = vld [vmem:[%s244_s10] sm:$0xff] }
 0x210   : > { %546 = vst [vmem:[%s515_s14] sm:$0xff] %v545_v29 }
 0x211   : > { %v547_v30 = vld [vmem:[%s244_s10 + $0x8] sm:$0xff] }
 0x212   : > { %548 = vst [vmem:[%s515_s14 + $0x10] sm:$0xff] %v547_v30 }
 0x213 PF: > { %p11_p10 = scmp.ge.s32.totalorder %s775_s19, 4   ;;  %s867_s15 = smov %s718_s16 }
 0x214   : > { %s868_s16 = smov %s786_s22  ;;  %s869_s17 = smov %s775_s19 }
 0x215   :  { %13 = sbr.rel (!%p11_p10) target bundleno = 2 (0x2), region = 155 }

// kernel: image_encoder.3
= control target key start
LH: loop header
LB: loop body
LE: loop exit
PB: predicated region body
PF: predicated region fallthrough
CT: control target
= control target key end

     0   :  { %s3797_s13 = smov 0   ;;  %s4716_s0 = inlined_call_operand.vmem [shape: bf16[2,1024], index: 0, kind: input, shape index: {}]   ;;  %s4717_s1 = inlined_call_operand.vmem [shape: bf16[9,512], index: 1, kind: input, shape index: {}]   ;;  %s4718_s2 = inlined_call_operand.vmem [shape: bf16[8,18], index: 2, kind: input, shape index: {}]   ;;  %s4719_s3 = inlined_call_operand.vmem [shape: f32[8,1], index: 3, kind: input, shape index: {}]   ;;  %s4720_s4 = inlined_call_operand.vmem [shape: bf16[8,18], index: 4, kind: input, shape index: {}]   ;;  %s4721_s5 = inlined_call_operand.vmem [shape: f32[8,1], index: 5, kind: input, shape index: {}]   ;;  %s4722_s6 = inlined_call_operand.vmem [shape: bf16[8,72], index: 6, kind: input, shape index: {}]   ;;  %s4723_s7 = inlined_call_operand.vmem [shape: f32[8,1], index: 7, kind: input, shape index: {}]   ;;  %s4724_s8 = inlined_call_operand.vmem [shape: bf16[8,72], index: 8, kind: input, shape index: {}]   ;;  %s4725_s9 = inlined_call_operand.vmem [shape: f32[8,1], index: 9, kind: input, shape index: {}]   ;;  %s4726_s10 = inlined_call_operand.vmem [shape: f32[8,1024], index: 10, kind: output, shape index: {}]  }
   0x1 LB: > { %s3371_s14 = sadd.s32 4294967295, %s3731_s13   ;;  %p3375_p0 = scmp.ge.s32.totalorder %s3731_s13, 1  ;;  %s3731_s13 = sphi %s3797_s13, %s20_s13  }
   0x2   : > { %p312_p1 = scmp.lt.s32.totalorder %s3731_s13, 3 }
   0x4   : > { %p313_p2 = pnand %p3375_p0, %p312_p1 }
   0x5   : > { %v409_v0 = vlaneseq (!%p313_p2)  ;;  %v582_v1 = vld [vmem:[%s4717_s1] sm:$0x22] (!%p313_p2)  ;;  %v485_v2 = vld [vmem:[%s4717_s1] sm:$0x11] (!%p313_p2)  ;;  %v583_v7 = vld [vmem:[%s4717_s1 + $0x8] sm:$0x22] (!%p313_p2) }
   0x6   : > { %316 = sbr.rel (%p313_p2) target bundleno = 1361 (0x551), region = 60  ;;  %v3394_v3 = vcombine.low (!%p313_p2), %v582_v1, %v582_v1  ;;  %v3395_v4 = vcombine.high (!%p313_p2), %v582_v1, %v582_v1  ;;  %v3388_v5 = vcombine.low (!%p313_p2), %v485_v2, %v485_v2  ;;  %v3389_v6 = vcombine.high (!%p313_p2), %v485_v2, %v485_v2  ;;  %v486_v8 = vld [vmem:[%s4717_s1 + $0x8] sm:$0x11] (!%p313_p2)  ;;  %v676_v25 = vld [vmem:[%s4717_s1 + $0x8] sm:$0x22] (!%p313_p2)  ;;  %s3376_s29 = sshll.u32 (!%p313_p2), %s3371_s14, 2 }
   0x7   : > { %v3817_v9 = vshrl.u32 (!%p313_p2), %v409_v0, 7  ;;  %v3396_v10 = vcombine.low (!%p313_p2), %v583_v7, %v583_v7  ;;  %v3397_v11 = vcombine.high (!%p313_p2), %v583_v7, %v583_v7  ;;  %v3390_v12 = vcombine.low (!%p313_p2), %v486_v8, %v486_v8  ;;  %v675_v30 = vld [vmem:[%s4717_s1] sm:$0x22] (!%p313_p2)  ;;  %v777_v35 = vld [vmem:[%s4717_s1 + $0x8] sm:$0x44] (!%p313_p2)  ;;  %p350_p3 = scmp.lt.s32.totalorder (!%p313_p2), %s3376_s29, 7 }
   0x8   : > { %v595_v13 = vpack.i.b16 (!%p313_p2), %v3394_v3, %v3394_v3  ;;  %v602_v14 = vpack.i.b16 (!%p313_p2), %v3395_v4, %v3395_v4  ;;  %v498_v15 = vshrl.u32 (!%p313_p2), %v3388_v5, 16  ;;  %v506_v16 = vshrl.u32 (!%p313_p2), %v3389_v6, 16  ;;  %s3733_s30 = smov (!%p313_p2), 113   ;;  %v776_v48 = vld [vmem:[%s4717_s1] sm:$0x44] (!%p313_p2)  ;;  %s3734_s15 = smov (!%p313_p2), 112  }
   0x9   : > { %v3820_v17 = vsub.s32 (!%p313_p2), 1, %v3817_v9  ;;  %v3823_v18 = vsub.s32 (!%p313_p2), 0, %v3817_v9  ;;  %v609_v19 = vpack.i.b16 (!%p313_p2), %v3396_v10, %v3396_v10  ;;  %v616_v20 = vpack.i.b16 (!%p313_p2), %v3397_v11, %v3397_v11  ;;  %v872_v61 = vld [vmem:[%s4717_s1 + $0x8] sm:$0x88] (!%p313_p2)  ;;  %v871_v7 = vld [vmem:[%s4717_s1] sm:$0x88] (!%p313_p2) }
   0xa   : > { %v499_v21 = vpack.i.b16 (!%p313_p2), %v498_v15, %v498_v15  ;;  %v507_v22 = vpack.i.b16 (!%p313_p2), %v506_v16, %v506_v16  ;;  %v3391_v23 = vcombine.high (!%p313_p2), %v486_v8, %v486_v8  ;;  %v514_v24 = vshrl.u32 (!%p313_p2), %v3390_v12, 16  ;;  %s3735_s24 = smov (!%p313_p2), 127   ;;  %s3736_s11 = smov (!%p313_p2), 1  }
   0xb   : > { %v600_v26 = vrot.slane (!%p313_p2), %v595_v13, %v3820_v17  ;;  %v607_v27 = vrot.slane (!%p313_p2), %v602_v14, %v3820_v17  ;;  %v614_v28 = vrot.slane (!%p313_p2), %v609_v19, %v3820_v17  ;;  %v621_v29 = vrot.slane (!%p313_p2), %v616_v20, %v3820_v17  ;;  %v963_v19 = vld [vmem:[%s4717_s1 + $0x8] sm:$0x88] (!%p313_p2)  ;;  %s3737_s18 = smov (!%p313_p2), 15   ;;  %s3738_s21 = smov (!%p313_p2), 16  }
   0xc   : > { %v504_v31 = vrot.slane (!%p313_p2), %v499_v21, %v3823_v18  ;;  %v512_v32 = vrot.slane (!%p313_p2), %v507_v22, %v3823_v18  ;;  %v515_v33 = vpack.i.b16 (!%p313_p2), %v514_v24, %v514_v24  ;;  %v522_v34 = vshrl.u32 (!%p313_p2), %v3391_v23, 16  ;;  %v962_v24 = vld [vmem:[%s4717_s1] sm:$0x88] (!%p313_p2)  ;;  %s3739_s22 = smov (!%p313_p2), 111   ;;  %s3741_s23 = smov (!%p313_p2), 17  }
   0xd   : > { %v3398_v36 = vcombine.low %v600_v26, %v607_v27  ;;  %v3399_v37 = vcombine.low %v614_v28, %v621_v29  ;;  %v3402_v38 = vcombine.low %v676_v25, %v676_v25  ;;  %v3403_v39 = vcombine.high %v676_v25, %v676_v25  ;;  %s4728_s29 = smov (!%p350_p3, %s3376_s29), 7 }
   0xe   : > { %v3392_v40 = vcombine.low %v504_v31, %v512_v32  ;;  %v520_v41 = vrot.slane %v515_v33, %v3823_v18  ;;  %v523_v42 = vpack.i.b16 %v522_v34, %v522_v34  ;;  %v3400_v43 = vcombine.low %v675_v30, %v675_v30  ;;  %s352_s19 = scalar_lea.vmem %s4716_s0, %s4728_s29 }
   0xf   : > { %632 = vrot.lane.b32.xlu1 %v3398_v36, %s3733_s30  ;;  %v704_v44 = vshrl.u32 %v3402_v38, 16  ;;  %v712_v45 = vshrl.u32 %v3403_v39, 16  ;;  %v3401_v46 = vcombine.high %v675_v30, %v675_v30  ;;  %v3408_v47 = vcombine.low %v777_v35, %v777_v35  ;;  %v3865_v2 = vld.sshfl [vmem:[%s352_s19] sm:$0x55 pattern:$0x73625140] }
  0x10   : > { %539 = vrot.lane.b32.xlu0 %v3392_v40, %s3734_s15  ;;  %v528_v49 = vrot.slane %v523_v42, %v3823_v18  ;;  %v688_v50 = vshrl.u32 %v3400_v43, 16  ;;  %v3409_v51 = vcombine.high %v777_v35, %v777_v35  ;;  %v3850_v52 = vsub.s32 2, %v3817_v9  ;;  %3380 = vst.sshfl [vmem:[#allocation2 + $0x4] sm:$0x5 pattern:$0x75316420] %v3865_v2 }
  0x11   : > { %v705_v53 = vpack.i.b16 %v704_v44, %v704_v44  ;;  %v713_v54 = vpack.i.b16 %v712_v45, %v712_v45  ;;  %v696_v55 = vshrl.u32 %v3401_v46, 16  ;;  %v805_v56 = vshrl.u32 %v3408_v47, 16  ;;  %v395_v36 = vld [vmem:[%s4717_s1 + $0x8] sm:$0x11] }
  0x12   : > { %v3393_v57 = vcombine.low %v520_v41, %v528_v49  ;;  %v689_v58 = vpack.i.b16 %v688_v50, %v688_v50  ;;  %v813_v59 = vshrl.u32 %v3409_v51, 16  ;;  %v3406_v60 = vcombine.low %v776_v48, %v776_v48  ;;  %v394_v41 = vld [vmem:[%s4717_s1] sm:$0x11] }
  0x13   : > { %634 = vrot.lane.b32.xlu1 %v3399_v37, %s3733_s30  ;;  %v710_v62 = vrot.slane %v705_v53, %v3820_v17  ;;  %v718_v63 = vrot.slane %v713_v54, %v3820_v17  ;;  %v697_v0 = vpack.i.b16 %v696_v55, %v696_v55  ;;  %v806_v1 = vpack.i.b16 %v805_v56, %v805_v56  ;;  %v1058_v55 = vld [vmem:[%s4717_s1 + $0x18] sm:$0x11] }
  0x14   : > { %541 = vrot.lane.b32.xlu0 %v3393_v57, %s3734_s15  ;;  %v694_v3 = vrot.slane %v689_v58, %v3820_v17  ;;  %v814_v4 = vpack.i.b16 %v813_v59, %v813_v59  ;;  %v3407_v5 = vcombine.high %v776_v48, %v776_v48  ;;  %v789_v6 = vshrl.u32 %v3406_v60, 16 }
  0x15   : > { %v3405_v8 = vcombine.low %v710_v62, %v718_v63  ;;  %v702_v10 = vrot.slane %v697_v0, %v3820_v17  ;;  %v811_v11 = vrot.slane %v806_v1, %v3850_v52  ;;  %v3414_v12 = vcombine.low %v872_v61, %v872_v61  ;;  %v1057_v0 = vld [vmem:[%s4717_s1 + $0x10] sm:$0x11] }
  0x16   : > { %v819_v13 = vrot.slane %v814_v4, %v3850_v52  ;;  %v790_v14 = vpack.i.b16 %v789_v6, %v789_v6  ;;  %v797_v15 = vshrl.u32 %v3407_v5, 16  ;;  %v3415_v16 = vcombine.high %v872_v61, %v872_v61 }
  0x17   : > { %731 = vrot.lane.b32.xlu1 %v3405_v8, %s3735_s24  ;;  %v3404_v20 = vcombine.low %v694_v3, %v702_v10  ;;  %v3881_v21 = vsub.s32 3, %v3817_v9  ;;  %v898_v22 = vpack.i.b16 %v3414_v12, %v3414_v12  ;;  %v3412_v23 = vcombine.low %v871_v7, %v871_v7 }
  0x18   : > { %v3411_v25 = vcombine.low %v811_v11, %v819_v13  ;;  %v795_v26 = vrot.slane %v790_v14, %v3850_v52  ;;  %v798_v27 = vpack.i.b16 %v797_v15, %v797_v15  ;;  %v905_v28 = vpack.i.b16 %v3415_v16, %v3415_v16 }
  0x19   : > { %729 = vrot.lane.b32.xlu0 %v3404_v20, %s3735_s24  ;;  %v903_v29 = vrot.slane %v898_v22, %v3881_v21  ;;  %v3413_v30 = vcombine.high %v871_v7, %v871_v7  ;;  %v884_v31 = vpack.i.b16 %v3412_v23, %v3412_v23  ;;  %v3420_v32 = vcombine.low %v963_v19, %v963_v19 }
  0x1a   : > { %v803_v9 = vrot.slane %v798_v27, %v3850_v52  ;;  %v910_v33 = vrot.slane %v905_v28, %v3881_v21  ;;  %v3421_v34 = vcombine.high %v963_v19, %v963_v19  ;;  %v3418_v35 = vcombine.low %v962_v24, %v962_v24 }
  0x1b   : > { %832 = vrot.lane.b32.xlu1 %v3411_v25, %s3736_s11  ;;  %v889_v37 = vrot.slane %v884_v31, %v3881_v21  ;;  %v891_v38 = vpack.i.b16 %v3413_v30, %v3413_v30  ;;  %v991_v39 = vshrl.u32 %v3420_v32, 16  ;;  %v3419_v40 = vcombine.high %v962_v24, %v962_v24 }
  0x1c   : > { %v3410_v42 = vcombine.low %v795_v26, %v803_v9  ;;  %v3417_v43 = vcombine.low %v903_v29, %v910_v33  ;;  %v999_v44 = vshrl.u32 %v3421_v34, 16  ;;  %v975_v45 = vshrl.u32 %v3418_v35, 16 }
  0x1d   : > { %v896_v46 = vrot.slane %v891_v38, %v3881_v21  ;;  %v992_v47 = vpack.i.b16 %v991_v39, %v991_v39  ;;  %v983_v48 = vshrl.u32 %v3419_v40, 16  ;;  %v3384_v49 = vcombine.low %v395_v36, %v395_v36 }
  0x1e   : > { %830 = vrot.lane.b32.xlu0 %v3410_v42, %s3736_s11  ;;  %v1000_v50 = vpack.i.b16 %v999_v44, %v999_v44  ;;  %v976_v51 = vpack.i.b16 %v975_v45, %v975_v45  ;;  %v3385_v53 = vcombine.high %v395_v36, %v395_v36  ;;  %v3382_v54 = vcombine.low %v394_v41, %v394_v41 }
  0x1f   : > { %923 = vrot.lane.b32.xlu1 %v3417_v43, %s3737_s18  ;;  %v3416_v56 = vcombine.low %v889_v37, %v896_v46  ;;  %v997_v57 = vrot.slane %v992_v47, %v3881_v21  ;;  %v984_v58 = vpack.i.b16 %v983_v48, %v983_v48  ;;  %v421_v59 = vpack.i.b16 %v3384_v49, %v3384_v49 }
  0x20   : > { %v1005_v60 = vrot.slane %v1000_v50, %v3881_v21  ;;  %v981_v61 = vrot.slane %v976_v51, %v3881_v21  ;;  %v428_v62 = vpack.i.b16 %v3385_v53, %v3385_v53  ;;  %v3383_v63 = vcombine.high %v394_v41, %v394_v41 }
  0x21   : > { %v989_v1 = vrot.slane %v984_v58, %v3881_v21  ;;  %v426_v3 = vrot.slane %v421_v59, %v3823_v18  ;;  %v407_v4 = vpack.i.b16 %v3382_v54, %v3382_v54  ;;  %v3426_v5 = vcombine.low %v1058_v55, %v1058_v55  ;;  %v1054_v58 = vld [vmem:[#allocation2 + $0x4] sm:$0x11] }
  0x22   : > { %921 = vrot.lane.b32.xlu0 %v3416_v56, %s3737_s18  ;;  %v3423_v6 = vcombine.low %v997_v57, %v1005_v60  ;;  %v433_v7 = vrot.slane %v428_v62, %v3823_v18  ;;  %v414_v8 = vpack.i.b16 %v3383_v63, %v3383_v63  ;;  %v3427_v10 = vcombine.high %v1058_v55, %v1058_v55 }
  0x23   : > { %v3422_v11 = vcombine.low %v981_v61, %v989_v1  ;;  %v412_v12 = vrot.slane %v407_v4, %v3823_v18  ;;  %v1084_v13 = vpack.i.b16 %v3426_v5, %v3426_v5  ;;  %v3424_v14 = vcombine.low %v1057_v0, %v1057_v0 }
  0x24   : > { %1018 = vrot.lane.b32.xlu1 %v3423_v6, %s3738_s21  ;;  %v3387_v15 = vcombine.low %v426_v3, %v433_v7  ;;  %v419_v16 = vrot.slane %v414_v8, %v3823_v18  ;;  %v1091_v19 = vpack.i.b16 %v3427_v10, %v3427_v10  ;;  %v3425_v20 = vcombine.high %v1057_v0, %v1057_v0 }
  0x25   : > { %v1089_v22 = vrot.slane %v1084_v13, %v3823_v18  ;;  %v1070_v23 = vpack.i.b16 %v3424_v14, %v3424_v14  ;;  %v372_v30 = vcombine.high %v3865_v2, %v3865_v2  ;;  %v3740_v32 = vmov 0  }
  0x26   : > { %1016 = vrot.lane.b32.xlu0 %v3422_v11, %s3738_s21  ;;  %v3386_v24 = vcombine.low %v412_v12, %v419_v16  ;;  %v1096_v25 = vrot.slane %v1091_v19, %v3823_v18  ;;  %v1077_v26 = vpack.i.b16 %v3425_v20, %v3425_v20  ;;  %361 = vst [vmem:[#allocation2] sm:$0xf] %v3740_v32  ;;  %362 = vst [vmem:[#allocation2 + $0x14] sm:$0xf] %v3740_v32  ;;  %vm450_vm0 = vcmask 908288  }
  0x27   : > { %v1075_v27 = vrot.slane %v1070_v23, %v3823_v18  ;;  %1234 = vmatprep.mubr.bf16.mxu0 %v3740_v32  ;;  %3381 = vst.sshfl [vmem:[#allocation2 + $0xc] sm:$0x5 pattern:$0x75316420] %v372_v30  ;;  %1275 = vmatprep.mubr.bf16.mxu1 %v3740_v32  ;;  %vm638_vm1 = vcmask 924672   ;;  %vm474_vm2 = vcmask 138240  }
  0x28   : > { %446 = vrot.lane.b32.xlu1 %v3387_v15, %s3739_s22  ;;  %v3429_v28 = vcombine.low %v1089_v22, %v1096_v25  ;;  %v1082_v29 = vrot.slane %v1077_v26, %v3823_v18  ;;  %3617 = vset.pattern.permute.xlu0 %v3740_v32  ;;  %vm452_vm3 = vcmask 1043456   ;;  %vm761_vm4 = vcmask 7168  }
  0x29   : > { %3618 = vset.pattern.permute.xlu1 %v3740_v32  ;;  %vm664_vm5 = vcmask 121856   ;;  %vm545_vm6 = vcmask 916480   ;;  %vm571_vm7 = vcmask 130048   ;;  %vm735_vm8 = vcmask 1039360  }
  0x2a   : > { %444 = vrot.lane.b32.xlu0 %v3386_v24, %s3739_s22  ;;  %v3428_v31 = vcombine.low %v1075_v27, %v1082_v29  ;;  %vm1189_vm9 = vcmask 1040384   ;;  %vm1185_vm10 = vcmask 146432   ;;  %vm2249_vm11 = vcmask 588800  }
  0x2c   : > { %1109 = vrot.lane.b32.xlu1 %v3429_v28, %s3741_s23 }
  0x2d   : > { %v391_v50 = vld [vmem:[#allocation2] sm:$0x11]  ;;  %v870_v6 = vld [vmem:[#allocation2 + $0x14] sm:$0x1] }
  0x2e   : > { %1107 = vrot.lane.b32.xlu0 %v3428_v31, %s3741_s23  ;;  %v393_v44 = vld [vmem:[#allocation2 + $0x10] sm:$0x1]  ;;  %v579_v62 = vld [vmem:[#allocation2] sm:$0x11]  ;;  %v392_v3 = vld [vmem:[#allocation2 + $0x8] sm:$0x11] }
  0x2f   : > { %v581_v51 = vld [vmem:[#allocation2 + $0x10] sm:$0x1]  ;;  %v775_v8 = vld [vmem:[#allocation2 + $0x14] sm:$0x1]  ;;  %v773_v31 = vld [vmem:[#allocation2 + $0x4] sm:$0x11] }
  0x30   : > { %v484_v16 = vld [vmem:[#allocation2 + $0x10] sm:$0x1]  ;;  %v961_v20 = vld [vmem:[#allocation2 + $0x14] sm:$0x1] }
  0x31   : > { %v674_v28 = vld [vmem:[#allocation2 + $0x10] sm:$0x1] }
  0x81   : > { %v3935_v2 = vpop.permute.xlu1 %632 }
  0x82   : > { %v3937_v9 = vpop.permute.xlu0 %539  ;;  %v636_v49 = vrot.slane %v3935_v2, 4 }
  0x84   : > { %v639_v60 = vsel %vm638_vm1, %v636_v49, %v3935_v2 }
  0x85   : > { %v3939_v33 = vpop.permute.xlu1 %634  ;;  %v645_v5 = vmul.bf16 %v639_v60, %v579_v62 }
  0x86   : > { %v3941_v34 = vpop.permute.xlu0 %541  ;;  %v637_v53 = vrot.slane %v3939_v33, 4 }
  0x87   : > { %v544_v11 = vrot.slane %v3941_v34, 4  ;;  %v651_v14 = vrot.slane %v645_v5, 6 }
  0x88   : > { %v647_v59 = vmul.bf16 %v637_v53, %v581_v51  ;;  %v868_v51 = vld [vmem:[#allocation2 + $0x4] sm:$0x11] }
  0x89   : > { %v3943_v35 = vpop.permute.xlu1 %731  ;;  %v554_v25 = vmul.bf16 %v544_v11, %v484_v16  ;;  %v672_v16 = vld [vmem:[#allocation2] sm:$0x11] }
  0x8a   : > { %v653_v1 = vrot.slane %v647_v59, 6  ;;  %v734_v29 = vrot.slane %v3943_v35, 4 }
  0x8b   : > { %v3945_v36 = vpop.permute.xlu0 %729 }
  0x8d   : > { %v3947_v37 = vpop.permute.xlu1 %832 }
  0x8e   : > { %v835_v10 = vrot.slane %v3947_v37, 4 }
  0x90   : > { %v3949_v38 = vpop.permute.xlu0 %830  ;;  %v844_v15 = vmul.bf16 %v835_v10, %v775_v8 }
  0x91   : > { %v3951_v39 = vpop.permute.xlu1 %923  ;;  %v834_v19 = vrot.slane %v3949_v38, 4 }
  0x92   : > { %v926_v7 = vrot.slane %v3951_v39, 4  ;;  %v850_v26 = vrot.slane %v844_v15, 7 }
  0x93   : > { %v836_v30 = vsel %vm761_vm4, %v834_v19, %v3949_v38 }
  0x94   : > { %v3953_v40 = vpop.permute.xlu0 %921  ;;  %v935_v13 = vmul.bf16 %v926_v7, %v870_v6 }
  0x95   : > { %v925_v22 = vrot.slane %v3953_v40, 4 }
  0x96   : > { %v3955_v41 = vpop.permute.xlu1 %1018  ;;  %v941_v24 = vrot.slane %v935_v13, 6 }
  0x97   : > { %v1021_v23 = vrot.slane %v3955_v41, 4 }
  0x98   : > { %v3957_v42 = vpop.permute.xlu0 %1016 }
  0x99   : > { %v1030_v27 = vmul.bf16 %v1021_v23, %v961_v20 }
  0x9a   : > { %v447_v43 = vpop.permute.xlu1 %446 }
  0x9b   : > { %v449_v45 = vrot.slane %v447_v43, 4 }
  0x9c   : > { %v445_v46 = vpop.permute.xlu0 %444 }
  0x9d   : > { %v448_v47 = vrot.slane %v445_v46, 4  ;;  %v460_v48 = vmul.bf16 %v449_v45, %v393_v44  ;;  %v560_v44 = vrot.slane %v554_v25, 7 }
  0x9f   : > { %v451_v54 = vsel %vm450_vm0, %v448_v47, %v445_v46  ;;  %468 = vrot.lane.b32.xlu0 %v460_v48, %s3741_s23  ;;  %v453_v61 = vsel %vm452_vm3, %v448_v47, %v449_v45  ;;  %v744_v45 = vmul.bf16 %v734_v29, %v674_v28  ;;  %v543_v46 = vrot.slane %v3937_v9, 4  ;;  %v774_v28 = vld [vmem:[#allocation2 + $0xc] sm:$0x11] }
  0xa0   : > { %v3963_v55 = vpop.permute.xlu0 %1107  ;;  %v458_v57 = vmul.bf16 %v451_v54, %v391_v50  ;;  %v454_v4 = vsel %vm450_vm0, %v453_v61, %v447_v43  ;;  %v928_v43 = vsel %vm452_vm3, %v925_v22, %v926_v7  ;;  %v927_v47 = vsel %vm664_vm5, %v925_v22, %v3953_v40 }
  0xa1   : > { %v1111_v56 = vrot.slane %v3963_v55, 4  ;;  %v459_v12 = vmul.bf16 %v454_v4, %v392_v3  ;;  %v1036_v48 = vrot.slane %v1030_v27, 5  ;;  %v842_v50 = vmul.bf16 %v836_v30, %v773_v31  ;;  %v960_v30 = vld [vmem:[#allocation2 + $0xc] sm:$0x11] }
  0xa2   : > { %v1020_v54 = vrot.slane %v3957_v42, 4  ;;  %v750_v59 = vrot.slane %v744_v45, 5  ;;  %v933_v60 = vmul.bf16 %v927_v47, %v868_v51  ;;  %v546_v40 = vsel %vm545_vm6, %v543_v46, %v3937_v9  ;;  %v1055_v45 = vld [vmem:[#allocation2 + $0xc] sm:$0x11]  ;;  %v1413_v51 = vld [vmem:[%s4717_s1] sm:$0x11] }
  0xa3   : > { %v1113_v63 = vsel %vm474_vm2, %v1111_v56, %v3963_v55  ;;  %464 = vrot.lane.b32.xlu0 %v458_v57, %s3741_s23  ;;  %v869_v57 = vld [vmem:[#allocation2 + $0xc] sm:$0x11]  ;;  %v848_v61 = vrot.slane %v842_v50, 7  ;;  %v547_v3 = vsel %vm452_vm3, %v543_v46, %v544_v11  ;;  %v733_v4 = vrot.slane %v3945_v36, 4  ;;  %v1110_v11 = vpop.permute.xlu1 %1109  ;;  %v1293_v50 = vld [vmem:[%s4721_s5] sm:$0xff] }
  0xa4   : > { %v1119_v0 = vmul.bf16 %v1113_v63, %v1054_v58  ;;  %v929_v58 = vsel %vm664_vm5, %v928_v43, %v3951_v39  ;;  %v482_v63 = vld [vmem:[#allocation2] sm:$0x11]  ;;  %v1022_v39 = vsel %vm571_vm7, %v1020_v54, %v3957_v42  ;;  %v939_v9 = vrot.slane %v933_v60, 6 }
  0xa5   : > { %v934_v62 = vmul.bf16 %v929_v58, %v869_v57  ;;  %v552_v5 = vmul.bf16 %v546_v40, %v482_v63  ;;  %v548_v42 = vsel %vm545_vm6, %v547_v3, %v3941_v34  ;;  %v737_v8 = vsel %vm452_vm3, %v733_v4, %v734_v29  ;;  %v673_v34 = vld [vmem:[#allocation2 + $0x8] sm:$0x11]  ;;  %v1501_v40 = vld [vmem:[%s4717_s1] sm:$0x11] }
  0xa6   : > { %1125 = vrot.lane.b32.xlu1 %v1119_v0, %s3739_s22  ;;  %v640_v0 = vsel %vm452_vm3, %v636_v49, %v637_v53  ;;  %v580_v49 = vld [vmem:[#allocation2 + $0x8] sm:$0x11]  ;;  %v738_v20 = vsel %vm735_vm8, %v737_v8, %v3943_v35  ;;  %v837_v22 = vsel %vm452_vm3, %v834_v19, %v835_v10  ;;  %v1023_v35 = vsel %vm452_vm3, %v1020_v54, %v1021_v23 }
  0xa7   : > { %658 = vrot.lane.b32.xlu0 %v653_v1, %s3737_s18  ;;  %v959_v1 = vld [vmem:[#allocation2 + $0x4] sm:$0x11]  ;;  %v641_v6 = vsel %vm638_vm1, %v640_v0, %v3939_v33  ;;  %v940_v2 = vrot.slane %v934_v62, 6  ;;  %v736_v33 = vsel %vm735_vm8, %v733_v4, %v3945_v36  ;;  %v743_v27 = vmul.bf16 %v738_v20, %v673_v34 }
  0xa8   : > { %v1028_v7 = vmul.bf16 %v1022_v39, %v959_v1  ;;  %v483_v53 = vld [vmem:[#allocation2 + $0x8] sm:$0x11]  ;;  %v646_v13 = vmul.bf16 %v641_v6, %v580_v49  ;;  %v742_v36 = vmul.bf16 %v736_v33, %v672_v16  ;;  %v838_v29 = vsel %vm761_vm4, %v837_v22, %v3947_v37  ;;  %v1593_v49 = vld [vmem:[%s4717_s1] sm:$0x22] }
  0xa9   : > { %v553_v15 = vmul.bf16 %v548_v42, %v483_v53  ;;  %v843_v19 = vmul.bf16 %v838_v29, %v774_v28  ;;  %v749_v31 = vrot.slane %v743_v27, 5  ;;  %v1024_v43 = vsel %vm571_vm7, %v1023_v35, %v3955_v41  ;;  %v769_v37 = vld [vmem:[#allocation2 + $0x4] sm:$0x11]  ;;  %v1056_v41 = vld [vmem:[#allocation2 + $0x14] sm:$0x1] }
  0xaa   : > { %466 = vrot.lane.b32.xlu1 %v459_v12, %s3741_s23  ;;  %v558_v12 = vrot.slane %v552_v5, 7  ;;  %v652_v25 = vrot.slane %v646_v13, 6  ;;  %v748_v10 = vrot.slane %v742_v36, 5  ;;  %771 = vst [vmem:[#allocation3 + $0x10] sm:$0x11] %v769_v37  ;;  %v3448_v57 = vcombine.low %v1413_v51, %v1413_v51 }
  0xab   : > { %654 = vrot.lane.b32.xlu0 %v651_v14, %s3737_s18  ;;  %v1034_v14 = vrot.slane %v1028_v7, 5  ;;  %v849_v55 = vrot.slane %v843_v19, 7  ;;  %v1414_v54 = vld [vmem:[%s4717_s1 + $0x8] sm:$0x11]  ;;  %v3449_v58 = vcombine.high %v1413_v51, %v1413_v51  ;;  %v3454_v62 = vcombine.low %v1501_v40, %v1501_v40  ;;  %v1777_v37 = vld [vmem:[%s4717_s1] sm:$0x44] }
  0xac   : > { %v3451_v60 = vcombine.high %v1414_v54, %v1414_v54  ;;  %v3455_v63 = vcombine.high %v1501_v40, %v1501_v40  ;;  %v1426_v1 = vpack.i.b16 %v3448_v57, %v3448_v57  ;;  %v3460_v20 = vcombine.low %v1593_v49, %v1593_v49 }
  0xad   : > { %v1433_v3 = vpack.i.b16 %v3449_v58, %v3449_v58  ;;  %v1514_v5 = vshrl.u32 %v3454_v62, 16  ;;  %v3461_v22 = vcombine.high %v1593_v49, %v1593_v49  ;;  %v3472_v57 = vcombine.low %v1777_v37, %v1777_v37  ;;  %v1870_v49 = vld [vmem:[%s4717_s1 + $0x8] sm:$0x88] }
  0xae   : > { %946 = vrot.lane.b32.xlu1 %v941_v24, %s3733_s30  ;;  %v1112_v24 = vrot.slane %v1110_v11, 4  ;;  %v1522_v6 = vshrl.u32 %v3455_v63, 16  ;;  %v1431_v42 = vrot.slane %v1426_v1, %v3823_v18  ;;  %v1606_v28 = vpack.i.b16 %v3460_v20, %v3460_v20 }
  0xaf   : > { %855 = vrot.lane.b32.xlu0 %v850_v26, %s3735_s24  ;;  %v559_v26 = vrot.slane %v553_v15, 7  ;;  %v1438_v53 = vrot.slane %v1433_v3, %v3823_v18  ;;  %v1594_v15 = vld [vmem:[%s4717_s1 + $0x8] sm:$0x22]  ;;  %v1613_v29 = vpack.i.b16 %v3461_v22, %v3461_v22  ;;  %v3473_v62 = vcombine.high %v1777_v37, %v1777_v37 }
  0xb0   : > { %v1114_v38 = vsel %vm452_vm3, %v1111_v56, %v1112_v24  ;;  %v1029_v56 = vmul.bf16 %v1024_v43, %v960_v30  ;;  %v1523_v13 = vpack.i.b16 %v1522_v6, %v1522_v6  ;;  %v3462_v35 = vcombine.low %v1594_v15, %v1594_v15 }
  0xb1   : > { %v1115_v23 = vsel %vm474_vm2, %v1114_v38, %v1110_v11  ;;  %v3452_v16 = vcombine.low %v1431_v42, %v1438_v53  ;;  %v3463_v38 = vcombine.high %v1594_v15, %v1594_v15  ;;  %v1790_v63 = vshrl.u32 %v3472_v57, 16  ;;  %v1957_v15 = vld [vmem:[%s4717_s1] sm:$0x88] }
  0xb2   : > { %565 = vrot.lane.b32.xlu1 %v560_v44, %s3738_s21  ;;  %v770_v44 = vld [vmem:[#allocation2 + $0xc] sm:$0x11]  ;;  %v1120_v46 = vmul.bf16 %v1115_v23, %v1055_v45  ;;  %v1035_v47 = vrot.slane %v1029_v56, 5  ;;  %v1528_v36 = vrot.slane %v1523_v13, %v3823_v18  ;;  %v1618_v45 = vrot.slane %v1613_v29, %v3820_v17 }
  0xb3   : > { %1041 = vrot.lane.b32.xlu0 %v1036_v48, %s3734_s15  ;;  %772 = vst [vmem:[#allocation3 + $0x18] sm:$0x11] %v770_v44  ;;  %v1121_v48 = vmul.bf16 %v1112_v24, %v1056_v41  ;;  %v1681_v24 = vld [vmem:[%s4717_s1] sm:$0x22]  ;;  %v1611_v44 = vrot.slane %v1606_v28, %v3820_v17  ;;  %v1620_v23 = vpack.i.b16 %v3462_v35, %v3462_v35  ;;  %v1798_v6 = vshrl.u32 %v3473_v62, 16 }
  0xb4   : > { %v3467_v43 = vcombine.high %v1681_v24, %v1681_v24  ;;  %v3480_v22 = vcombine.low %v1870_v49, %v1870_v49 }
  0xb5   : > { %v1625_v51 = vrot.slane %v1620_v23, %v3820_v17  ;;  %v1799_v13 = vpack.i.b16 %v1798_v6, %v1798_v6 }
  0xb6   : > { %755 = vrot.lane.b32.xlu1 %v750_v59, %s3736_s11  ;;  %v3450_v59 = vcombine.low %v1414_v54, %v1414_v54  ;;  %v1896_v35 = vpack.i.b16 %v3480_v22, %v3480_v22 }
  0xb7   : > { %851 = vrot.lane.b32.xlu0 %v848_v61, %s3735_s24  ;;  %v1502_v61 = vld [vmem:[%s4717_s1 + $0x8] sm:$0x11] }
  0xb8   : > { %v3456_v0 = vcombine.low %v1502_v61, %v1502_v61  ;;  %v3457_v39 = vcombine.high %v1502_v61, %v1502_v61  ;;  %v1440_v4 = vpack.i.b16 %v3450_v59, %v3450_v59 }
  0xba   : > { %942 = vrot.lane.b32.xlu1 %v939_v9, %s3733_s30  ;;  %v1447_v9 = vpack.i.b16 %v3451_v60, %v3451_v60  ;;  %v1538_v7 = vshrl.u32 %v3457_v39, 16  ;;  %v1445_v8 = vrot.slane %v1440_v4, %v3823_v18  ;;  %v1869_v39 = vld [vmem:[%s4717_s1] sm:$0x88] }
  0xbb   : > { %944 = vrot.lane.b32.xlu0 %v940_v2, %s3733_s30  ;;  %v1530_v2 = vshrl.u32 %v3456_v0, 16 }
  0xbc   : > { %v1452_v11 = vrot.slane %v1447_v9, %v3823_v18 }
  0xbd   : > { %v1531_v33 = vpack.i.b16 %v1530_v2, %v1530_v2 }
  0xbe   : > { %561 = vrot.lane.b32.xlu1 %v558_v12, %s3738_s21  ;;  %v1515_v12 = vpack.i.b16 %v1514_v5, %v1514_v5  ;;  %v3453_v34 = vcombine.low %v1445_v8, %v1452_v11  ;;  %v1791_v5 = vpack.i.b16 %v1790_v63, %v1790_v63  ;;  %v3478_v11 = vcombine.low %v1869_v39, %v1869_v39 }
  0xbf   : > { %1037 = vrot.lane.b32.xlu0 %v1034_v14, %s3734_s15  ;;  %v1539_v14 = vpack.i.b16 %v1538_v7, %v1538_v7 }
  0xc0   : > { %v1882_v20 = vpack.i.b16 %v3478_v11, %v3478_v11 }
  0xc1   : > { %v1544_v27 = vrot.slane %v1539_v14, %v3823_v18 }
  0xc2   : > { %656 = vrot.lane.b32.xlu1 %v652_v25, %s3737_s18  ;;  %v1520_v25 = vrot.slane %v1515_v12, %v3823_v18  ;;  %v1796_v12 = vrot.slane %v1791_v5, %v3850_v52  ;;  %v1887_v28 = vrot.slane %v1882_v20, %v3881_v21 }
  0xc3   : > { %563 = vrot.lane.b32.xlu0 %v559_v26, %s3738_s21  ;;  %v1536_v26 = vrot.slane %v1531_v33, %v3823_v18 }
  0xc4   : > { %v3458_v19 = vcombine.low %v1520_v25, %v1528_v36 }
  0xc5   : > { %v3459_v30 = vcombine.low %v1536_v26, %v1544_v27  ;;  %v3481_v26 = vcombine.high %v1870_v49, %v1870_v49  ;;  %v1958_v27 = vld [vmem:[%s4717_s1 + $0x8] sm:$0x88] }
  0xc6   : > { %751 = vrot.lane.b32.xlu1 %v748_v10, %s3736_s11  ;;  %v1682_v10 = vld [vmem:[%s4717_s1 + $0x8] sm:$0x22]  ;;  %v3486_v23 = vcombine.low %v1958_v27, %v1958_v27 }
  0xc7   : > { %753 = vrot.lane.b32.xlu0 %v749_v31, %s3736_s11  ;;  %v3466_v31 = vcombine.low %v1681_v24, %v1681_v24  ;;  %v3469_v41 = vcombine.high %v1682_v10, %v1682_v10  ;;  %v1804_v24 = vrot.slane %v1799_v13, %v3850_v52 }
  0xc9   : > { %v1694_v56 = vshrl.u32 %v3466_v31, 16  ;;  %v1718_v40 = vshrl.u32 %v3469_v41, 16  ;;  %v3485_v31 = vcombine.high %v1957_v15, %v1957_v15  ;;  %v2050_v41 = vld [vmem:[%s4717_s1 + $0x18] sm:$0x11] }
  0xca   : > { %853 = vrot.lane.b32.xlu1 %v849_v55, %s3735_s24  ;;  %v1627_v55 = vpack.i.b16 %v3463_v38, %v3463_v38  ;;  %v3484_v38 = vcombine.low %v1957_v15, %v1957_v15  ;;  %v3492_v63 = vcombine.low %v2050_v41, %v2050_v41 }
  0xcb   : > { %1127 = vrot.lane.b32.xlu0 %v1120_v46, %s3739_s22  ;;  %v1702_v46 = vshrl.u32 %v3467_v43, 16  ;;  %v1695_v58 = vpack.i.b16 %v1694_v56, %v1694_v56  ;;  %v1719_v9 = vpack.i.b16 %v1718_v40, %v1718_v40  ;;  %v2049_v43 = vld [vmem:[%s4717_s1 + $0x10] sm:$0x11] }
  0xcc   : > { %v1632_v54 = vrot.slane %v1627_v55, %v3820_v17  ;;  %v2076_v5 = vpack.i.b16 %v3492_v63, %v3492_v63 }
  0xcd   : > { %v1703_v59 = vpack.i.b16 %v1702_v46, %v1702_v46  ;;  %v1700_v1 = vrot.slane %v1695_v58, %v3820_v17  ;;  %v1724_v8 = vrot.slane %v1719_v9, %v3820_v17  ;;  %v1978_v46 = vshrl.u32 %v3485_v31, 16 }
  0xce   : > { %1039 = vrot.lane.b32.xlu1 %v1035_v47, %s3734_s15  ;;  %v3468_v47 = vcombine.low %v1682_v10, %v1682_v10  ;;  %v3465_v61 = vcombine.low %v1625_v51, %v1632_v54  ;;  %v3476_v10 = vcombine.low %v1796_v12, %v1804_v24  ;;  %v1986_v51 = vshrl.u32 %v3486_v23, 16 }
  0xcf   : > { %1296 = vperm.xlu0 %3617, %v1293_v50   ;;  %v3464_v50 = vcombine.low %v1611_v44, %v1618_v45  ;;  %v1708_v3 = vrot.slane %v1703_v59, %v3820_v17  ;;  %v1901_v44 = vrot.slane %v1896_v35, %v3881_v21  ;;  %v1970_v45 = vshrl.u32 %v3484_v38, 16 }
  0xd0   : > { %v1710_v60 = vshrl.u32 %v3468_v47, 16  ;;  %v3487_v47 = vcombine.high %v1958_v27, %v1958_v27  ;;  %v3490_v54 = vcombine.low %v2049_v43, %v2049_v43  ;;  %v1979_v58 = vpack.i.b16 %v1978_v46, %v1978_v46 }
  0xd1   : > { %v3470_v42 = vcombine.low %v1700_v1, %v1708_v3  ;;  %v3493_v9 = vcombine.high %v2050_v41, %v2050_v41 }
  0xd2   : > { %1129 = vrot.lane.b32.xlu1 %v1121_v48, %s3739_s22  ;;  %v1778_v48 = vld [vmem:[%s4717_s1 + $0x8] sm:$0x44]  ;;  %v1711_v4 = vpack.i.b16 %v1710_v60, %v1710_v60  ;;  %v1994_v59 = vshrl.u32 %v3487_v47, 16  ;;  %v3491_v60 = vcombine.high %v2049_v43, %v2049_v43  ;;  %v2062_v62 = vpack.i.b16 %v3490_v54, %v3490_v54 }
  0xd3   : > { %1555 = vrot.lane.b32.xlu0 %v3458_v19, %s3734_s15  ;;  %v3474_v0 = vcombine.low %v1778_v48, %v1778_v48  ;;  %v3475_v2 = vcombine.high %v1778_v48, %v1778_v48  ;;  %v2083_v49 = vpack.i.b16 %v3493_v9, %v3493_v9 }
  0xd4   : > { %v1716_v53 = vrot.slane %v1711_v4, %v3820_v17  ;;  %v2069_v1 = vpack.i.b16 %v3491_v60, %v3491_v60  ;;  %v2067_v4 = vrot.slane %v2062_v62, %v3823_v18 }
  0xd5   : > { %v1806_v7 = vshrl.u32 %v3474_v0, 16  ;;  %v1814_v14 = vshrl.u32 %v3475_v2, 16  ;;  %v1984_v0 = vrot.slane %v1979_v58, %v3881_v21  ;;  %v2088_v11 = vrot.slane %v2083_v49, %v3823_v18 }
  0xd6   : > { %1463 = vrot.lane.b32.xlu1 %v3452_v16, %s3739_s22  ;;  %v3471_v16 = vcombine.low %v1716_v53, %v1724_v8  ;;  %v2081_v8 = vrot.slane %v2076_v5, %v3823_v18 }
  0xd7   : > { %1643 = vrot.lane.b32.xlu0 %v3464_v50, %s3733_s30  ;;  %v1807_v33 = vpack.i.b16 %v1806_v7, %v1806_v7  ;;  %v1815_v36 = vpack.i.b16 %v1814_v14, %v1814_v14  ;;  %v1971_v50 = vpack.i.b16 %v1970_v45, %v1970_v45  ;;  %v2074_v7 = vrot.slane %v2069_v1, %v3823_v18 }
  0xd8   : > { %v3495_v12 = vcombine.low %v2081_v8, %v2088_v11 }
  0xd9   : > { %v1812_v25 = vrot.slane %v1807_v33, %v3850_v52  ;;  %v1820_v19 = vrot.slane %v1815_v36, %v3850_v52  ;;  %v1976_v40 = vrot.slane %v1971_v50, %v3881_v21  ;;  %v3494_v53 = vcombine.low %v2067_v4, %v2074_v7 }
  0xda   : > { %1465 = vrot.lane.b32.xlu1 %v3453_v34, %s3739_s22  ;;  %v3479_v34 = vcombine.high %v1869_v39, %v1869_v39  ;;  %v1995_v39 = vpack.i.b16 %v1994_v59, %v1994_v59 }
  0xdb   : > { %1735 = vrot.lane.b32.xlu0 %v3470_v42, %s3735_s24  ;;  %v3477_v55 = vcombine.low %v1812_v25, %v1820_v19  ;;  %v3488_v6 = vcombine.low %v1976_v40, %v1984_v0 }
  0xdc   : > { %v1889_v29 = vpack.i.b16 %v3479_v34, %v3479_v34  ;;  %v2000_v2 = vrot.slane %v1995_v39, %v3881_v21 }
  0xde   : > { %1557 = vrot.lane.b32.xlu1 %v3459_v30, %s3734_s15  ;;  %v1903_v30 = vpack.i.b16 %v3481_v26, %v3481_v26  ;;  %v1894_v37 = vrot.slane %v1889_v29, %v3881_v21 }
  0xdf   : > { %1831 = vrot.lane.b32.xlu0 %v3476_v10, %s3736_s11 }
  0xe0   : > { %v1908_v56 = vrot.slane %v1903_v30, %v3881_v21  ;;  %v3482_v48 = vcombine.low %v1887_v28, %v1894_v37 }
  0xe2   : > { %1645 = vrot.lane.b32.xlu1 %v3465_v61, %s3733_s30  ;;  %v3483_v57 = vcombine.low %v1901_v44, %v1908_v56  ;;  %v1987_v61 = vpack.i.b16 %v1986_v51, %v1986_v51 }
  0xe3   : > { %1919 = vrot.lane.b32.xlu0 %v3482_v48, %s3737_s18 }
  0xe4   : > { %v1992_v3 = vrot.slane %v1987_v61, %v3881_v21 }
  0xe6   : > { %1737 = vrot.lane.b32.xlu1 %v3471_v16, %s3735_s24  ;;  %v3489_v42 = vcombine.low %v1992_v3, %v2000_v2 }
  0xe7   : > { %2011 = vrot.lane.b32.xlu0 %v3488_v6, %s3738_s21 }
  0xea   : > { %1833 = vrot.lane.b32.xlu1 %v3477_v55, %s3736_s11 }
  0xeb   : > { %2099 = vrot.lane.b32.xlu0 %v3494_v53, %s3741_s23 }
  0xee   : > { %1921 = vrot.lane.b32.xlu1 %v3483_v57, %s3737_s18 }
  0xf2   : > { %2013 = vrot.lane.b32.xlu1 %v3489_v42, %s3738_s21 }
  0xf6   : > { %2101 = vrot.lane.b32.xlu1 %v3495_v12, %s3741_s23 }
 0x111   : > { %v469_v13 = vpop.permute.xlu0 %468 }
 0x112   : > { %v472_v34 = vrot.slane %v469_v13, 4 }
 0x115   : > { %v465_v33 = vpop.permute.xlu0 %464 }
 0x116   : > { %v470_v20 = vrot.slane %v465_v33, 4 }
 0x118   : > { %v4158_v14 = vpop.permute.xlu1 %1125 }
 0x119   : > { %v659_v15 = vpop.permute.xlu0 %658 }
 0x11a   : > { %v662_v48 = vrot.slane %v659_v15, 4 }
 0x11c   : > { %v467_v16 = vpop.permute.xlu1 %466 }
 0x11d   : > { %v471_v22 = vrot.slane %v467_v16, 4  ;;  %v655_v24 = vpop.permute.xlu0 %654 }
 0x11e   : > { %v660_v50 = vrot.slane %v655_v24, 4 }
 0x11f   : > { %v473_v25 = vsel %vm452_vm3, %v470_v20, %v471_v22  ;;  %v476_v36 = vsel %vm452_vm3, %v471_v22, %v472_v34 }
 0x120   : > { %v475_v26 = vsel %vm474_vm2, %v465_v33, %v473_v25  ;;  %v477_v27 = vsel %vm474_vm2, %v467_v16, %v476_v36  ;;  %v947_v28 = vpop.permute.xlu1 %946  ;;  %v1131_v33 = vrot.slane %v4158_v14, 4 }
 0x121   : > { %480 = vst [vmem:[#allocation3] sm:$0x11] %v475_v26  ;;  %481 = vst [vmem:[#allocation3 + $0x8] sm:$0x11] %v477_v27  ;;  %v856_v29 = vpop.permute.xlu0 %855  ;;  %v950_v43 = vrot.slane %v947_v28, 4 }
 0x122   : > { %v859_v2 = vrot.slane %v856_v29, 4 }
 0x124   : > { %v566_v35 = vpop.permute.xlu1 %565 }
 0x125   : > { %v4164_v38 = vpop.permute.xlu0 %1041  ;;  %v569_v57 = vrot.slane %v566_v35, 4 }
 0x126   : > { %v1045_v36 = vrot.slane %v4164_v38, 4 }
 0x128   : > { %v756_v10 = vpop.permute.xlu1 %755 }
 0x129   : > { %v852_v19 = vpop.permute.xlu0 %851  ;;  %v759_v9 = vrot.slane %v756_v10, 4 }
 0x12a   : > { %v857_v53 = vrot.slane %v852_v19, 4 }
 0x12c   : > { %v943_v30 = vpop.permute.xlu1 %942 }
 0x12d   : > { %v945_v31 = vpop.permute.xlu0 %944  ;;  %v948_v37 = vrot.slane %v943_v30, 4 }
 0x12e   : > { %v949_v44 = vrot.slane %v945_v31, 4 }
 0x130   : > { %v951_v45 = vsel %vm452_vm3, %v948_v37, %v949_v44  ;;  %v953_v23 = vsel %vm452_vm3, %v949_v44, %v950_v43  ;;  %v562_v55 = vpop.permute.xlu1 %561 }
 0x131   : > { %v952_v56 = vsel %vm638_vm1, %v943_v30, %v951_v45  ;;  %v954_v46 = vsel %vm638_vm1, %v945_v31, %v953_v23  ;;  %v1038_v47 = vpop.permute.xlu0 %1037  ;;  %v567_v58 = vrot.slane %v562_v55, 4 }
 0x132   : > { %957 = vst [vmem:[#allocation3 + $0x10] sm:$0x44] %v952_v56  ;;  %958 = vst [vmem:[#allocation3 + $0x18] sm:$0x44] %v954_v46  ;;  %v1043_v26 = vrot.slane %v1038_v47, 4 }
 0x134   : > { %v657_v41 = vpop.permute.xlu1 %656 }
 0x135   : > { %v661_v51 = vrot.slane %v657_v41, 4  ;;  %v564_v54 = vpop.permute.xlu0 %563 }
 0x136   : > { %v568_v59 = vrot.slane %v564_v54, 4 }
 0x137   : > { %v663_v60 = vsel %vm452_vm3, %v660_v50, %v661_v51  ;;  %v666_v40 = vsel %vm452_vm3, %v661_v51, %v662_v48  ;;  %v1142_v51 = vld [vmem:[%s4718_s2] sm:$0xf] }
 0x138   : > { %v665_v61 = vsel %vm664_vm5, %v655_v24, %v663_v60  ;;  %v667_v62 = vsel %vm664_vm5, %v657_v41, %v666_v40  ;;  %v570_v63 = vsel %vm452_vm3, %v567_v58, %v568_v59  ;;  %v573_v0 = vsel %vm452_vm3, %v568_v59, %v569_v57  ;;  %v752_v39 = vpop.permute.xlu1 %751  ;;  %v1292_v57 = vld [vmem:[%s4720_s4] sm:$0xf] }
 0x139   : > { %670 = vst [vmem:[#allocation3] sm:$0x44] %v665_v61  ;;  %671 = vst [vmem:[#allocation3 + $0x8] sm:$0x44] %v667_v62  ;;  %v572_v1 = vsel %vm571_vm7, %v562_v55, %v570_v63  ;;  %v574_v3 = vsel %vm571_vm7, %v564_v54, %v573_v0  ;;  %v754_v4 = vpop.permute.xlu0 %753  ;;  %v757_v5 = vrot.slane %v752_v39, 4 }
 0x13a   : > { %577 = vst [vmem:[#allocation3] sm:$0x22] %v572_v1  ;;  %578 = vst [vmem:[#allocation3 + $0x8] sm:$0x22] %v574_v3  ;;  %v758_v6 = vrot.slane %v754_v4, 4 }
 0x13c   : > { %v760_v7 = vsel %vm452_vm3, %v757_v5, %v758_v6  ;;  %v763_v49 = vsel %vm452_vm3, %v758_v6, %v759_v9  ;;  %v854_v42 = vpop.permute.xlu1 %853 }
 0x13d   : > { %v762_v8 = vsel %vm761_vm4, %v752_v39, %v760_v7  ;;  %v764_v11 = vsel %vm761_vm4, %v754_v4, %v763_v49  ;;  %v858_v12 = vrot.slane %v854_v42, 4  ;;  %v1128_v13 = vpop.permute.xlu0 %1127 }
 0x13e   : > { %767 = vst [vmem:[#allocation3] sm:$0x88] %v762_v8  ;;  %768 = vst [vmem:[#allocation3 + $0x8] sm:$0x88] %v764_v11  ;;  %v1132_v15 = vrot.slane %v1128_v13, 4 }
 0x13f   : > { %v860_v16 = vsel %vm452_vm3, %v857_v53, %v858_v12  ;;  %v862_v34 = vsel %vm452_vm3, %v858_v12, %v859_v2 }
 0x140   : > { %v861_v20 = vsel %vm735_vm8, %v852_v19, %v860_v16  ;;  %v863_v22 = vsel %vm735_vm8, %v854_v42, %v862_v34  ;;  %v1134_v24 = vsel %vm452_vm3, %v1131_v33, %v1132_v15  ;;  %v1040_v25 = vpop.permute.xlu1 %1039 }
 0x141   : > { %866 = vst [vmem:[#allocation3 + $0x10] sm:$0x22] %v861_v20  ;;  %867 = vst [vmem:[#allocation3 + $0x18] sm:$0x22] %v863_v22  ;;  %v1135_v27 = vsel %vm450_vm0, %v4158_v14, %v1134_v24  ;;  %v1044_v28 = vrot.slane %v1040_v25, 4 }
 0x142   : > { %1140 = vst [vmem:[#allocation3 + $0x20] sm:$0x11] %v1135_v27  ;;  %v1868_v22 = vld [vmem:[#allocation2 + $0x14] sm:$0xf] }
 0x143   : > { %v1046_v29 = vsel %vm452_vm3, %v1043_v26, %v1044_v28  ;;  %v1048_v35 = vsel %vm452_vm3, %v1044_v28, %v1045_v36 }
 0x144   : > { %v1047_v10 = vsel %vm545_vm6, %v1038_v47, %v1046_v29  ;;  %v1049_v19 = vsel %vm545_vm6, %v1040_v25, %v1048_v35  ;;  %v1130_v30 = vpop.permute.xlu1 %1129  ;;  %v1956_v25 = vld [vmem:[#allocation2 + $0x14] sm:$0xf] }
 0x145   : > { %1052 = vst [vmem:[#allocation3 + $0x10] sm:$0x88] %v1047_v10  ;;  %1053 = vst [vmem:[#allocation3 + $0x18] sm:$0x88] %v1049_v19  ;;  %v1133_v38 = vrot.slane %v1130_v30, 4 }
 0x147   : > { %v1136_v31 = vsel %vm452_vm3, %v1132_v15, %v1133_v38  ;;  %v1776_v15 = vld [vmem:[#allocation2 + $0x14] sm:$0xf] }
 0x148   : > { %v1137_v43 = vsel %vm450_vm0, %v1128_v13, %v1136_v31  ;;  %v4210_v54 = vpop.permute.xlu1 %1463 }
 0x149   : > { %1141 = vst [vmem:[#allocation3 + $0x28] sm:$0x11] %v1137_v43  ;;  %v1147_v14 = vld [vmem:[#allocation3 + $0x20] sm:$0x11]  ;;  %v1467_v59 = vrot.slane %v4210_v54, 4 }
 0x14a   : > { %v3435_v55 = vcombine.high %v1147_v14, %v1147_v14  ;;  %v3434_v56 = vcombine.low %v1147_v14, %v1147_v14 }
 0x14c   : > { %v3651_v37 = vld [vmem:[#allocation3 + $0x4] ss:$16 sps:$4 sm:$0xff]   ;;  %v3653_v44 = vld [vmem:[#allocation3 + $0xc] ss:$16 sps:$4 sm:$0xff]   ;;  %v3655_v45 = vld [vmem:[#allocation3] ss:$16 sps:$4 sm:$0xff]   ;;  %v4216_v58 = vpop.permute.xlu1 %1465 }
 0x14d   : > { %v3656_v23 = vld [vmem:[#allocation3 + $0x8] ss:$16 sps:$4 sm:$0xff]   ;;  %1202 = vmatprep.subr.bf16.mxu0 %v3651_v37  ;;  %1243 = vmatprep.subr.bf16.mxu1 %v3653_v44  ;;  %v1191_v48 = vsel %vm1189_vm9, %v3434_v56, 0  ;;  %v1468_v60 = vrot.slane %v4216_v58, 4 }
 0x14e   : > { %1203 = vmatpush1.bf16.msra.mxu0 %v3655_v45  ;;  %1244 = vmatpush1.bf16.msra.mxu1 %v3656_v23  ;;  %v1297_v62 = vpop.permute.xlu0 %1296 }
 0x14f   : > { %3438 = vmatprep.subr.msk.bf16.mxu0 %vm1189_vm9, %v3435_v55  ;;  %v1470_v40 = vsel %vm452_vm3, %v1467_v59, %v1468_v60 }
 0x150   : > { %v1148_v46 = vld [vmem:[#allocation3 + $0x28] sm:$0x11]  ;;  %v4230_v61 = vsel %vm450_vm0, %v1470_v40, %v4216_v58  ;;  %v4234_v0 = vpop.permute.xlu1 %1557 }
 0x151   : > { %v3437_v47 = vcombine.high %v1148_v46, %v1148_v46  ;;  %v3436_v41 = vcombine.low %v1148_v46, %v1148_v46 }
 0x152   : > { %1205 = vmatpush1.bf16.msra.mxu0 %v1191_v48  ;;  %v4232_v63 = vpop.permute.xlu0 %1555 }
 0x153   : > { %3440 = vmatprep.subr.msk.bf16.mxu1 %vm1189_vm9, %v3437_v47  ;;  %v1197_v50 = vsel %vm1189_vm9, %v3436_v41, 0  ;;  %1302 = vmatprep.subr.bf16.mxu0 %v3651_v37 }
 0x154   : > { %1246 = vmatpush1.bf16.msra.mxu1 %v1197_v50  ;;  %v4238_v1 = vpop.permute.xlu1 %1645 }
 0x155   : > { %1343 = vmatprep.subr.bf16.mxu1 %v3653_v44  ;;  %3439 = vmatmul.mubr.msk.bf16.vlgmr.msra.gmra.mrb[0].mxu0 %vm1185_vm10, %v1142_v51 }
 0x156   : > { %1303 = vmatpush1.bf16.msra.mxu0 %v3655_v45  ;;  %1334 = vmatprep.mubr.bf16.mxu0 %v3740_v32  ;;  %v4236_v39 = vpop.permute.xlu0 %1643 }
 0x157   : > { %3441 = vmatmul.mubr.msk.bf16.vlgmr.msra.gmra.mrb[0].mxu1 %vm1185_vm10, %v1142_v51  ;;  %3442 = vmatprep.subr.msk.bf16.mxu0 %vm1189_vm9, %v3435_v55 }
 0x158   : > { %1344 = vmatpush1.bf16.msra.mxu1 %v3656_v23  ;;  %1375 = vmatprep.mubr.bf16.mxu1 %v3740_v32  ;;  %v4242_v4 = vpop.permute.xlu1 %1737 }
 0x159   : > { %3444 = vmatprep.subr.msk.bf16.mxu1 %vm1189_vm9, %v3437_v47 }
 0x15a   : > { %1305 = vmatpush1.bf16.msra.mxu0 %v1191_v48  ;;  %v4240_v3 = vpop.permute.xlu0 %1735 }
 0x15c   : > { %1346 = vmatpush1.bf16.msra.mxu1 %v1197_v50  ;;  %v1834_v5 = vpop.permute.xlu1 %1833 }
 0x15d   : > { %3443 = vmatmul.mubr.msk.bf16.vlgmr.msra.gmra.mrb[4].mxu0 %vm1185_vm10, %v1292_v57  ;;  %v1836_v49 = vrot.slane %v1834_v5, 4 }
 0x15e   : > { %2298 = vmatprep.mubr.bf16.mxu0 %v3740_v32  ;;  %v4244_v9 = vpop.permute.xlu0 %1831 }
 0x15f   : > { %3445 = vmatmul.mubr.msk.bf16.vlgmr.msra.gmra.mrb[4].mxu1 %vm1185_vm10, %v1292_v57  ;;  %v1835_v7 = vrot.slane %v4244_v9, 4  ;;  %v1845_v20 = vmul.bf16 %v1836_v49, %v1776_v15 }
 0x160   : > { %2339 = vmatprep.mubr.bf16.mxu1 %v3740_v32  ;;  %v1922_v2 = vpop.permute.xlu1 %1921 }
 0x161   : > { %v1924_v8 = vrot.slane %v1922_v2, 4  ;;  %v1838_v13 = vsel %vm452_vm3, %v1835_v7, %v1836_v49  ;;  %1853 = vrot.lane.b32.xlu0 %v1845_v20, %s3735_s24  ;;  %v1560_v20 = vrot.slane %v4234_v0, 4 }
 0x162   : > { %v4246_v6 = vpop.permute.xlu0 %1919  ;;  %v4257_v16 = vsel %vm761_vm4, %v1838_v13, %v1834_v5 }
 0x163   : > { %v1923_v53 = vrot.slane %v4246_v6, 4  ;;  %v1933_v26 = vmul.bf16 %v1924_v8, %v1868_v22 }
 0x164   : > { %v2014_v12 = vpop.permute.xlu1 %2013 }
 0x165   : > { %v2016_v33 = vrot.slane %v2014_v12, 4  ;;  %v1926_v34 = vsel %vm452_vm3, %v1923_v53, %v1924_v8  ;;  %1941 = vrot.lane.b32.xlu1 %v1933_v26, %s3733_s30 }
 0x166   : > { %v4249_v42 = vpop.permute.xlu0 %2011  ;;  %v4263_v24 = vsel %vm664_vm5, %v1926_v34, %v1922_v2  ;;  %v1559_v34 = vrot.slane %v4232_v63, 4 }
 0x167   : > { %v2015_v11 = vrot.slane %v4249_v42, 4  ;;  %v2025_v28 = vmul.bf16 %v2016_v33, %v1956_v25 }
 0x169   : > { %v2018_v36 = vsel %vm452_vm3, %v2015_v11, %v2016_v33  ;;  %2033 = vrot.lane.b32.xlu0 %v2025_v28, %s3734_s15  ;;  %v1561_v28 = vsel %vm545_vm6, %v1559_v34, %v4232_v63 }
 0x16a   : > { %v4269_v27 = vsel %vm571_vm7, %v2018_v36, %v2014_v12 }
 0x228   : > { %v4274_v29 = vpop.f32.mrb[0].mxu0 }
 0x229   : > { %v4278_v10 = vpop.f32.mrb[1].mxu0 }
 0x22a   : > { %v4276_v35 = vpop.f32.mrb[0].mxu1  ;;  %v1240_v30 = vpop.f32.mrb[2].mxu0 }
 0x22b   : > { %v4280_v19 = vpop.f32.mrb[1].mxu1  ;;  %v1241_v31 = vpop.f32.mrb[3].mxu0  ;;  %v1562_v30 = vsel %vm452_vm3, %v1559_v34, %v1560_v20  ;;  %v2377_v34 = vld [vmem:[%s4717_s1] sm:$0x11] }
 0x22c   : > { %v1281_v38 = vpop.f32.mrb[2].mxu1  ;;  %v1563_v63 = vsel %vm545_vm6, %v1562_v30, %v4234_v0  ;;  %v1740_v0 = vrot.slane %v4242_v4, 4  ;;  %v2466_v30 = vld [vmem:[%s4717_s1 + $0x8] sm:$0x11] }
 0x22d   : > { %v1282_v43 = vpop.f32.mrb[3].mxu1  ;;  %v1648_v38 = vrot.slane %v4238_v1, 4 }
 0x230   : > { %v1336_v14 = vpop.f32.mrb[4].mxu0 }
 0x231   : > { %v1337_v37 = vadd.f32 %v1336_v14, %v1297_v62  ;;  %v1338_v45 = vpop.f32.mrb[5].mxu0 }
 0x232   : > { %v1377_v44 = vpop.f32.mrb[4].mxu1  ;;  %v1339_v55 = vadd.f32 %v1338_v45, %v1297_v62  ;;  %v1340_v46 = vpop.f32.mrb[6].mxu0 }
 0x233   : > { %v1378_v23 = vadd.f32 %v1377_v44, %v1297_v62  ;;  %v1379_v56 = vpop.f32.mrb[5].mxu1  ;;  %v1384_v47 = vmul.f32 0.25, %v1337_v37  ;;  %v1341_v50 = vpop.f32.mrb[7].mxu0  ;;  %v1739_v44 = vrot.slane %v4240_v3, 4 }
 0x234   : > { %v1380_v41 = vadd.f32 %v1379_v56, %v1297_v62  ;;  %v1381_v48 = vpop.f32.mrb[6].mxu1  ;;  %v1385_v57 = vmul.f32 0.25, %v1339_v55  ;;  %v1469_v62 = vsel %vm450_vm0, %v1467_v59, %v4210_v54  ;;  %v1647_v59 = vrot.slane %v4236_v39, 4 }
 0x235   : > { %v1386_v51 = vmul.f32 0.25, %v1378_v23  ;;  %v1382_v40 = vpop.f32.mrb[7].mxu1  ;;  %v1388_v5 = vmax.f32 %v1337_v37, %v1384_v47  ;;  %v1742_v56 = vsel %vm452_vm3, %v1739_v44, %v1740_v0 }
 0x236   : > { %v1387_v2 = vmul.f32 0.25, %v1380_v41  ;;  %v1389_v8 = vmax.f32 %v1339_v55, %v1385_v57  ;;  %v1649_v14 = vsel %vm638_vm1, %v1647_v59, %v4236_v39  ;;  %v1650_v58 = vsel %vm452_vm3, %v1647_v59, %v1648_v38  ;;  %v2102_v57 = vpop.permute.xlu1 %2101 }
 0x237   : > { %v1390_v49 = vmax.f32 %v1378_v23, %v1386_v51  ;;  %v1651_v37 = vsel %vm638_vm1, %v1650_v58, %v4238_v1  ;;  %v1741_v39 = vsel %vm735_vm8, %v1739_v44, %v4240_v3  ;;  %v1837_v3 = vsel %vm761_vm4, %v1835_v7, %v4244_v9  ;;  %v2100_v51 = vpop.permute.xlu0 %2099 }
 0x238   : > { %v1391_v12 = vmax.f32 %v1380_v41, %v1387_v2  ;;  %v4282_v13 = vpack.c.bf16 %v1389_v8, %v1388_v5  ;;  %v1743_v41 = vsel %vm735_vm8, %v1742_v56, %v4242_v4  ;;  %v1925_v5 = vsel %vm664_vm5, %v1923_v53, %v4246_v6 }
 0x239   : > { %v2103_v2 = vrot.slane %v2100_v51, 4 }
 0x23a   : > { %v4284_v33 = vpack.c.bf16 %v1391_v12, %v1390_v49  ;;  %1408 = vst [vmem:[#allocation2 + $0x4] sm:$0xff] %v4282_v13  ;;  %v1843_v40 = vmul.bf16 %v4282_v13, %v1837_v3  ;;  %v2104_v49 = vrot.slane %v2102_v57, 4  ;;  %v1931_v7 = vmul.bf16 %v4282_v13, %v1925_v5 }
 0x23b   : > { %v2105_v12 = vsel %vm474_vm2, %v2103_v2, %v2100_v51 }
 0x23c   : > { %1409 = vst [vmem:[#allocation2 + $0xc] sm:$0xff] %v4284_v33  ;;  %v1844_v4 = vmul.bf16 %v4284_v33, %v4257_v16  ;;  %v1932_v9 = vmul.bf16 %v4284_v33, %v4263_v24  ;;  %v2017_v16 = vsel %vm571_vm7, %v2015_v11, %v4249_v42  ;;  %v2106_v8 = vsel %vm452_vm3, %v2103_v2, %v2104_v49 }
 0x23d   : > { %v2023_v6 = vmul.bf16 %v4282_v13, %v2017_v16  ;;  %v2024_v53 = vmul.bf16 %v4284_v33, %v4269_v27  ;;  %v2107_v24 = vsel %vm474_vm2, %v2106_v8, %v2102_v57  ;;  %v2111_v11 = vmul.bf16 %v4282_v13, %v2105_v12  ;;  %v2153_v27 = vld [vmem:[%s4723_s7] sm:$0xff]  ;;  %v2646_v16 = vld [vmem:[%s4717_s1 + $0x8] sm:$0x22] }
 0x23e   : > { %v2112_v42 = vmul.bf16 %v4284_v33, %v2107_v24  ;;  %v2645_v57 = vld [vmem:[%s4717_s1] sm:$0x22]  ;;  %v2741_v12 = vld [vmem:[%s4717_s1] sm:$0x44] }
 0x23f   : > { %v3540_v24 = vcombine.low %v2645_v57, %v2645_v57 }
 0x241   : > { %v1410_v15 = vld [vmem:[#allocation2] sm:$0xff] }
 0x242   : > { %v1475_v25 = vmul.bf16 %v1469_v62, %v1410_v15  ;;  %v1567_v31 = vmul.bf16 %v1561_v28, %v1410_v15  ;;  %v1655_v45 = vmul.bf16 %v1649_v14, %v1410_v15  ;;  %v1747_v47 = vmul.bf16 %v1741_v39, %v1410_v15  ;;  %v2048_v62 = vld [vmem:[#allocation2 + $0x14] sm:$0xf] }
 0x243   : > { %v1411_v22 = vld [vmem:[#allocation2 + $0x8] sm:$0xff]  ;;  %v1412_v26 = vld [vmem:[#allocation2 + $0x10] sm:$0xf]  ;;  %v2113_v15 = vmul.bf16 %v2104_v49, %v2048_v62 }
 0x244   : > { %v1476_v36 = vmul.bf16 %v4230_v61, %v1411_v22  ;;  %1481 = vrot.lane.b32.xlu0 %v1475_v25, %s3741_s23  ;;  %v1477_v54 = vmul.bf16 %v1468_v60, %v1412_v26  ;;  %v1500_v61 = vld [vmem:[#allocation2 + $0x10] sm:$0xf]  ;;  %v1568_v43 = vmul.bf16 %v1563_v63, %v1411_v22  ;;  %v1656_v23 = vmul.bf16 %v1651_v37, %v1411_v22 }
 0x245   : > { %v1569_v60 = vmul.bf16 %v1560_v20, %v1500_v61  ;;  %v1592_v55 = vld [vmem:[#allocation2 + $0x10] sm:$0xf]  ;;  %v1748_v48 = vmul.bf16 %v1743_v41, %v1411_v22  ;;  %v2378_v20 = vld [vmem:[%s4717_s1 + $0x8] sm:$0x11]  ;;  %v2465_v22 = vld [vmem:[%s4717_s1] sm:$0x11]  ;;  %v3522_v25 = vcombine.low %v2377_v34, %v2377_v34 }
 0x246   : > { %1483 = vrot.lane.b32.xlu1 %v1476_v36, %s3741_s23  ;;  %v1657_v46 = vmul.bf16 %v1648_v38, %v1592_v55  ;;  %v1680_v1 = vld [vmem:[#allocation2 + $0x10] sm:$0xf]  ;;  %v3523_v36 = vcombine.high %v2377_v34, %v2377_v34  ;;  %v3524_v26 = vcombine.low %v2378_v20, %v2378_v20  ;;  %v3525_v28 = vcombine.high %v2378_v20, %v2378_v20  ;;  %v2558_v41 = vld [vmem:[%s4717_s1 + $0x8] sm:$0x22] }
 0x247   : > { %v1749_v50 = vmul.bf16 %v1740_v0, %v1680_v1  ;;  %v3529_v59 = vcombine.high %v2465_v22, %v2465_v22  ;;  %v3530_v38 = vcombine.low %v2466_v30, %v2466_v30  ;;  %v2390_v61 = vpack.i.b16 %v3522_v25, %v3522_v25  ;;  %v2557_v0 = vld [vmem:[%s4717_s1] sm:$0x22]  ;;  %v2742_v25 = vld [vmem:[%s4717_s1 + $0x8] sm:$0x44] }
 0x248   : > { %1485 = vrot.lane.b32.xlu0 %v1477_v54, %s3741_s23  ;;  %v3528_v54 = vcombine.low %v2465_v22, %v2465_v22  ;;  %v2397_v63 = vpack.i.b16 %v3523_v36, %v3523_v36  ;;  %v2411_v14 = vpack.i.b16 %v3525_v28, %v3525_v28  ;;  %v3535_v51 = vcombine.high %v2557_v0, %v2557_v0 }
 0x249   : > { %v2494_v37 = vshrl.u32 %v3530_v38, 16  ;;  %v2658_v34 = vshrl.u32 %v3540_v24, 16  ;;  %v3542_v20 = vcombine.low %v2646_v16, %v2646_v16  ;;  %v3543_v22 = vcombine.high %v2646_v16, %v2646_v16  ;;  %v2922_v16 = vld [vmem:[%s4717_s1 + $0x8] sm:$0x88] }
 0x24a   : > { %1573 = vrot.lane.b32.xlu1 %v1567_v31, %s3738_s21  ;;  %v3531_v31 = vcombine.high %v2466_v30, %v2466_v30  ;;  %v2478_v58 = vshrl.u32 %v3528_v54, 16  ;;  %v2416_v39 = vrot.slane %v2411_v14, %v3823_v18  ;;  %v3546_v30 = vcombine.low %v2741_v12, %v2741_v12 }
 0x24b   : > { %v2674_v38 = vshrl.u32 %v3542_v20, 16  ;;  %v3548_v14 = vcombine.low %v2742_v25, %v2742_v25  ;;  %v3560_v20 = vcombine.low %v2922_v16, %v2922_v16 }
 0x24c   : > { %1575 = vrot.lane.b32.xlu0 %v1568_v43, %s3738_s21  ;;  %v2404_v43 = vpack.i.b16 %v3524_v26, %v3524_v26  ;;  %v2502_v44 = vshrl.u32 %v3531_v31, 16  ;;  %v2479_v56 = vpack.i.b16 %v2478_v58, %v2478_v58  ;;  %v2682_v31 = vshrl.u32 %v3543_v22, 16  ;;  %v2833_v58 = vld [vmem:[%s4717_s1] sm:$0x88]  ;;  %v3013_v22 = vld [vmem:[%s4717_s1 + $0x10] sm:$0x11] }
 0x24e   : > { %1577 = vrot.lane.b32.xlu1 %v1569_v60, %s3738_s21  ;;  %v2486_v60 = vshrl.u32 %v3529_v59, 16  ;;  %v2409_v55 = vrot.slane %v2404_v43, %v3823_v18  ;;  %v2503_v1 = vpack.i.b16 %v2502_v44, %v2502_v44  ;;  %v2659_v59 = vpack.i.b16 %v2658_v34, %v2658_v34 }
 0x24f   : > { %v2754_v43 = vshrl.u32 %v3546_v30, 16  ;;  %v2675_v44 = vpack.i.b16 %v2674_v38, %v2674_v38  ;;  %v2950_v38 = vshrl.u32 %v3560_v20, 16 }
 0x250   : > { %1661 = vrot.lane.b32.xlu0 %v1655_v45, %s3737_s18  ;;  %v2395_v45 = vrot.slane %v2390_v61, %v3823_v18  ;;  %v3527_v3 = vcombine.low %v2409_v55, %v2416_v39  ;;  %v2508_v2 = vrot.slane %v2503_v1, %v3823_v18  ;;  %v3549_v39 = vcombine.high %v2742_v25, %v2742_v25 }
 0x251   : > { %v3552_v1 = vcombine.low %v2833_v58, %v2833_v58 }
 0x252   : > { %1663 = vrot.lane.b32.xlu1 %v1656_v23, %s3737_s18  ;;  %v2402_v23 = vrot.slane %v2397_v63, %v3823_v18  ;;  %v3547_v63 = vcombine.high %v2741_v12, %v2741_v12 }
 0x254   : > { %1665 = vrot.lane.b32.xlu0 %v1657_v46, %s3737_s18  ;;  %v2487_v46 = vpack.i.b16 %v2486_v60, %v2486_v60  ;;  %v2762_v55 = vshrl.u32 %v3547_v63, 16  ;;  %v3564_v63 = vcombine.low %v3013_v22, %v3013_v22 }
 0x256   : > { %1753 = vrot.lane.b32.xlu1 %v1747_v47, %s3736_s11  ;;  %v2495_v47 = vpack.i.b16 %v2494_v37, %v2494_v37  ;;  %v2664_v37 = vrot.slane %v2659_v59, %v3820_v17 }
 0x258   : > { %1755 = vrot.lane.b32.xlu0 %v1748_v48, %s3736_s11  ;;  %v3526_v48 = vcombine.low %v2395_v45, %v2402_v23  ;;  %v2500_v5 = vrot.slane %v2495_v47, %v3823_v18  ;;  %v2755_v23 = vpack.i.b16 %v2754_v43, %v2754_v43  ;;  %v2770_v47 = vshrl.u32 %v3548_v14, 16 }
 0x259   : > { %v3565_v43 = vcombine.high %v3013_v22, %v3013_v22 }
 0x25a   : > { %1757 = vrot.lane.b32.xlu1 %v1749_v50, %s3736_s11  ;;  %v3534_v50 = vcombine.low %v2557_v0, %v2557_v0  ;;  %v2683_v0 = vpack.i.b16 %v2682_v31, %v2682_v31 }
 0x25c   : > { %1849 = vrot.lane.b32.xlu0 %v1843_v40, %s3735_s24  ;;  %v2484_v40 = vrot.slane %v2479_v56, %v3823_v18  ;;  %v2570_v49 = vpack.i.b16 %v3534_v50, %v3534_v50  ;;  %v2680_v56 = vrot.slane %v2675_v44, %v3820_v17  ;;  %v2763_v50 = vpack.i.b16 %v2762_v55, %v2762_v55 }
 0x25e   : > { %1851 = vrot.lane.b32.xlu1 %v1844_v4, %s3735_s24  ;;  %v2492_v4 = vrot.slane %v2487_v46, %v3823_v18  ;;  %v2688_v46 = vrot.slane %v2683_v0, %v3820_v17  ;;  %v3026_v0 = vpack.i.b16 %v3564_v63, %v3564_v63 }
 0x260   : > { %1939 = vrot.lane.b32.xlu0 %v1932_v9, %s3733_s30  ;;  %v2577_v9 = vpack.i.b16 %v3535_v51, %v3535_v51  ;;  %v3532_v8 = vcombine.low %v2484_v40, %v2492_v4  ;;  %v2778_v51 = vshrl.u32 %v3549_v39, 16  ;;  %v3545_v40 = vcombine.low %v2680_v56, %v2688_v46 }
 0x261   : > { %v2771_v4 = vpack.i.b16 %v2770_v47, %v2770_v47  ;;  %v3031_v47 = vrot.slane %v3026_v0, %v3823_v18 }
 0x262   : > { %1937 = vrot.lane.b32.xlu1 %v1931_v7, %s3733_s30  ;;  %v3536_v7 = vcombine.low %v2558_v41, %v2558_v41 }
 0x264   : > { %2029 = vrot.lane.b32.xlu0 %v2023_v6, %s3734_s15  ;;  %v3533_v6 = vcombine.low %v2500_v5, %v2508_v2  ;;  %v2584_v62 = vpack.i.b16 %v3536_v7, %v3536_v7  ;;  %v3553_v5 = vcombine.high %v2833_v58, %v2833_v58  ;;  %v2846_v2 = vpack.i.b16 %v3552_v1, %v3552_v1 }
 0x266   : > { %2031 = vrot.lane.b32.xlu1 %v2024_v53, %s3734_s15  ;;  %v3537_v53 = vcombine.high %v2558_v41, %v2558_v41  ;;  %v2589_v26 = vrot.slane %v2584_v62, %v3820_v17  ;;  %v2834_v41 = vld [vmem:[%s4717_s1 + $0x8] sm:$0x88] }
 0x267   : > { %v3555_v7 = vcombine.high %v2834_v41, %v2834_v41 }
 0x268   : > { %2119 = vrot.lane.b32.xlu0 %v2112_v42, %s3739_s22  ;;  %v2575_v42 = vrot.slane %v2570_v49, %v3820_v17  ;;  %v2779_v49 = vpack.i.b16 %v2778_v51, %v2778_v51 }
 0x269   : > { %v2867_v62 = vpack.i.b16 %v3555_v7, %v3555_v7 }
 0x26a   : > { %2117 = vrot.lane.b32.xlu1 %v2111_v11, %s3739_s22  ;;  %v2582_v11 = vrot.slane %v2577_v9, %v3820_v17  ;;  %v3554_v9 = vcombine.low %v2834_v41, %v2834_v41 }
 0x26c   : > { %2156 = vperm.xlu0 %3617, %v2153_v27   ;;  %v3541_v27 = vcombine.high %v2645_v57, %v2645_v57  ;;  %v3538_v36 = vcombine.low %v2575_v42, %v2582_v11  ;;  %v2921_v57 = vld [vmem:[%s4717_s1] sm:$0x88]  ;;  %v2784_v42 = vrot.slane %v2779_v49, %v3850_v52  ;;  %v2860_v11 = vpack.i.b16 %v3554_v9, %v3554_v9 }
 0x26d   : > { %v3558_v24 = vcombine.low %v2921_v57, %v2921_v57 }
 0x26e   : > { %2121 = vrot.lane.b32.xlu1 %v2113_v15, %s3739_s22  ;;  %v2591_v15 = vpack.i.b16 %v3537_v53, %v3537_v53  ;;  %v2666_v28 = vshrl.u32 %v3541_v27, 16  ;;  %v2853_v53 = vpack.i.b16 %v3553_v5, %v3553_v5  ;;  %v4466_v5 = vpop.permute.xlu1 %1941 }
 0x26f   : > { %v2934_v34 = vshrl.u32 %v3558_v24, 16 }
 0x270   : > { %2429 = vrot.lane.b32.xlu0 %v3527_v3, %s3739_s22  ;;  %v2596_v54 = vrot.slane %v2591_v15, %v3820_v17  ;;  %v2667_v61 = vpack.i.b16 %v2666_v28, %v2666_v28  ;;  %v2760_v3 = vrot.slane %v2755_v23, %v3850_v52  ;;  %v2858_v27 = vrot.slane %v2853_v53, %v3881_v21 }
 0x271   : > { %v3559_v15 = vcombine.high %v2921_v57, %v2921_v57  ;;  %v3561_v28 = vcombine.high %v2922_v16, %v2922_v16 }
 0x272   : > { %2427 = vrot.lane.b32.xlu1 %v3526_v48, %s3739_s22  ;;  %v3539_v60 = vcombine.low %v2589_v26, %v2596_v54  ;;  %v2672_v45 = vrot.slane %v2667_v61, %v3820_v17  ;;  %v2768_v17 = vrot.slane %v2763_v50, %v3850_v52  ;;  %v2872_v26 = vrot.slane %v2867_v62, %v3881_v21 }
 0x273   : > { %v2935_v54 = vpack.i.b16 %v2934_v34, %v2934_v34  ;;  %v2942_v59 = vshrl.u32 %v3559_v15, 16  ;;  %v2958_v61 = vshrl.u32 %v3561_v28, 16 }
 0x274   : > { %2521 = vrot.lane.b32.xlu0 %v3533_v6, %s3734_s15  ;;  %v3544_v48 = vcombine.low %v2664_v37, %v2672_v45  ;;  %v2851_v6 = vrot.slane %v2846_v2, %v3881_v21  ;;  %v3550_v12 = vcombine.low %v2760_v3, %v2768_v17  ;;  %v3033_v45 = vpack.i.b16 %v3565_v43, %v3565_v43 }
 0x275   : > { %v2940_v14 = vrot.slane %v2935_v54, %v3881_v21  ;;  %v2943_v58 = vpack.i.b16 %v2942_v59, %v2942_v59  ;;  %v2959_v44 = vpack.i.b16 %v2958_v61, %v2958_v61 }
 0x276   : > { %2519 = vrot.lane.b32.xlu1 %v3532_v8, %s3734_s15  ;;  %v2776_v8 = vrot.slane %v2771_v4, %v3850_v52  ;;  %v3014_v52 = vld [vmem:[%s4717_s1 + $0x18] sm:$0x11]  ;;  %v3556_v30 = vcombine.low %v2851_v6, %v2858_v27  ;;  %v3038_v1 = vrot.slane %v3033_v45, %v3823_v18 }
 0x277   : > { %v3566_v37 = vcombine.low %v3014_v52, %v3014_v52  ;;  %v3567_v23 = vcombine.high %v3014_v52, %v3014_v52  ;;  %v2948_v55 = vrot.slane %v2943_v58, %v3881_v21  ;;  %v2964_v46 = vrot.slane %v2959_v44, %v3881_v21 }
 0x278   : > { %2609 = vrot.lane.b32.xlu0 %v3539_v60, %s3733_s30  ;;  %v3551_v25 = vcombine.low %v2776_v8, %v2784_v42  ;;  %v2951_v60 = vpack.i.b16 %v2950_v38, %v2950_v38  ;;  %v3568_v57 = vcombine.low %v3031_v47, %v3038_v1 }
 0x279   : > { %v3040_v56 = vpack.i.b16 %v3566_v37, %v3566_v37  ;;  %v3047_v41 = vpack.i.b16 %v3567_v23, %v3567_v23 }
 0x27a   : > { %2607 = vrot.lane.b32.xlu1 %v3538_v36, %s3733_s30  ;;  %v2865_v36 = vrot.slane %v2860_v11, %v3881_v21  ;;  %v2956_v39 = vrot.slane %v2951_v60, %v3881_v21  ;;  %v4462_v21 = vpop.permute.xlu0 %1853 }
 0x27b   : > { %v3045_v3 = vrot.slane %v3040_v56, %v3823_v18  ;;  %v3052_v51 = vrot.slane %v3047_v41, %v3823_v18 }
 0x27c   : > { %2701 = vrot.lane.b32.xlu0 %v3545_v40, %s3735_s24  ;;  %v3557_v31 = vcombine.low %v2865_v36, %v2872_v26  ;;  %v3563_v50 = vcombine.low %v2956_v39, %v2964_v46 }
 0x27d   : > { %v3569_v40 = vcombine.low %v3045_v3, %v3052_v51  ;;  %v1857_v3 = vrot.slane %v4462_v21, 4 }
 0x27e   : > { %2699 = vrot.lane.b32.xlu1 %v3544_v48, %s3735_s24  ;;  %v3562_v48 = vcombine.low %v2940_v14, %v2948_v55  ;;  %v4464_v4 = vpop.permute.xlu0 %2033 }
 0x280   : > { %2797 = vrot.lane.b32.xlu0 %v3551_v25, %s3736_s11 }
 0x282   : > { %2795 = vrot.lane.b32.xlu1 %v3550_v12, %s3736_s11 }
 0x284   : > { %2885 = vrot.lane.b32.xlu0 %v3557_v31, %s3737_s18 }
 0x286   : > { %2883 = vrot.lane.b32.xlu1 %v3556_v30, %s3737_s18 }
 0x288   : > { %2977 = vrot.lane.b32.xlu0 %v3563_v50, %s3738_s21 }
 0x28a   : > { %2975 = vrot.lane.b32.xlu1 %v3562_v48, %s3738_s21 }
 0x28c   : > { %3065 = vrot.lane.b32.xlu0 %v3569_v40, %s3741_s23 }
 0x28e   : > { %3063 = vrot.lane.b32.xlu1 %v3568_v57, %s3741_s23 }
 0x2b6   : > { %v1482_v2 = vpop.permute.xlu0 %1481 }
 0x2b7   : > { %v1487_v18 = vrot.slane %v1482_v2, 4 }
 0x2b8   : > { %v1484_v17 = vpop.permute.xlu1 %1483 }
 0x2b9   : > { %v1488_v9 = vrot.slane %v1484_v17, 4 }
 0x2ba   : > { %v1486_v49 = vpop.permute.xlu0 %1485 }
 0x2bb   : > { %v1489_v16 = vrot.slane %v1486_v49, 4  ;;  %v1490_v6 = vsel %vm452_vm3, %v1487_v18, %v1488_v9 }
 0x2bc   : > { %v1574_v7 = vpop.permute.xlu1 %1573  ;;  %v1491_v27 = vsel %vm474_vm2, %v1482_v2, %v1490_v6 }
 0x2bd   : > { %v1579_v53 = vrot.slane %v1574_v7, 4  ;;  %v1492_v42 = vsel %vm452_vm3, %v1488_v9, %v1489_v16 }
 0x2be   : > { %v1576_v8 = vpop.permute.xlu0 %1575  ;;  %v1493_v22 = vsel %vm474_vm2, %v1484_v17, %v1492_v42 }
 0x2bf   : > { %v1580_v24 = vrot.slane %v1576_v8, 4 }
 0x2c0   : > { %v1578_v12 = vpop.permute.xlu1 %1577 }
 0x2c1   : > { %v1581_v11 = vrot.slane %v1578_v12, 4  ;;  %v1582_v62 = vsel %vm452_vm3, %v1579_v53, %v1580_v24  ;;  %v1945_v53 = vrot.slane %v4466_v5, 4 }
 0x2c2   : > { %v1583_v15 = vsel %vm571_vm7, %v1574_v7, %v1582_v62  ;;  %v1662_v20 = vpop.permute.xlu0 %1661 }
 0x2c3   : > { %v1584_v34 = vsel %vm452_vm3, %v1580_v24, %v1581_v11  ;;  %v3497_v26 = vcombine.high %v1491_v27, %v1583_v15  ;;  %v3496_v28 = vcombine.low %v1491_v27, %v1583_v15  ;;  %v1667_v59 = vrot.slane %v1662_v20, 4 }
 0x2c4   : > { %v1585_v25 = vsel %vm571_vm7, %v1576_v8, %v1584_v34  ;;  %v1664_v36 = vpop.permute.xlu1 %1663  ;;  %v2037_v27 = vrot.slane %v4464_v4, 4 }
 0x2c5   : > { %v3499_v52 = vcombine.high %v1493_v22, %v1585_v25  ;;  %v3498_v30 = vcombine.low %v1493_v22, %v1585_v25  ;;  %2266 = vmatprep.subr.bf16.mxu0 %v3497_v26  ;;  %v1668_v38 = vrot.slane %v1664_v36, 4 }
 0x2c6   : > { %v1666_v54 = vpop.permute.xlu0 %1665  ;;  %2267 = vmatpush1.bf16.msra.mxu0 %v3496_v28 }
 0x2c7   : > { %2307 = vmatprep.subr.bf16.mxu1 %v3499_v52  ;;  %v1669_v31 = vrot.slane %v1666_v54, 4  ;;  %v1670_v43 = vsel %vm452_vm3, %v1667_v59, %v1668_v38 }
 0x2c8   : > { %v1754_v61 = vpop.permute.xlu1 %1753  ;;  %2308 = vmatpush1.bf16.msra.mxu1 %v3498_v30  ;;  %v1671_v45 = vsel %vm664_vm5, %v1662_v20, %v1670_v43 }
 0x2c9   : > { %v1672_v14 = vsel %vm452_vm3, %v1668_v38, %v1669_v31  ;;  %v1759_v58 = vrot.slane %v1754_v61, 4 }
 0x2ca   : > { %v1756_v63 = vpop.permute.xlu0 %1755  ;;  %v1673_v23 = vsel %vm664_vm5, %v1664_v36, %v1672_v14 }
 0x2cb   : > { %v1760_v60 = vrot.slane %v1756_v63, 4 }
 0x2cc   : > { %v1758_v37 = vpop.permute.xlu1 %1757 }
 0x2cd   : > { %v1761_v44 = vrot.slane %v1758_v37, 4  ;;  %v1762_v0 = vsel %vm452_vm3, %v1759_v58, %v1760_v60 }
 0x2ce   : > { %v1763_v55 = vsel %vm761_vm4, %v1754_v61, %v1762_v0  ;;  %v1850_v56 = vpop.permute.xlu0 %1849 }
 0x2cf   : > { %v1764_v39 = vsel %vm452_vm3, %v1760_v60, %v1761_v44  ;;  %v1855_v47 = vrot.slane %v1850_v56, 4  ;;  %v3501_v41 = vcombine.high %v1671_v45, %v1763_v55  ;;  %v3500_v48 = vcombine.low %v1671_v45, %v1763_v55  ;;  %v2134_v44 = vld [vmem:[%s4722_s6] sm:$0xf] }
 0x2d0   : > { %v1765_v46 = vsel %vm761_vm4, %v1756_v63, %v1764_v39  ;;  %v1852_v1 = vpop.permute.xlu1 %1851 }
 0x2d1   : > { %v1856_v50 = vrot.slane %v1852_v1, 4  ;;  %v3503_v51 = vcombine.high %v1673_v23, %v1765_v46  ;;  %v3502_v57 = vcombine.low %v1673_v23, %v1765_v46  ;;  %2268 = vmatprep.subr.bf16.mxu0 %v3501_v41 }
 0x2d2   : > { %v1940_v17 = vpop.permute.xlu0 %1939  ;;  %2269 = vmatpush1.bf16.msra.mxu0 %v3500_v48 }
 0x2d3   : > { %v1858_v40 = vsel %vm452_vm3, %v1855_v47, %v1856_v50  ;;  %v1860_v2 = vsel %vm452_vm3, %v1856_v50, %v1857_v3  ;;  %2309 = vmatprep.subr.bf16.mxu1 %v3503_v51  ;;  %v1944_v9 = vrot.slane %v1940_v17, 4 }
 0x2d4   : > { %v1859_v49 = vsel %vm735_vm8, %v1850_v56, %v1858_v40  ;;  %v1861_v18 = vsel %vm735_vm8, %v1852_v1, %v1860_v2  ;;  %v1938_v7 = vpop.permute.xlu1 %1937  ;;  %2310 = vmatpush1.bf16.msra.mxu1 %v3502_v57 }
 0x2d5   : > { %v1943_v16 = vrot.slane %v1938_v7, 4  ;;  %v3505_v21 = vcombine.high %v4282_v13, %v1859_v49  ;;  %v3507_v8 = vcombine.high %v4284_v33, %v1861_v18  ;;  %v3504_v6 = vcombine.low %v4282_v13, %v1859_v49  ;;  %v2740_v49 = vld [vmem:[#allocation2 + $0x14] sm:$0xf] }
 0x2d6   : > { %v3506_v24 = vcombine.low %v4284_v33, %v1861_v18  ;;  %v2030_v12 = vpop.permute.xlu0 %2029  ;;  %v1948_v42 = vsel %vm452_vm3, %v1944_v9, %v1945_v53 }
 0x2d7   : > { %2270 = vmatprep.subr.bf16.mxu0 %v3505_v21  ;;  %2311 = vmatprep.subr.bf16.mxu1 %v3507_v8  ;;  %v2035_v11 = vrot.slane %v2030_v12, 4  ;;  %v1946_v15 = vsel %vm452_vm3, %v1943_v16, %v1944_v9  ;;  %v1949_v13 = vsel %vm638_vm1, %v1940_v17, %v1948_v42  ;;  %v2832_v42 = vld [vmem:[#allocation2 + $0x14] sm:$0xf] }
 0x2d8   : > { %v2032_v62 = vpop.permute.xlu1 %2031  ;;  %2271 = vmatpush1.bf16.msra.mxu0 %v3504_v6  ;;  %2312 = vmatpush1.bf16.msra.mxu1 %v3506_v24  ;;  %v1947_v22 = vsel %vm638_vm1, %v1938_v7, %v1946_v15 }
 0x2d9   : > { %v2036_v34 = vrot.slane %v2032_v62, 4 }
 0x2da   : > { %v2120_v20 = vpop.permute.xlu0 %2119 }
 0x2db   : > { %v2038_v5 = vsel %vm452_vm3, %v2035_v11, %v2036_v34  ;;  %v2040_v33 = vsel %vm452_vm3, %v2036_v34, %v2037_v27  ;;  %v2124_v26 = vrot.slane %v2120_v20, 4 }
 0x2dc   : > { %v2039_v25 = vsel %vm545_vm6, %v2030_v12, %v2038_v5  ;;  %v2041_v36 = vsel %vm545_vm6, %v2032_v62, %v2040_v33  ;;  %v2118_v28 = vpop.permute.xlu1 %2117  ;;  %v2920_v62 = vld [vmem:[#allocation2 + $0x14] sm:$0xf] }
 0x2dd   : > { %v2123_v52 = vrot.slane %v2118_v28, 4  ;;  %v3509_v4 = vcombine.high %v1947_v22, %v2039_v25  ;;  %v3511_v30 = vcombine.high %v1949_v13, %v2041_v36  ;;  %v3508_v54 = vcombine.low %v1947_v22, %v2039_v25 }
 0x2de   : > { %v3510_v59 = vcombine.low %v1949_v13, %v2041_v36 }
 0x2df   : > { %v2126_v38 = vsel %vm452_vm3, %v2123_v52, %v2124_v26  ;;  %2272 = vmatprep.subr.bf16.mxu0 %v3509_v4  ;;  %2313 = vmatprep.subr.bf16.mxu1 %v3511_v30 }
 0x2e0   : > { %v2127_v31 = vsel %vm450_vm0, %v2118_v28, %v2126_v38  ;;  %v2122_v61 = vpop.permute.xlu1 %2121  ;;  %2273 = vmatpush1.bf16.msra.mxu0 %v3508_v54  ;;  %2314 = vmatpush1.bf16.msra.mxu1 %v3510_v59 }
 0x2e1   : > { %v2125_v63 = vrot.slane %v2122_v61, 4  ;;  %v3513_v43 = vcombine.high %v2127_v31, %v2127_v31  ;;  %v3512_v14 = vcombine.low %v2127_v31, %v2127_v31 }
 0x2e3   : > { %v2128_v58 = vsel %vm452_vm3, %v2124_v26, %v2125_v63  ;;  %3516 = vmatprep.subr.msk.bf16.mxu0 %vm452_vm3, %v3513_v43  ;;  %v2255_v60 = vsel %vm452_vm3, %v3512_v14, 0 }
 0x2e4   : > { %v2129_v37 = vsel %vm450_vm0, %v2120_v20, %v2128_v58  ;;  %2275 = vmatpush1.bf16.msra.mxu0 %v2255_v60  ;;  %v4518_v39 = vpop.permute.xlu1 %2427 }
 0x2e5   : > { %v3515_v0 = vcombine.high %v2129_v37, %v2129_v37  ;;  %v3514_v45 = vcombine.low %v2129_v37, %v2129_v37  ;;  %v2431_v37 = vrot.slane %v4518_v39, 4 }
 0x2e7   : > { %3517 = vmatmul.mubr.msk.bf16.vlgmr.msra.gmra.mrb[8].mxu0 %vm2249_vm11, %v2134_v44  ;;  %3518 = vmatprep.subr.msk.bf16.mxu1 %vm452_vm3, %v3515_v0  ;;  %v2261_v23 = vsel %vm452_vm3, %v3514_v45, 0  ;;  %v2433_v0 = vsel %vm450_vm0, %v2431_v37, %v4518_v39 }
 0x2e8   : > { %2316 = vmatpush1.bf16.msra.mxu1 %v2261_v23  ;;  %3260 = vmatprep.mubr.bf16.mxu0 %v3740_v32  ;;  %v4522_v46 = vpop.permute.xlu1 %2519 }
 0x2e9   : > { %v2523_v45 = vrot.slane %v4522_v46, 4 }
 0x2eb   : > { %3519 = vmatmul.mubr.msk.bf16.vlgmr.msra.gmra.mrb[8].mxu1 %vm2249_vm11, %v2134_v44  ;;  %v2157_v55 = vpop.permute.xlu0 %2156 }
 0x2ec   : > { %3301 = vmatprep.mubr.bf16.mxu1 %v3740_v32  ;;  %v4526_v1 = vpop.permute.xlu1 %2607 }
 0x2ef   : > { %v4520_v56 = vpop.permute.xlu0 %2429 }
 0x2f0   : > { %v4530_v48 = vpop.permute.xlu1 %2699  ;;  %v2432_v44 = vrot.slane %v4520_v56, 4 }
 0x2f3   : > { %v4524_v47 = vpop.permute.xlu0 %2521 }
 0x2f4   : > { %v4534_v50 = vpop.permute.xlu1 %2795 }
 0x2f5   : > { %v2799_v40 = vrot.slane %v4534_v50, 4 }
 0x2f7   : > { %v4528_v41 = vpop.permute.xlu0 %2609 }
 0x2f8   : > { %v4536_v51 = vpop.permute.xlu1 %2883 }
 0x2f9   : > { %v2887_v9 = vrot.slane %v4536_v51, 4 }
 0x2fb   : > { %v4532_v3 = vpop.permute.xlu0 %2701 }
 0x2fc   : > { %v4539_v17 = vpop.permute.xlu1 %2975 }
 0x2fd   : > { %v2979_v7 = vrot.slane %v4539_v17, 4 }
 0x2ff   : > { %v2798_v32 = vpop.permute.xlu0 %2797 }
 0x300   : > { %v2800_v2 = vrot.slane %v2798_v32, 4 }
 0x302   : > { %v2802_v18 = vsel %vm452_vm3, %v2799_v40, %v2800_v2  ;;  %v2809_v8 = vmul.bf16 %v2800_v2, %v2740_v49  ;;  %v2525_v2 = vsel %vm545_vm6, %v2523_v45, %v4522_v46  ;;  %v2611_v46 = vrot.slane %v4526_v1, 4 }
 0x303   : > { %v2886_v57 = vpop.permute.xlu0 %2885  ;;  %v4547_v21 = vsel %vm761_vm4, %v2802_v18, %v2798_v32  ;;  %v2524_v32 = vrot.slane %v4524_v47, 4 }
 0x304   : > { %v2888_v6 = vrot.slane %v2886_v57, 4  ;;  %2817 = vrot.lane.b32.xlu1 %v2809_v8, %s3735_s24 }
 0x306   : > { %v2890_v24 = vsel %vm452_vm3, %v2887_v9, %v2888_v6  ;;  %v2897_v15 = vmul.bf16 %v2888_v6, %v2832_v42 }
 0x307   : > { %v2978_v16 = vpop.permute.xlu0 %2977  ;;  %v4557_v11 = vsel %vm664_vm5, %v2890_v24, %v2886_v57  ;;  %v2612_v24 = vrot.slane %v4528_v41, 4 }
 0x308   : > { %v2980_v53 = vrot.slane %v2978_v16, 4  ;;  %2905 = vrot.lane.b32.xlu0 %v2897_v15, %s3733_s30  ;;  %v2703_v15 = vrot.slane %v4530_v48, 4 }
 0x30a   : > { %v2982_v12 = vsel %vm452_vm3, %v2979_v7, %v2980_v53  ;;  %v2989_v34 = vmul.bf16 %v2980_v53, %v2920_v62 }
 0x30b   : > { %v4560_v27 = vsel %vm571_vm7, %v2982_v12, %v2978_v16  ;;  %v2526_v16 = vsel %vm452_vm3, %v2523_v45, %v2524_v32 }
 0x30c   : > { %2997 = vrot.lane.b32.xlu1 %v2989_v34, %s3734_s15  ;;  %v2527_v53 = vsel %vm545_vm6, %v2526_v16, %v4524_v47  ;;  %v2614_v34 = vsel %vm452_vm3, %v2611_v46, %v2612_v24  ;;  %v2704_v47 = vrot.slane %v4532_v3, 4 }
 0x3ba   : > { %v2300_v13 = vpop.f32.mrb[8].mxu0 }
 0x3bb   : > { %v2301_v5 = vadd.f32 %v2300_v13, %v2157_v55  ;;  %v2302_v33 = vpop.f32.mrb[9].mxu0 }
 0x3bc   : > { %v2303_v20 = vadd.f32 %v2302_v33, %v2157_v55  ;;  %v2304_v22 = vpop.f32.mrb[10].mxu0  ;;  %v2705_v33 = vsel %vm735_vm8, %v2703_v15, %v4530_v48 }
 0x3bd   : > { %v2348_v25 = vmul.f32 0.25, %v2301_v5  ;;  %v2305_v36 = vpop.f32.mrb[11].mxu0 }
 0x3be   : > { %v2349_v26 = vmul.f32 0.25, %v2303_v20  ;;  %v2341_v28 = vpop.f32.mrb[8].mxu1 }
 0x3bf   : > { %v2352_v52 = vmax.f32 %v2301_v5, %v2348_v25  ;;  %v2342_v4 = vadd.f32 %v2341_v28, %v2157_v55  ;;  %v2343_v30 = vpop.f32.mrb[9].mxu1 }
 0x3c0   : > { %v2353_v54 = vmax.f32 %v2303_v20, %v2349_v26  ;;  %v2344_v59 = vadd.f32 %v2343_v30, %v2157_v55  ;;  %v2345_v38 = vpop.f32.mrb[10].mxu1  ;;  %v2434_v55 = vsel %vm452_vm3, %v2431_v37, %v2432_v44  ;;  %v2706_v20 = vsel %vm452_vm3, %v2703_v15, %v2704_v47 }
 0x3c1   : > { %v2350_v31 = vmul.f32 0.25, %v2342_v4  ;;  %v2346_v61 = vpop.f32.mrb[11].mxu1  ;;  %v2435_v49 = vsel %vm450_vm0, %v2434_v55, %v4520_v56  ;;  %v2613_v56 = vsel %vm638_vm1, %v2611_v46, %v4526_v1  ;;  %v2615_v1 = vsel %vm638_vm1, %v2614_v34, %v4528_v41 }
 0x3c2   : > { %v4564_v63 = vpack.c.bf16 %v2353_v54, %v2352_v52  ;;  %v2351_v43 = vmul.f32 0.25, %v2344_v59  ;;  %v2707_v26 = vsel %vm735_vm8, %v2706_v20, %v4532_v3  ;;  %v2801_v52 = vsel %vm761_vm4, %v2799_v40, %v4534_v50 }
 0x3c3   : > { %v2354_v14 = vmax.f32 %v2342_v4, %v2350_v31  ;;  %v3066_v4 = vpop.permute.xlu0 %3065  ;;  %v2889_v40 = vsel %vm664_vm5, %v2887_v9, %v4536_v51 }
 0x3c4   : > { %2372 = vst [vmem:[#allocation2 + $0x4] sm:$0xff] %v4564_v63  ;;  %v2355_v58 = vmax.f32 %v2344_v59, %v2351_v43  ;;  %v2807_v30 = vmul.bf16 %v4564_v63, %v2801_v52  ;;  %v3064_v59 = vpop.permute.xlu1 %3063  ;;  %v3068_v38 = vrot.slane %v3066_v4, 4  ;;  %v2895_v43 = vmul.bf16 %v4564_v63, %v2889_v40 }
 0x3c5   : > { %v3067_v31 = vrot.slane %v3064_v59, 4 }
 0x3c6   : > { %v4567_v60 = vpack.c.bf16 %v2355_v58, %v2354_v14 }
 0x3c7   : > { %v3070_v61 = vsel %vm452_vm3, %v3067_v31, %v3068_v38  ;;  %v3069_v58 = vsel %vm474_vm2, %v3067_v31, %v3064_v59 }
 0x3c8   : > { %2373 = vst [vmem:[#allocation2 + $0xc] sm:$0xff] %v4567_v60  ;;  %v2896_v3 = vmul.bf16 %v4567_v60, %v4557_v11  ;;  %v2808_v50 = vmul.bf16 %v4567_v60, %v4547_v21  ;;  %v2988_v11 = vmul.bf16 %v4567_v60, %v4560_v27  ;;  %v2981_v21 = vsel %vm571_vm7, %v2979_v7, %v4539_v17  ;;  %v1149_v17 = vld [vmem:[%s4719_s3] sm:$0xff]  ;;  %v3012_v27 = vld [vmem:[#allocation2 + $0x14] sm:$0xf] }
 0x3c9   : > { %v3071_v14 = vsel %vm474_vm2, %v3070_v61, %v3066_v4  ;;  %v2987_v51 = vmul.bf16 %v4564_v63, %v2981_v21  ;;  %v3075_v7 = vmul.bf16 %v4564_v63, %v3069_v58  ;;  %v3077_v37 = vmul.bf16 %v3068_v38, %v3012_v27 }
 0x3ca   : > { %v3076_v9 = vmul.bf16 %v4567_v60, %v3071_v14 }
 0x3cb   : > { %v2374_v23 = vld [vmem:[#allocation2] sm:$0xff] }
 0x3cc   : > { %v2439_v57 = vmul.bf16 %v2433_v0, %v2374_v23  ;;  %v2531_v8 = vmul.bf16 %v2525_v2, %v2374_v23  ;;  %v2619_v5 = vmul.bf16 %v2613_v56, %v2374_v23  ;;  %v2711_v25 = vmul.bf16 %v2705_v33, %v2374_v23  ;;  %v4651_v0 = vpop.permute.xlu1 %2817  ;;  %v4655_v23 = vpop.permute.xlu0 %2905 }
 0x3cd   : > { %v2821_v14 = vrot.slane %v4651_v0, 4 }
 0x3ce   : > { %2445 = vrot.lane.b32.xlu1 %v2439_v57, %s3741_s23 }
 0x3cf   : > { %v2375_v18 = vld [vmem:[#allocation2 + $0x8] sm:$0xff]  ;;  %v2376_v6 = vld [vmem:[#allocation2 + $0x10] sm:$0xf] }
 0x3d0   : > { %v2440_v39 = vmul.bf16 %v2435_v49, %v2375_v18  ;;  %v2532_v12 = vmul.bf16 %v2527_v53, %v2375_v18  ;;  %v2441_v42 = vmul.bf16 %v2432_v44, %v2376_v6  ;;  %v2464_v62 = vld [vmem:[#allocation2 + $0x10] sm:$0xf]  ;;  %v2620_v22 = vmul.bf16 %v2615_v1, %v2375_v18  ;;  %v3117_v44 = vld [vmem:[%s4725_s9] sm:$0xff]  ;;  %v4653_v45 = vpop.permute.xlu1 %2997 }
 0x3d1   : > { %v2533_v13 = vmul.bf16 %v2524_v32, %v2464_v62  ;;  %v2556_v36 = vld [vmem:[#allocation2 + $0x10] sm:$0xf]  ;;  %v2712_v48 = vmul.bf16 %v2707_v26, %v2375_v18  ;;  %v3001_v0 = vrot.slane %v4653_v45, 4 }
 0x3d2   : > { %2447 = vrot.lane.b32.xlu0 %v2440_v39, %s3741_s23  ;;  %2537 = vrot.lane.b32.xlu1 %v2531_v8, %s3738_s21  ;;  %v2621_v28 = vmul.bf16 %v2612_v24, %v2556_v36  ;;  %v2644_v41 = vld [vmem:[#allocation2 + $0x10] sm:$0xf] }
 0x3d3   : > { %v2713_v54 = vmul.bf16 %v2704_v47, %v2644_v41 }
 0x3d6   : > { %2539 = vrot.lane.b32.xlu0 %v2532_v12, %s3738_s21  ;;  %2449 = vrot.lane.b32.xlu1 %v2441_v42, %s3741_s23 }
 0x3da   : > { %2541 = vrot.lane.b32.xlu0 %v2533_v13, %s3738_s21  ;;  %2625 = vrot.lane.b32.xlu1 %v2619_v5, %s3737_s18 }
 0x3de   : > { %2627 = vrot.lane.b32.xlu0 %v2620_v22, %s3737_s18  ;;  %2717 = vrot.lane.b32.xlu1 %v2711_v25, %s3736_s11 }
 0x3e2   : > { %2719 = vrot.lane.b32.xlu0 %v2712_v48, %s3736_s11  ;;  %2629 = vrot.lane.b32.xlu1 %v2621_v28, %s3737_s18 }
 0x3e6   : > { %2721 = vrot.lane.b32.xlu0 %v2713_v54, %s3736_s11  ;;  %2813 = vrot.lane.b32.xlu1 %v2807_v30, %s3735_s24 }
 0x3ea   : > { %2815 = vrot.lane.b32.xlu0 %v2808_v50, %s3735_s24  ;;  %2903 = vrot.lane.b32.xlu1 %v2896_v3, %s3733_s30 }
 0x3ee   : > { %2901 = vrot.lane.b32.xlu0 %v2895_v43, %s3733_s30  ;;  %2995 = vrot.lane.b32.xlu1 %v2988_v11, %s3734_s15 }
 0x3f2   : > { %2993 = vrot.lane.b32.xlu0 %v2987_v51, %s3734_s15  ;;  %3083 = vrot.lane.b32.xlu1 %v3076_v9, %s3739_s22  ;;  %v2909_v51 = vrot.slane %v4655_v23, 4 }
 0x3f6   : > { %1152 = vperm.xlu1 %3618, %v1149_v17   ;;  %3081 = vrot.lane.b32.xlu0 %v3075_v7, %s3739_s22 }
 0x3fa   : > { %3085 = vrot.lane.b32.xlu0 %v3077_v37, %s3739_s22  ;;  %s3378_s22 = sshll.u32 %s4728_s29, 3 }
 0x3fb   : > { %s358_s14 = scalar_lea.vmem %s4726_s10, %s3378_s22 }
 0x3fe   : > { %3120 = vperm.xlu0 %3617, %v3117_v44  }
 0x440   : > { %v2446_v55 = vpop.permute.xlu1 %2445 }
 0x441   : > { %v2451_v2 = vrot.slane %v2446_v55, 4 }
 0x444   : > { %v2448_v32 = vpop.permute.xlu0 %2447  ;;  %v2538_v57 = vpop.permute.xlu1 %2537 }
 0x445   : > { %v2452_v49 = vrot.slane %v2448_v32, 4  ;;  %v2543_v6 = vrot.slane %v2538_v57, 4 }
 0x447   : > { %v2454_v18 = vsel %vm452_vm3, %v2451_v2, %v2452_v49 }
 0x448   : > { %v2455_v16 = vsel %vm474_vm2, %v2446_v55, %v2454_v18  ;;  %v2540_v39 = vpop.permute.xlu0 %2539  ;;  %v2450_v8 = vpop.permute.xlu1 %2449 }
 0x449   : > { %2460 = vst [vmem:[#allocation3] sm:$0xff] %v2455_v16  ;;  %v2544_v53 = vrot.slane %v2540_v39, 4  ;;  %v2453_v46 = vrot.slane %v2450_v8, 4 }
 0x44b   : > { %v2546_v24 = vsel %vm452_vm3, %v2543_v6, %v2544_v53  ;;  %v2456_v12 = vsel %vm452_vm3, %v2452_v49, %v2453_v46 }
 0x44c   : > { %v2547_v42 = vsel %vm571_vm7, %v2538_v57, %v2546_v24  ;;  %v2457_v56 = vsel %vm474_vm2, %v2448_v32, %v2456_v12  ;;  %v2542_v62 = vpop.permute.xlu0 %2541  ;;  %v2626_v15 = vpop.permute.xlu1 %2625 }
 0x44d   : > { %2552 = vst [vmem:[#allocation3 + $0x10] sm:$0xff] %v2547_v42  ;;  %2461 = vst [vmem:[#allocation3 + $0x8] sm:$0xff] %v2457_v56  ;;  %v2545_v34 = vrot.slane %v2542_v62, 4  ;;  %v3570_v47 = vcombine.low %v2455_v16, %v2547_v42  ;;  %v3571_v13 = vcombine.high %v2455_v16, %v2547_v42  ;;  %v2631_v22 = vrot.slane %v2626_v15, 4 }
 0x44f   : > { %v2548_v5 = vsel %vm452_vm3, %v2544_v53, %v2545_v34  ;;  %3228 = vmatprep.subr.bf16.mxu0 %v3571_v13 }
 0x450   : > { %v2549_v33 = vsel %vm571_vm7, %v2540_v39, %v2548_v5  ;;  %v2628_v1 = vpop.permute.xlu0 %2627  ;;  %v2718_v20 = vpop.permute.xlu1 %2717  ;;  %3229 = vmatpush1.bf16.msra.mxu0 %v3570_v47 }
 0x451   : > { %2553 = vst [vmem:[#allocation3 + $0x18] sm:$0xff] %v2549_v33  ;;  %v2632_v25 = vrot.slane %v2628_v1, 4  ;;  %v3572_v36 = vcombine.low %v2457_v56, %v2549_v33  ;;  %v3573_v26 = vcombine.high %v2457_v56, %v2549_v33  ;;  %v2723_v4 = vrot.slane %v2718_v20, 4 }
 0x453   : > { %v2634_v48 = vsel %vm452_vm3, %v2631_v22, %v2632_v25  ;;  %3269 = vmatprep.subr.bf16.mxu1 %v3573_v26 }
 0x454   : > { %v2635_v28 = vsel %vm664_vm5, %v2626_v15, %v2634_v48  ;;  %v2720_v52 = vpop.permute.xlu0 %2719  ;;  %v2630_v41 = vpop.permute.xlu1 %2629  ;;  %3270 = vmatpush1.bf16.msra.mxu1 %v3572_v36 }
 0x455   : > { %2640 = vst [vmem:[#allocation3 + $0x20] sm:$0xff] %v2635_v28  ;;  %v2724_v30 = vrot.slane %v2720_v52, 4  ;;  %v2633_v54 = vrot.slane %v2630_v41, 4 }
 0x457   : > { %v2726_v59 = vsel %vm452_vm3, %v2723_v4, %v2724_v30  ;;  %v2636_v38 = vsel %vm452_vm3, %v2632_v25, %v2633_v54 }
 0x458   : > { %v2727_v3 = vsel %vm761_vm4, %v2718_v20, %v2726_v59  ;;  %v2637_v31 = vsel %vm664_vm5, %v2628_v1, %v2636_v38  ;;  %v2722_v50 = vpop.permute.xlu0 %2721  ;;  %v2814_v40 = vpop.permute.xlu1 %2813  ;;  %v3098_v59 = vld [vmem:[%s4724_s8] sm:$0xf] }
 0x459   : > { %2641 = vst [vmem:[#allocation3 + $0x28] sm:$0xff] %v2637_v31  ;;  %v2725_v61 = vrot.slane %v2722_v50, 4  ;;  %v3574_v43 = vcombine.low %v2635_v28, %v2727_v3  ;;  %v3575_v11 = vcombine.high %v2635_v28, %v2727_v3  ;;  %v2819_v58 = vrot.slane %v2814_v40, 4 }
 0x45b   : > { %v2728_v21 = vsel %vm452_vm3, %v2724_v30, %v2725_v61  ;;  %3230 = vmatprep.subr.bf16.mxu0 %v3575_v11 }
 0x45c   : > { %v2729_v9 = vsel %vm761_vm4, %v2720_v52, %v2728_v21  ;;  %v2816_v17 = vpop.permute.xlu0 %2815  ;;  %v2904_v7 = vpop.permute.xlu1 %2903  ;;  %3231 = vmatpush1.bf16.msra.mxu0 %v3574_v43 }
 0x45d   : > { %v2820_v27 = vrot.slane %v2816_v17, 4  ;;  %v2908_v37 = vrot.slane %v2904_v7, 4  ;;  %v3576_v44 = vcombine.low %v2637_v31, %v2729_v9  ;;  %v3577_v55 = vcombine.high %v2637_v31, %v2729_v9 }
 0x45f   : > { %v2822_v32 = vsel %vm452_vm3, %v2819_v58, %v2820_v27  ;;  %v2824_v57 = vsel %vm452_vm3, %v2820_v27, %v2821_v14  ;;  %v2912_v2 = vsel %vm452_vm3, %v2908_v37, %v2909_v51  ;;  %3271 = vmatprep.subr.bf16.mxu1 %v3577_v55 }
 0x460   : > { %v2823_v23 = vsel %vm735_vm8, %v2814_v40, %v2822_v32  ;;  %v2825_v49 = vsel %vm735_vm8, %v2816_v17, %v2824_v57  ;;  %v2913_v18 = vsel %vm638_vm1, %v2904_v7, %v2912_v2  ;;  %v2902_v16 = vpop.permute.xlu0 %2901  ;;  %v2996_v39 = vpop.permute.xlu1 %2995  ;;  %3272 = vmatpush1.bf16.msra.mxu1 %v3576_v44 }
 0x461   : > { %v2907_v8 = vrot.slane %v2902_v16, 4  ;;  %v3000_v6 = vrot.slane %v2996_v39, 4  ;;  %v3578_v53 = vcombine.low %v4564_v63, %v2823_v23  ;;  %v3579_v46 = vcombine.high %v4564_v63, %v2823_v23 }
 0x462   : > { %v3580_v24 = vcombine.low %v4567_v60, %v2825_v49  ;;  %v3581_v12 = vcombine.high %v4567_v60, %v2825_v49 }
 0x463   : > { %v2910_v45 = vsel %vm452_vm3, %v2907_v8, %v2908_v37  ;;  %v3004_v42 = vsel %vm452_vm3, %v3000_v6, %v3001_v0  ;;  %3232 = vmatprep.subr.bf16.mxu0 %v3579_v46 }
 0x464   : > { %v2911_v56 = vsel %vm638_vm1, %v2902_v16, %v2910_v45  ;;  %v3005_v62 = vsel %vm545_vm6, %v2996_v39, %v3004_v42  ;;  %v2994_v15 = vpop.permute.xlu0 %2993  ;;  %3273 = vmatprep.subr.bf16.mxu1 %v3581_v12  ;;  %3233 = vmatpush1.bf16.msra.mxu0 %v3578_v53  ;;  %v3084_v13 = vpop.permute.xlu1 %3083 }
 0x465   : > { %v2999_v34 = vrot.slane %v2994_v15, 4  ;;  %3274 = vmatpush1.bf16.msra.mxu1 %v3580_v24  ;;  %v3584_v47 = vcombine.low %v2913_v18, %v3005_v62  ;;  %v3585_v63 = vcombine.high %v2913_v18, %v3005_v62  ;;  %v3088_v1 = vrot.slane %v3084_v13, 4 }
 0x467   : > { %v3002_v5 = vsel %vm452_vm3, %v2999_v34, %v3000_v6  ;;  %3275 = vmatprep.subr.bf16.mxu1 %v3585_v63 }
 0x468   : > { %v3003_v60 = vsel %vm545_vm6, %v2994_v15, %v3002_v5  ;;  %v3082_v33 = vpop.permute.xlu0 %3081 }
 0x469   : > { %v3087_v20 = vrot.slane %v3082_v33, 4  ;;  %3276 = vmatpush1.bf16.msra.mxu1 %v3584_v47  ;;  %v3582_v22 = vcombine.low %v2911_v56, %v3003_v60  ;;  %v3583_v25 = vcombine.high %v2911_v56, %v3003_v60 }
 0x46b   : > { %v3090_v36 = vsel %vm452_vm3, %v3087_v20, %v3088_v1  ;;  %3234 = vmatprep.subr.bf16.mxu0 %v3583_v25 }
 0x46c   : > { %v3091_v26 = vsel %vm450_vm0, %v3082_v33, %v3090_v36  ;;  %v3086_v48 = vpop.permute.xlu0 %3085  ;;  %3235 = vmatpush1.bf16.msra.mxu0 %v3582_v22 }
 0x46d   : > { %v3089_v28 = vrot.slane %v3086_v48, 4  ;;  %v3587_v52 = vcombine.high %v3091_v26, %v3091_v26  ;;  %v3586_v41 = vcombine.low %v3091_v26, %v3091_v26 }
 0x46f   : > { %v3092_v4 = vsel %vm452_vm3, %v3088_v1, %v3089_v28  ;;  %3590 = vmatprep.subr.msk.bf16.mxu0 %vm452_vm3, %v3587_v52  ;;  %v3217_v30 = vsel %vm452_vm3, %v3586_v41, 0 }
 0x470   : > { %v3093_v54 = vsel %vm450_vm0, %v3084_v13, %v3092_v4  ;;  %3237 = vmatpush1.bf16.msra.mxu0 %v3217_v30 }
 0x471   : > { %v3589_v38 = vcombine.high %v3093_v54, %v3093_v54  ;;  %v3588_v3 = vcombine.low %v3093_v54, %v3093_v54 }
 0x473   : > { %3591 = vmatmul.mubr.msk.bf16.vlgmr.msra.gmra.mrb[12].mxu0 %vm2249_vm11, %v3098_v59  ;;  %3592 = vmatprep.subr.msk.bf16.mxu1 %vm452_vm3, %v3589_v38  ;;  %v3223_v31 = vsel %vm452_vm3, %v3588_v3, 0 }
 0x474   : > { %3278 = vmatpush1.bf16.msra.mxu1 %v3223_v31 }
 0x475   : > { %v1153_v50 = vpop.permute.xlu1 %1152 }
 0x476   : > { %v1237_v40 = vadd.f32 %v4274_v29, %v1153_v50  ;;  %v1239_v61 = vadd.f32 %v4278_v10, %v1153_v50  ;;  %v1278_v43 = vadd.f32 %v4276_v35, %v1153_v50  ;;  %v1280_v21 = vadd.f32 %v4280_v19, %v1153_v50 }
 0x477   : > { %3593 = vmatmul.mubr.msk.bf16.vlgmr.msra.gmra.mrb[12].mxu1 %vm2249_vm11, %v3098_v59 }
 0x478   : > { %v1284_v11 = vmul.f32 0.25, %v1237_v40  ;;  %v1285_v14 = vmul.f32 0.25, %v1239_v61  ;;  %v1286_v58 = vmul.f32 0.25, %v1278_v43  ;;  %v1287_v37 = vmul.f32 0.25, %v1280_v21 }
 0x47a   : > { %v1288_v17 = vmax.f32 %v1237_v40, %v1284_v11  ;;  %v1289_v29 = vmax.f32 %v1239_v61, %v1285_v14  ;;  %v1290_v57 = vmax.f32 %v1278_v43, %v1286_v58  ;;  %v1291_v23 = vmax.f32 %v1280_v21, %v1287_v37 }
 0x47d   : > { %v3121_v51 = vpop.permute.xlu0 %3120 }
 0x546   : > { %v3262_v9 = vpop.f32.mrb[12].mxu0 }
 0x547   : > { %v3263_v7 = vadd.f32 %v3262_v9, %v3121_v51  ;;  %v3264_v27 = vpop.f32.mrb[13].mxu0 }
 0x548   : > { %v3265_v10 = vadd.f32 %v3264_v27, %v3121_v51  ;;  %v3266_v44 = vpop.f32.mrb[14].mxu0 }
 0x549   : > { %v3310_v35 = vadd.f32 %v3263_v7, %v1288_v17  ;;  %v3267_v55 = vpop.f32.mrb[15].mxu0 }
 0x54a   : > { %v3311_v32 = vadd.f32 %v3265_v10, %v1289_v29  ;;  %v3303_v19 = vpop.f32.mrb[12].mxu1 }
 0x54b   : > { %3314 = vst [vmem:[%s358_s14] sm:$0xff] %v3310_v35  ;;  %v3304_v2 = vadd.f32 %v3303_v19, %v3121_v51  ;;  %v3305_v0 = vpop.f32.mrb[13].mxu1 }
 0x54c   : > { %3315 = vst [vmem:[%s358_s14 + $0x8] sm:$0xff] %v3311_v32  ;;  %v3306_v49 = vadd.f32 %v3305_v0, %v3121_v51  ;;  %v3307_v18 = vpop.f32.mrb[14].mxu1 }
 0x54d   : > { %v3312_v16 = vadd.f32 %v3304_v2, %v1290_v57  ;;  %v3308_v39 = vpop.f32.mrb[15].mxu1 }
 0x54e   : > { %v3313_v8 = vadd.f32 %v3306_v49, %v1291_v23 }
 0x54f   : > { %3316 = vst [vmem:[%s358_s14 + $0x10] sm:$0xff] %v3312_v16 }
 0x550   : > { %3317 = vst [vmem:[%s358_s14 + $0x18] sm:$0xff] %v3313_v8 }
 0x551 PF: > { %s20_s13 = sadd.s32 1, %s3731_s13  }
 0x552   : > { %p17_p4 = scmp.ge.s32.totalorder %s20_s13, 4  }
 0x554   :  { %19 = sbr.rel (!%p17_p4) target bundleno = 1 (0x1), region = 90 }

// kernel: tile.29
= control target key start
LH: loop header
LB: loop body
LE: loop exit
PB: predicated region body
PF: predicated region fallthrough
CT: control target
= control target key end

     0   :  { %vm147_vm0 = vcmask 1047556   ;;  %vm149_vm1 = vcmask 130048   ;;  %s261_s12 = smov 16   ;;  %s262_s13 = smov 32   ;;  %vm164_vm2 = vcmask 523648   ;;  %vm181_vm3 = vcmask 392448   ;;  %s291_s0 = inlined_call_operand.vmem [shape: bf16[9,4,16], index: 0, kind: input, shape index: {}]   ;;  %s292_s1 = inlined_call_operand.vmem [shape: bf16[9,64], index: 1, kind: output, shape index: {}]  }
   0x1   :  { %v228_v0 = vld [vmem:[%s291_s0 + $0xa] sm:$0xff]   ;;  %v232_v1 = vld [vmem:[%s291_s0 + $0x2] sm:$0xff]   ;;  %v141_v2 = vld [vmem:[%s291_s0] sm:$0x3]  ;;  %s260_s0 = smov 48   ;;  %vm198_vm4 = vcmask 261248  }
   0x2   :  { %v17_v3 = vunpack.c.h.bf16 %v228_v0  ;;  %v49_v4 = vunpack.c.l.bf16 %v228_v0  ;;  %v81_v5 = vunpack.c.h.bf16 %v232_v1  ;;  %v113_v6 = vunpack.c.l.bf16 %v232_v1 }
   0x3   :  { %v142_v7 = vunpack.c.l.bf16 %v141_v2 }
   0x4   :  { %20 = vst [vmem:[#allocation1 + $0x38] ss:$8 sps:$4 sm:$0xff] %v17_v3   ;;  %52 = vst [vmem:[#allocation1 + $0x28] ss:$8 sps:$4 sm:$0xff] %v49_v4  }
   0x5   :  { %84 = vst [vmem:[#allocation1 + $0x18] ss:$8 sps:$4 sm:$0xff] %v81_v5   ;;  %116 = vst [vmem:[#allocation1 + $0x8] ss:$8 sps:$4 sm:$0xff] %v113_v6  }
   0x6   :  { %144 = vst [vmem:[#allocation1] sm:$0xf] %v142_v7 }
   0xb   :  { %v167_v8 = vld [vmem:[#allocation1 + $0x43] sm:$0x1]   ;;  %v201_v9 = vld [vmem:[#allocation1 + $0x41] sm:$0x1]   ;;  %v184_v12 = vld [vmem:[#allocation1 + $0x42] sm:$0x1]  }
   0xc   :  { %v159_v10 = vld [vmem:[#allocation1 + $0x3] ss:$8 sm:$0xf0]   ;;  %v176_v11 = vld [vmem:[#allocation1 + $0x2] ss:$8 sm:$0xf0]  }
   0xd   :  { %v157_v13 = vld [vmem:[#allocation1 + $0x3] ss:$8 sm:$0xf]   ;;  %v174_v14 = vld [vmem:[#allocation1 + $0x2] ss:$8 sm:$0xf]  }
   0xe   :  { %v161_v15 = vsel %vm147_vm0, %v159_v10, %v157_v13  ;;  %v178_v16 = vsel %vm147_vm0, %v176_v11, %v174_v14  ;;  %v191_v17 = vld [vmem:[#allocation1 + $0x1] ss:$8 sm:$0xf]   ;;  %v145_v21 = vld [vmem:[#allocation1] ss:$8 sm:$0xf]  }
   0xf   :  { %v193_v18 = vld [vmem:[#allocation1 + $0x1] ss:$8 sm:$0xf0]   ;;  %v245_v19 = vpack.i.bf16 %v167_v8, %v161_v15  ;;  %v146_v22 = vld [vmem:[#allocation1] ss:$8 sm:$0xf0]   ;;  %v250_v26 = vpack.i.bf16 %v184_v12, %v178_v16 }
  0x10   :  { %v195_v20 = vsel %vm147_vm0, %v193_v18, %v191_v17  ;;  %v148_v24 = vsel %vm147_vm0, %v146_v22, %v145_v21  ;;  %v152_v25 = vld [vmem:[#allocation1 + $0x40] sm:$0x1]  }
  0x11   :  { %v255_v23 = vpack.i.bf16 %v201_v9, %v195_v20  ;;  %246 = vrot.lane.b32.xlu0 %v245_v19, %s260_s0  ;;  %150 = vst.msk [vmem:[#allocation0] sm:$0xff] %vm149_vm1, %v148_v24   ;;  %155 = vst.msk [vmem:[#allocation0 + $0x8] sm:$0x1] %vm149_vm1, %v152_v25  }
  0x13   :  { %256 = vrot.lane.b32.xlu1 %v255_v23, %s261_s12 }
  0x15   :  { %251 = vrot.lane.b32.xlu0 %v250_v26, %s262_s13 }
  0x83   :  { %v247_v27 = vpop.permute.xlu0 %246 }
  0x84   :  { %v249_v28 = vunpack.i.h.bf16 %v247_v27  ;;  %v248_v29 = vunpack.i.l.bf16 %v247_v27 }
  0x85   :  { %v257_v30 = vpop.permute.xlu1 %256 }
  0x86   :  { %165 = vst.msk [vmem:[#allocation0] sm:$0xff] %vm164_vm2, %v248_v29   ;;  %172 = vst.msk [vmem:[#allocation0 + $0x8] sm:$0x1] %vm164_vm2, %v249_v28   ;;  %v259_v32 = vunpack.i.h.bf16 %v257_v30  ;;  %v258_v33 = vunpack.i.l.bf16 %v257_v30 }
  0x87   :  { %v252_v31 = vpop.permute.xlu0 %251 }
  0x88   :  { %v254_v34 = vunpack.i.h.bf16 %v252_v31  ;;  %v253_v35 = vunpack.i.l.bf16 %v252_v31 }
  0x8a   :  { %182 = vst.msk [vmem:[#allocation0] sm:$0xff] %vm181_vm3, %v253_v35   ;;  %189 = vst.msk [vmem:[#allocation0 + $0x8] sm:$0x1] %vm181_vm3, %v254_v34  }
  0x8b   :  { %199 = vst.msk [vmem:[#allocation0] sm:$0xff] %vm198_vm4, %v258_v33   ;;  %206 = vst.msk [vmem:[#allocation0 + $0x8] sm:$0x1] %vm198_vm4, %v259_v32  }
  0x92   :  { %v211_v36 = vld [vmem:[#allocation0] sm:$0xff]  ;;  %v216_v37 = vld [vmem:[#allocation0 + $0x8] sm:$0xff] }
  0x93   :  { %v240_v38 = vpack.c.bf16 %v216_v37, %v211_v36 }
  0x95   :  { %241 = vst [vmem:[%s292_s1] sm:$0xff] %v240_v38  }

// kernel: image_encoder.5
= control target key start
LH: loop header
LB: loop body
LE: loop exit
PB: predicated region body
PF: predicated region fallthrough
CT: control target
= control target key end

     0   :  { %v60_v0 = vlaneseq  ;;  %vm30_vm0 = vcmask 523264   ;;  %v404_v4 = vmov 0   ;;  %s406_s5 = smov 124   ;;  %s407_s6 = smov 127   ;;  %vm275_vm1 = vcmask 130048   ;;  %s544_s1 = inlined_call_operand.vmem [shape: bf16[9,64], index: 1, kind: input, shape index: {}]   ;;  %s545_s0 = inlined_call_operand.vmem [shape: bf16[4,16,64], index: 0, kind: input, shape index: {}]   ;;  %s546_s2 = inlined_call_operand.vmem [shape: bf16[32,144], index: 2, kind: input, shape index: {}]   ;;  %s547_s3 = inlined_call_operand.vmem [shape: f32[32,1], index: 3, kind: input, shape index: {}]   ;;  %s548_s4 = inlined_call_operand.vmem [shape: f32[32,64], index: 4, kind: output, shape index: {}]  }
   0x1   :  { %v56_v1 = vld [vmem:[%s544_s1] sm:$0x1]  ;;  %v109_v3 = vld [vmem:[%s544_s1] sm:$0x2]  ;;  %282 = vmatprep.subr.bf16.mxu0 %v404_v4  ;;  %364 = vmatprep.subr.bf16.mxu1 %v404_v4  ;;  %v391_v10 = vld [vmem:[%s545_s0 + $0x18] sm:$0xff]   ;;  %s408_s7 = smov 5  }
   0x2   :  { %v82_v2 = vld [vmem:[%s544_s1] sm:$0x1]  ;;  %v58_v5 = vpack.i.b16 %v56_v1, %v56_v1  ;;  %v61_v6 = vshrl.u32 %v60_v0, 7  ;;  %v111_v8 = vpack.i.b16 %v109_v3, %v109_v3  ;;  %v134_v9 = vld [vmem:[%s544_s1] sm:$0x2]  ;;  %389 = vset.pattern.permute.xlu1 %v404_v4  ;;  %390 = vset.pattern.permute.xlu0 %v404_v4  ;;  %53 = vst.msk [vmem:[#allocation2 + $0x28] sm:$0xff] %vm30_vm0, %v391_v10 }
   0x3   :  { %v84_v7 = vshrl.u32 %v82_v2, 16  ;;  %v136_v11 = vshrl.u32 %v134_v9, 16  ;;  %v179_v12 = vld [vmem:[%s544_s1] sm:$0x8]  ;;  %v392_v17 = vld [vmem:[%s545_s0 + $0x10] sm:$0xff]   ;;  %v393_v18 = vld [vmem:[%s545_s0 + $0x8] sm:$0xff]  }
   0x4   :  { %v62_v13 = vsub.s32 0, %v61_v6  ;;  %v115_v15 = vsub.s32 1, %v61_v6  ;;  %42 = vst.msk [vmem:[#allocation2 + $0x18] sm:$0xff] %vm30_vm0, %v392_v17  ;;  %31 = vst.msk [vmem:[#allocation2 + $0x8] sm:$0xff] %vm30_vm0, %v393_v18  ;;  %s405_s1 = smov 123   ;;  %v181_v23 = vpack.i.b16 %v179_v12, %v179_v12  ;;  %v185_v24 = vsub.s32 3, %v61_v6 }
   0x5   :  { %v85_v14 = vpack.i.b16 %v84_v7, %v84_v7  ;;  %v137_v16 = vpack.i.b16 %v136_v11, %v136_v11  ;;  %v394_v35 = vld [vmem:[%s545_s0] sm:$0xff]   ;;  %s409_s10 = smov 4   ;;  %v395_v40 = vld [vmem:[%s545_s0 + $0x8] sm:$0xff]   ;;  %s410_s13 = smov 1   ;;  %v396_v46 = vld [vmem:[%s545_s0 + $0x10] sm:$0xff]   ;;  %vm76_vm2 = vcmask 39936  }
   0x6   :  { %v63_v19 = vrot.slane %v58_v5, %v62_v13  ;;  %v116_v20 = vrot.slane %v111_v8, %v115_v15  ;;  %v186_v25 = vrot.slane %v181_v23, %v185_v24  ;;  %167 = vst.msk [vmem:[#allocation3 + $0x20] sm:$0xff] %vm30_vm0, %v394_v35  ;;  %176 = vst.msk [vmem:[#allocation3 + $0x28] sm:$0xff] %vm30_vm0, %v395_v40  ;;  %v397_v47 = vld [vmem:[%s545_s0 + $0x18] sm:$0xff]   ;;  %v400_v48 = vld [vmem:[%s546_s2 + $0x4] ss:$8 sps:$4 sm:$0xff]   ;;  %vm103_vm3 = vcmask 31744  }
   0x7   :  { %v90_v21 = vrot.slane %v85_v14, %v62_v13  ;;  %v142_v22 = vrot.slane %v137_v16, %v115_v15  ;;  %210 = vst.msk [vmem:[#allocation3 + $0x38] sm:$0xff] %vm30_vm0, %v396_v46  ;;  %219 = vst.msk [vmem:[#allocation3 + $0x40] sm:$0xff] %vm30_vm0, %v397_v47  ;;  %v403_v49 = vld [vmem:[%s546_s2 + $0x14] ss:$8 sps:$4 sm:$0xff]   ;;  %362 = vmatprep.mubr.msk.bf16.mxu0 %vm275_vm1, %v400_v48  ;;  %v233_v50 = vld [vmem:[%s547_s3] sm:$0xff]  ;;  %vm155_vm4 = vcmask 7168  }
   0x8   :  { %65 = vrot.lane.b32.xlu0 %v63_v19, %s405_s1  ;;  %118 = vrot.lane.b32.xlu1 %v116_v20, %s406_s5  ;;  %v234_v51 = vld [vmem:[%s547_s3 + $0x8] sm:$0xff]  ;;  %v235_v52 = vld [vmem:[%s547_s3 + $0x10] sm:$0xff] }
   0x9   :  { %v55_v26 = vld [vmem:[#allocation2 + $0x28] sm:$0xff]  ;;  %363 = vmatprep.mubr.msk.bf16.mxu1 %vm275_vm1, %v403_v49  ;;  %v236_v53 = vld [vmem:[%s547_s3 + $0x18] sm:$0xff] }
   0xa   :  { %v398_v15 = vld [vmem:[%s546_s2] ss:$8 sps:$4 sm:$0xff]   ;;  %v401_v16 = vld [vmem:[%s546_s2 + $0x10] ss:$8 sps:$4 sm:$0xff]  }
   0xb   :  { %v81_v30 = vld [vmem:[#allocation2 + $0x18] sm:$0xff]  ;;  %v133_v39 = vld [vmem:[#allocation2 + $0x8] sm:$0xff] }
   0xc   :  { %92 = vrot.lane.b32.xlu0 %v90_v21, %s406_s5  ;;  %144 = vrot.lane.b32.xlu1 %v142_v22, %s407_s6 }
   0xd   :  { %v228_v10 = vld [vmem:[#allocation3 + $0x20] sm:$0xff]  ;;  %v229_v11 = vld [vmem:[#allocation3 + $0x28] sm:$0xff] }
   0xe   :  { %v231_v13 = vld [vmem:[#allocation3 + $0x38] sm:$0xff]  ;;  %v232_v14 = vld [vmem:[#allocation3 + $0x40] sm:$0xff] }
  0x10   :  { %188 = vrot.lane.b32.xlu0 %v186_v25, %s407_s6 }
  0x7a   :  { %v66_v27 = vpop.permute.xlu0 %65  ;;  %v119_v31 = vpop.permute.xlu1 %118 }
  0x7b   :  { %v68_v28 = vmul.bf16 0, %v66_v27  ;;  %v69_v29 = vmul.bf16 %v66_v27, %v55_v26  ;;  %v121_v36 = vmul.bf16 0, %v119_v31  ;;  %v122_v37 = vmul.bf16 %v119_v31, %v55_v26 }
  0x7d   :  { %72 = vrot.lane.b32.xlu1 %v68_v28, %s408_s7  ;;  %74 = vrot.lane.b32.xlu0 %v69_v29, %s408_s7 }
  0x7e   :  { %v93_v32 = vpop.permute.xlu0 %92  ;;  %v145_v38 = vpop.permute.xlu1 %144 }
  0x7f   :  { %v95_v33 = vmul.bf16 0, %v93_v32  ;;  %v96_v34 = vmul.bf16 %v93_v32, %v81_v30  ;;  %v147_v41 = vmul.bf16 0, %v145_v38  ;;  %v148_v42 = vmul.bf16 %v145_v38, %v133_v39 }
  0x81   :  { %99 = vrot.lane.b32.xlu1 %v95_v33, %s409_s10  ;;  %101 = vrot.lane.b32.xlu0 %v96_v34, %s409_s10 }
  0x82   :  { %v189_v43 = vpop.permute.xlu0 %188 }
  0x83   :  { %v191_v44 = vmul.bf16 0, %v189_v43  ;;  %v192_v45 = vmul.bf16 %v189_v43, %v55_v26 }
  0x85   :  { %125 = vrot.lane.b32.xlu1 %v121_v36, %s409_s10  ;;  %127 = vrot.lane.b32.xlu0 %v122_v37, %s409_s10 }
  0x89   :  { %151 = vrot.lane.b32.xlu1 %v147_v41, %s410_s13  ;;  %153 = vrot.lane.b32.xlu0 %v148_v42, %s410_s13 }
  0x8d   :  { %195 = vrot.lane.b32.xlu1 %v191_v44, %s410_s13  ;;  %197 = vrot.lane.b32.xlu0 %v192_v45, %s410_s13 }
  0x91   :  { %239 = vperm.xlu1 %389, %v233_v50   ;;  %244 = vperm.xlu0 %390, %v234_v51  }
  0x95   :  { %249 = vperm.xlu1 %389, %v235_v52  }
  0x99   :  { %254 = vperm.xlu1 %389, %v236_v53  }
  0xef   :  { %v73_v54 = vpop.permute.xlu1 %72  ;;  %v75_v55 = vpop.permute.xlu0 %74 }
  0xf0   :  { %v77_v56 = vsel %vm76_vm2, %v73_v54, %v75_v55 }
  0xf1   :  { %79 = vst.msk [vmem:[#allocation3] sm:$0xff] %vm30_vm0, %v77_v56 }
  0xf3   :  { %v100_v57 = vpop.permute.xlu1 %99  ;;  %v102_v58 = vpop.permute.xlu0 %101 }
  0xf4   :  { %v104_v59 = vsel %vm103_vm3, %v100_v57, %v102_v58 }
  0xf5   :  { %106 = vst.msk [vmem:[#allocation3 + $0x8] sm:$0xff] %vm30_vm0, %v104_v59 }
  0xf7   :  { %v126_v60 = vpop.permute.xlu1 %125  ;;  %v128_v61 = vpop.permute.xlu0 %127 }
  0xf8   :  { %v129_v62 = vsel %vm103_vm3, %v126_v60, %v128_v61  ;;  %v224_v63 = vld [vmem:[#allocation3] sm:$0xff] }
  0xf9   :  { %131 = vst.msk [vmem:[#allocation3 + $0x10] sm:$0xff] %vm30_vm0, %v129_v62  ;;  %283 = vmatpush1.bf16.msra.mxu0 %v224_v63  ;;  %373 = vmatpush1.bf16.msra.mxu1 %v224_v63 }
  0xfa   :  { %284 = vmatprep.subr.bf16.mxu0 %v404_v4  ;;  %365 = vmatprep.subr.bf16.mxu1 %v404_v4 }
  0xfb   :  { %v152_v0 = vpop.permute.xlu1 %151  ;;  %v154_v1 = vpop.permute.xlu0 %153 }
  0xfc   :  { %v156_v2 = vsel %vm155_vm4, %v152_v0, %v154_v1  ;;  %v225_v3 = vld [vmem:[#allocation3 + $0x8] sm:$0xff] }
  0xfd   :  { %158 = vst.msk [vmem:[#allocation3 + $0x18] sm:$0xff] %vm30_vm0, %v156_v2  ;;  %285 = vmatpush1.bf16.msra.mxu0 %v225_v3  ;;  %374 = vmatpush1.bf16.msra.mxu1 %v225_v3 }
  0xfe   :  { %286 = vmatprep.subr.bf16.mxu0 %v404_v4  ;;  %366 = vmatprep.subr.bf16.mxu1 %v404_v4 }
  0xff   :  { %v196_v5 = vpop.permute.xlu1 %195  ;;  %v198_v6 = vpop.permute.xlu0 %197 }
 0x100   :  { %v226_v7 = vld [vmem:[#allocation3 + $0x10] sm:$0xff]  ;;  %v199_v8 = vsel %vm155_vm4, %v196_v5, %v198_v6 }
 0x101   :  { %287 = vmatpush1.bf16.msra.mxu0 %v226_v7  ;;  %375 = vmatpush1.bf16.msra.mxu1 %v226_v7  ;;  %201 = vst.msk [vmem:[#allocation3 + $0x30] sm:$0xff] %vm30_vm0, %v199_v8 }
 0x102   :  { %288 = vmatprep.subr.bf16.mxu0 %v404_v4  ;;  %367 = vmatprep.subr.bf16.mxu1 %v404_v4 }
 0x104   :  { %v227_v9 = vld [vmem:[#allocation3 + $0x18] sm:$0xff] }
 0x105   :  { %289 = vmatpush1.bf16.msra.mxu0 %v227_v9  ;;  %376 = vmatpush1.bf16.msra.mxu1 %v227_v9 }
 0x106   :  { %290 = vmatprep.subr.bf16.mxu0 %v404_v4  ;;  %368 = vmatprep.subr.bf16.mxu1 %v404_v4 }
 0x108   :  { %v230_v12 = vld [vmem:[#allocation3 + $0x30] sm:$0xff] }
 0x109   :  { %291 = vmatpush1.bf16.msra.mxu0 %v228_v10  ;;  %377 = vmatpush1.bf16.msra.mxu1 %v228_v10 }
 0x10a   :  { %292 = vmatprep.subr.bf16.mxu0 %v404_v4  ;;  %369 = vmatprep.subr.bf16.mxu1 %v404_v4 }
 0x10d   :  { %293 = vmatpush1.bf16.msra.mxu0 %v229_v11  ;;  %378 = vmatpush1.bf16.msra.mxu1 %v229_v11 }
 0x10e   :  { %294 = vmatprep.subr.bf16.mxu0 %v404_v4  ;;  %370 = vmatprep.subr.bf16.mxu1 %v404_v4 }
 0x110   :  { %v240_v17 = vpop.permute.xlu1 %239  ;;  %v245_v20 = vpop.permute.xlu0 %244 }
 0x111   :  { %295 = vmatpush1.bf16.msra.mxu0 %v230_v12  ;;  %379 = vmatpush1.bf16.msra.mxu1 %v230_v12 }
 0x112   :  { %296 = vmatprep.subr.bf16.mxu0 %v404_v4  ;;  %371 = vmatprep.subr.bf16.mxu1 %v404_v4 }
 0x114   :  { %v250_v18 = vpop.permute.xlu1 %249 }
 0x115   :  { %297 = vmatpush1.bf16.msra.mxu0 %v231_v13  ;;  %380 = vmatpush1.bf16.msra.mxu1 %v231_v13 }
 0x116   :  { %298 = vmatprep.subr.bf16.mxu0 %v404_v4  ;;  %372 = vmatprep.subr.bf16.mxu1 %v404_v4 }
 0x118   :  { %v255_v19 = vpop.permute.xlu1 %254 }
 0x119   :  { %299 = vmatpush1.bf16.msra.mxu0 %v232_v14  ;;  %381 = vmatpush1.bf16.msra.mxu1 %v232_v14 }
 0x11c   :  { %315 = vmatmul.mubr.bf16.vlgmr.msra.gmra.mrb[0].mxu0 %v398_v15  ;;  %323 = vmatmul.mubr.bf16.vlgmr.msra.gmra.mrb[0].mxu1 %v401_v16 }
 0x1ef   :  { %v316_v21 = vpop.f32.mrb[0].mxu0  ;;  %v324_v22 = vpop.f32.mrb[0].mxu1 }
 0x1f0   :  { %v317_v4 = vadd.f32 %v316_v21, %v240_v17  ;;  %v325_v23 = vadd.f32 %v324_v22, %v250_v18  ;;  %v318_v24 = vpop.f32.mrb[1].mxu0  ;;  %v326_v25 = vpop.f32.mrb[1].mxu1 }
 0x1f1   :  { %v319_v26 = vpop.f32.mrb[2].mxu0  ;;  %v327_v27 = vpop.f32.mrb[2].mxu1 }
 0x1f2   :  { %331 = vst.msk [vmem:[%s548_s4] sm:$0xff] %vm30_vm0, %v317_v4  ;;  %333 = vst.msk [vmem:[%s548_s4 + $0x10] sm:$0xff] %vm30_vm0, %v325_v23  ;;  %v328_v28 = vadd.f32 %v327_v27, %v255_v19  ;;  %v320_v29 = vadd.f32 %v319_v26, %v245_v20  ;;  %v321_v30 = vpop.f32.mrb[3].mxu0  ;;  %v329_v31 = vpop.f32.mrb[3].mxu1 }
 0x1f4   :  { %334 = vst.msk [vmem:[%s548_s4 + $0x18] sm:$0xff] %vm30_vm0, %v328_v28  ;;  %332 = vst.msk [vmem:[%s548_s4 + $0x8] sm:$0xff] %vm30_vm0, %v320_v29 }

</bundles_post_ra>
